<compile_context>
chip_gen: v7x
topology: tpu7x:2x2x1
jax: 0.10.0
libtpu: 0.0.40
codegen_flags: <defaults>
</compile_context>

<pallas_src>
import jax
import jax.numpy as jnp
from jax.experimental import pallas as pl
from jax.experimental.pallas import tpu as pltpu

L = 70          # sequence length, fixed by nn.Linear(70, 7)
KSIZE = 3       # conv kernel size
BN_EPS = 1e-5
TB_MAX = 128    # batch tile: a few MB of live VMEM, safe on v5e/v6e/v7x


# ----------------------------------------------------------------------------
# shared math helpers (used both inside the kernel and by the matched ref)
# ----------------------------------------------------------------------------
def _im2col_reflect(a):
    """a: (B, L, C) -> (B, L, 3*C); taps ordered [l-1, l, l+1], reflect pad 1."""
    left = jnp.concatenate([a[:, 1:2, :], a[:, :L - 1, :]], axis=1)
    right = jnp.concatenate([a[:, 1:, :], a[:, L - 2:L - 1, :]], axis=1)
    return jnp.concatenate([left, a, right], axis=-1)


def _conv_matmul(a_bf16, w_bf16):
    """(B, L, Cin) bf16 x (3*Cin, Cout) bf16 -> (B, L, Cout) f32."""
    return jnp.einsum('blk,kd->bld', _im2col_reflect(a_bf16), w_bf16,
                      preferred_element_type=jnp.float32)


# ----------------------------------------------------------------------------
# kernel
# ----------------------------------------------------------------------------
def _model_kernel(x_ref,
                  w1_ref, b1_ref, w2_ref, b2_ref, w3_ref, b3_ref,
                  w4_ref, b4_ref, w5_ref, s5_ref, t5_ref,
                  wl_ref, bl_ref,
                  out_ref):
    x = x_ref[...].astype(jnp.bfloat16)                       # (TB, L, 1)

    def conv(a_f32_or_bf16, w_ref, b_ref):
        h = _conv_matmul(a_f32_or_bf16.astype(jnp.bfloat16), w_ref[...])
        return jnp.maximum(h + b_ref[...].reshape(1, 1, -1), 0.0)

    # conv stack (Dropout1d layers are inference-mode identity)
    h = conv(x, w1_ref, b1_ref)                               # (TB, L, 32)
    h = conv(h, w2_ref, b2_ref)                               # (TB, L, 32)
    h = conv(h, w3_ref, b3_ref)                               # (TB, L, 16)
    h = conv(h, w4_ref, b4_ref)                               # (TB, L, 12)

    # conv5 (bias folded) + BatchNorm1d eval affine + ReLU, all in f32
    h = _conv_matmul(h.astype(jnp.bfloat16), w5_ref[...])     # (TB, L, 12)
    h = jnp.maximum(h * s5_ref[...].reshape(1, 1, -1)
                    + t5_ref[...].reshape(1, 1, -1), 0.0)

    # AvgPool over the 12 channels: the 1/12 is folded into wl, so just sum.
    pooled = jnp.sum(h, axis=-1)                              # (TB, L) f32

    # Linear(70 -> 7)
    out = jnp.dot(pooled.astype(jnp.bfloat16), wl_ref[...],
                  preferred_element_type=jnp.float32)
    out_ref[...] = out + bl_ref[...]


# ----------------------------------------------------------------------------
# wrapper
# ----------------------------------------------------------------------------
def _prepare_constants(params):
    """Fold constants and pre-layout weights for the kernel (trace time)."""
    def w2d(w):  # (K, Cin, Cout) f32 -> (K*Cin, Cout) bf16, tap-major rows
        k, cin, cout = w.shape
        return w.reshape(k * cin, cout).astype(jnp.bfloat16)

    s5 = params['bn_scale']                                    # (1, 12)
    t5 = params['bn_shift'] + params['bn_scale'] * params['b5']
    wl = (params['wl'] / 12.0).astype(jnp.bfloat16)            # fold 1/12 pool

    return (w2d(params['w1']), params['b1'],
            w2d(params['w2']), params['b2'],
            w2d(params['w3']), params['b3'],
            w2d(params['w4']), params['b4'],
            w2d(params['w5']), s5, t5,
            wl, params['bl'])


def torch_model_forward(x_ncl, params, *, tb=TB_MAX):
    """x_ncl: (B, 1, 70) float32, like the PyTorch module input."""
    B = x_ncl.shape[0]
    x = jnp.transpose(x_ncl, (0, 2, 1)).astype(jnp.float32)    # (B, L, 1)
    consts = _prepare_constants(params)

    tb = min(tb, B)
    nb = pl.cdiv(B, tb)

    def const_spec(a):
        nd = a.ndim
        return pl.BlockSpec(a.shape, lambda i: (0,) * nd)      # resident weights

    in_specs = [pl.BlockSpec((tb, L, 1), lambda i: (i, 0, 0))]
    in_specs += [const_spec(c) for c in consts]

    out = pl.pallas_call(
        _model_kernel,
        out_shape=jax.ShapeDtypeStruct((B, 7), jnp.float32),
        grid_spec=pltpu.PrefetchScalarGridSpec(
            num_scalar_prefetch=0,
            grid=(nb,),
            in_specs=in_specs,
            out_specs=pl.BlockSpec((tb, 7), lambda i: (i, 0))),
        compiler_params=pltpu.CompilerParams(
            dimension_semantics=("parallel",)),
    )(x, *consts)

    if B == 1:
        # mirror torch `x.squeeze()`: for batch size 1 the output is (7,)
        return out[0]
    return out


# ----------------------------------------------------------------------------
# synthetic params + references
# ----------------------------------------------------------------------------
def init_params(key):
    """Deterministic synthetic parameters matching the PyTorch module shapes."""
    ks = list(jax.random.split(key, 12))

    def conv(kw, kb, cin, cout):
        bound = 1.0 / jnp.sqrt(float(cin * KSIZE))
        # stored as (KSIZE, Cin, Cout)  == torch (Cout, Cin, K) transposed
        w = jax.random.uniform(kw, (KSIZE, cin, cout), jnp.float32, -bound, bound)
        b = jax.random.uniform(kb, (1, cout), jnp.float32, -bound, bound)
        return w, b

    w1, b1 = conv(ks[0], ks[1], 1, 32)
    w2, b2 = conv(ks[2], ks[3], 32, 32)
    w3, b3 = conv(ks[4], ks[5], 32, 16)
    w4, b4 = conv(ks[6], ks[7], 16, 12)
    w5, b5 = conv(ks[8], ks[9], 12, 12)

    # BatchNorm1d(12) default init: gamma=1, beta=0, running_mean=0, running_var=1
    gamma = jnp.ones((1, 12), jnp.float32)
    beta = jnp.zeros((1, 12), jnp.float32)
    r_mean = jnp.zeros((1, 12), jnp.float32)
    r_var = jnp.ones((1, 12), jnp.float32)
    bn_scale = gamma / jnp.sqrt(r_var + BN_EPS)
    bn_shift = beta - r_mean * bn_scale

    lbound = 1.0 / jnp.sqrt(float(L))
    wl = jax.random.uniform(ks[10], (L, 7), jnp.float32, -lbound, lbound)
    bl = jax.random.uniform(ks[11], (1, 7), jnp.float32, -lbound, lbound)

    return dict(w1=w1, b1=b1, w2=w2, b2=b2, w3=w3, b3=b3, w4=w4, b4=b4,
                w5=w5, b5=b5, bn_scale=bn_scale, bn_shift=bn_shift,
                wl=wl, bl=bl)


def ref_forward_f32(x_ncl, p):
    """Straightforward f32 reference of the module math (eval dropout/BN)."""
    x = jnp.transpose(x_ncl, (0, 2, 1)).astype(jnp.float32)

    def conv(h, w, b):
        hp = jnp.pad(h, ((0, 0), (1, 1), (0, 0)), mode='reflect')
        y = sum(jnp.einsum('blc,cd->bld', hp[:, k:k + L, :], w[k])
                for k in range(KSIZE))
        return y + b.reshape(1, 1, -1)

    h = jnp.maximum(conv(x, p['w1'], p['b1']), 0.0)
    h = jnp.maximum(conv(h, p['w2'], p['b2']), 0.0)
    h = jnp.maximum(conv(h, p['w3'], p['b3']), 0.0)
    h = jnp.maximum(conv(h, p['w4'], p['b4']), 0.0)
    h = conv(h, p['w5'], p['b5'])
    h = jnp.maximum(h * p['bn_scale'].reshape(1, 1, -1)
                    + p['bn_shift'].reshape(1, 1, -1), 0.0)
    pooled = jnp.mean(h, axis=-1)
    return pooled @ p['wl'] + p['bl']


def ref_forward_matched(x_ncl, params):
    """Pure-JAX mirror of the kernel math (bf16 MXU operands, folded consts)."""
    (w1, b1, w2, b2, w3, b3, w4, b4, w5, s5, t5, wl, bl) = _prepare_constants(params)
    x = jnp.transpose(x_ncl, (0, 2, 1)).astype(jnp.bfloat16)

    def conv(a, w, b):
        return jnp.maximum(_conv_matmul(a.astype(jnp.bfloat16), w)
                           + b.reshape(1, 1, -1), 0.0)

    h = conv(x, w1, b1)
    h = conv(h, w2, b2)
    h = conv(h, w3, b3)
    h = conv(h, w4, b4)
    h = _conv_matmul(h.astype(jnp.bfloat16), w5)
    h = jnp.maximum(h * s5.reshape(1, 1, -1) + t5.reshape(1, 1, -1), 0.0)
    pooled = jnp.sum(h, axis=-1)
    return jnp.dot(pooled.astype(jnp.bfloat16), wl,
                   preferred_element_type=jnp.float32) + bl


if __name__ == "__main__":
    key = jax.random.PRNGKey(0)
    pkey, xkey = jax.random.split(key)
    params = init_params(pkey)

    B = 2
    x = jax.random.normal(xkey, (B, 1, L), jnp.float32)   # NCL, as PyTorch expects

    out = jax.block_until_ready(torch_model_forward(x, params))
    assert out.shape == (B, 7), out.shape

    ref_m = ref_forward_matched(x, params)   # same math (bf16 operands)
    ref_f = ref_forward_f32(x, params)       # unfused f32 semantics check

    err_m = float(jnp.max(jnp.abs(out - ref_m)))
    err_f = float(jnp.max(jnp.abs(out - ref_f)))
    assert err_m < 1e-2, f"mismatch vs matched bf16 reference: max abs err {err_m}"
    assert err_f < 5e-2, f"mismatch vs f32 reference: max abs err {err_f}"

    print("KERNEL_OK")
</pallas_src>

<mosaic_0001>
module attributes {stable_mosaic.version = 11 : i64} {
  func.func @_model_kernel(%arg0: i32, %arg1: memref<2x70x1xf32, #tpu.memory_space<vmem>>, %arg2: memref<3x32xbf16, #tpu.memory_space<vmem>>, %arg3: memref<1x32xf32, #tpu.memory_space<vmem>>, %arg4: memref<96x32xbf16, #tpu.memory_space<vmem>>, %arg5: memref<1x32xf32, #tpu.memory_space<vmem>>, %arg6: memref<96x16xbf16, #tpu.memory_space<vmem>>, %arg7: memref<1x16xf32, #tpu.memory_space<vmem>>, %arg8: memref<48x12xbf16, #tpu.memory_space<vmem>>, %arg9: memref<1x12xf32, #tpu.memory_space<vmem>>, %arg10: memref<36x12xbf16, #tpu.memory_space<vmem>>, %arg11: memref<1x12xf32, #tpu.memory_space<vmem>>, %arg12: memref<1x12xf32, #tpu.memory_space<vmem>>, %arg13: memref<70x7xbf16, #tpu.memory_space<vmem>>, %arg14: memref<1x7xf32, #tpu.memory_space<vmem>>, %arg15: memref<2x7xf32, #tpu.memory_space<vmem>>) attributes {dimension_semantics = [#tpu.dimension_semantics<parallel>], iteration_bounds = array<i64: 1>, scalar_prefetch = 0 : i64, scratch_operands = 0 : i64, tpu.core_type = #tpu.core_type<tc>, window_params = [{transform_indices = @transform_0, window_bounds = array<i64: 2, 70, 1>}, {pipeline_mode = #tpu.pipeline_mode<synchronous>, transform_indices = @transform_1, window_bounds = array<i64: 3, 32>}, {pipeline_mode = #tpu.pipeline_mode<synchronous>, transform_indices = @transform_2, window_bounds = array<i64: 1, 32>}, {pipeline_mode = #tpu.pipeline_mode<synchronous>, transform_indices = @transform_3, window_bounds = array<i64: 96, 32>}, {pipeline_mode = #tpu.pipeline_mode<synchronous>, transform_indices = @transform_4, window_bounds = array<i64: 1, 32>}, {pipeline_mode = #tpu.pipeline_mode<synchronous>, transform_indices = @transform_5, window_bounds = array<i64: 96, 16>}, {pipeline_mode = #tpu.pipeline_mode<synchronous>, transform_indices = @transform_6, window_bounds = array<i64: 1, 16>}, {pipeline_mode = #tpu.pipeline_mode<synchronous>, transform_indices = @transform_7, window_bounds = array<i64: 48, 12>}, {pipeline_mode = #tpu.pipeline_mode<synchronous>, transform_indices = @transform_8, window_bounds = array<i64: 1, 12>}, {pipeline_mode = #tpu.pipeline_mode<synchronous>, transform_indices = @transform_9, window_bounds = array<i64: 36, 12>}, {pipeline_mode = #tpu.pipeline_mode<synchronous>, transform_indices = @transform_10, window_bounds = array<i64: 1, 12>}, {pipeline_mode = #tpu.pipeline_mode<synchronous>, transform_indices = @transform_11, window_bounds = array<i64: 1, 12>}, {pipeline_mode = #tpu.pipeline_mode<synchronous>, transform_indices = @transform_12, window_bounds = array<i64: 70, 7>}, {pipeline_mode = #tpu.pipeline_mode<synchronous>, transform_indices = @transform_13, window_bounds = array<i64: 1, 7>}, {transform_indices = @transform_14, window_bounds = array<i64: 2, 7>}]} {
    %c0 = arith.constant 0 : index
    %c0_0 = arith.constant 0 : index
    %c0_1 = arith.constant 0 : index
    %0 = vector.load %arg1[%c0, %c0_0, %c0_1] : memref<2x70x1xf32, #tpu.memory_space<vmem>>, vector<2x70x1xf32>
    %1 = arith.truncf %0 : vector<2x70x1xf32> to vector<2x70x1xbf16>
    %c0_2 = arith.constant 0 : index
    %c0_3 = arith.constant 0 : index
    %2 = vector.load %arg2[%c0_2, %c0_3] : memref<3x32xbf16, #tpu.memory_space<vmem>>, vector<3x32xbf16>
    %3 = vector.extract_strided_slice %1 {offsets = [0, 1, 0], sizes = [2, 1, 1], strides = [1, 1, 1]} : vector<2x70x1xbf16> to vector<2x1x1xbf16>
    %4 = vector.extract_strided_slice %1 {offsets = [0, 0, 0], sizes = [2, 69, 1], strides = [1, 1, 1]} : vector<2x70x1xbf16> to vector<2x69x1xbf16>
    %5 = tpu.concatenate %3, %4 in 1 : vector<2x1x1xbf16>, vector<2x69x1xbf16> -> vector<2x70x1xbf16>
    %6 = vector.extract_strided_slice %1 {offsets = [0, 1, 0], sizes = [2, 69, 1], strides = [1, 1, 1]} : vector<2x70x1xbf16> to vector<2x69x1xbf16>
    %7 = vector.extract_strided_slice %1 {offsets = [0, 68, 0], sizes = [2, 1, 1], strides = [1, 1, 1]} : vector<2x70x1xbf16> to vector<2x1x1xbf16>
    %8 = tpu.concatenate %6, %7 in 1 : vector<2x69x1xbf16>, vector<2x1x1xbf16> -> vector<2x70x1xbf16>
    %9 = tpu.concatenate %5, %1, %8 in 2 : vector<2x70x1xbf16>, vector<2x70x1xbf16>, vector<2x70x1xbf16> -> vector<2x70x3xbf16>
    "tpu.trace_start"() <{level = 10 : i32, message = "blk,kd->bld"}> : () -> ()
    %cst = arith.constant dense<0.000000e+00> : vector<2x70x32xf32>
    %10 = tpu.matmul %9, %2, %cst {dimension_numbers = #tpu.dot_dimension_numbers<[2], [0], [0, 1], [1], [0, 0, 0, 1, 1, 1], [], []>} : vector<2x70x3xbf16>, vector<3x32xbf16>, vector<2x70x32xf32> -> vector<2x70x32xf32>
    "tpu.trace_stop"() : () -> ()
    %c0_4 = arith.constant 0 : index
    %c0_5 = arith.constant 0 : index
    %11 = vector.load %arg3[%c0_4, %c0_5] : memref<1x32xf32, #tpu.memory_space<vmem>>, vector<1x32xf32>
    %12 = vector.shape_cast %11 : vector<1x32xf32> to vector<1x1x32xf32>
    %13 = vector.broadcast %12 : vector<1x1x32xf32> to vector<2x70x32xf32>
    %14 = arith.addf %10, %13 : vector<2x70x32xf32>
    %cst_6 = arith.constant 0.000000e+00 : f32
    %15 = vector.broadcast %cst_6 : f32 to vector<2x70x32xf32>
    %16 = arith.maximumf %14, %15 : vector<2x70x32xf32>
    %17 = arith.truncf %16 : vector<2x70x32xf32> to vector<2x70x32xbf16>
    %c0_7 = arith.constant 0 : index
    %c0_8 = arith.constant 0 : index
    %18 = vector.load %arg4[%c0_7, %c0_8] : memref<96x32xbf16, #tpu.memory_space<vmem>>, vector<96x32xbf16>
    %19 = vector.extract_strided_slice %17 {offsets = [0, 1, 0], sizes = [2, 1, 32], strides = [1, 1, 1]} : vector<2x70x32xbf16> to vector<2x1x32xbf16>
    %20 = vector.extract_strided_slice %17 {offsets = [0, 0, 0], sizes = [2, 69, 32], strides = [1, 1, 1]} : vector<2x70x32xbf16> to vector<2x69x32xbf16>
    %21 = tpu.concatenate %19, %20 in 1 : vector<2x1x32xbf16>, vector<2x69x32xbf16> -> vector<2x70x32xbf16>
    %22 = vector.extract_strided_slice %17 {offsets = [0, 1, 0], sizes = [2, 69, 32], strides = [1, 1, 1]} : vector<2x70x32xbf16> to vector<2x69x32xbf16>
    %23 = vector.extract_strided_slice %17 {offsets = [0, 68, 0], sizes = [2, 1, 32], strides = [1, 1, 1]} : vector<2x70x32xbf16> to vector<2x1x32xbf16>
    %24 = tpu.concatenate %22, %23 in 1 : vector<2x69x32xbf16>, vector<2x1x32xbf16> -> vector<2x70x32xbf16>
    %25 = tpu.concatenate %21, %17, %24 in 2 : vector<2x70x32xbf16>, vector<2x70x32xbf16>, vector<2x70x32xbf16> -> vector<2x70x96xbf16>
    "tpu.trace_start"() <{level = 10 : i32, message = "blk,kd->bld"}> : () -> ()
    %cst_9 = arith.constant dense<0.000000e+00> : vector<2x70x32xf32>
    %26 = tpu.matmul %25, %18, %cst_9 {dimension_numbers = #tpu.dot_dimension_numbers<[2], [0], [0, 1], [1], [0, 0, 0, 1, 1, 1], [], []>} : vector<2x70x96xbf16>, vector<96x32xbf16>, vector<2x70x32xf32> -> vector<2x70x32xf32>
    "tpu.trace_stop"() : () -> ()
    %c0_10 = arith.constant 0 : index
    %c0_11 = arith.constant 0 : index
    %27 = vector.load %arg5[%c0_10, %c0_11] : memref<1x32xf32, #tpu.memory_space<vmem>>, vector<1x32xf32>
    %28 = vector.shape_cast %27 : vector<1x32xf32> to vector<1x1x32xf32>
    %29 = vector.broadcast %28 : vector<1x1x32xf32> to vector<2x70x32xf32>
    %30 = arith.addf %26, %29 : vector<2x70x32xf32>
    %cst_12 = arith.constant 0.000000e+00 : f32
    %31 = vector.broadcast %cst_12 : f32 to vector<2x70x32xf32>
    %32 = arith.maximumf %30, %31 : vector<2x70x32xf32>
    %33 = arith.truncf %32 : vector<2x70x32xf32> to vector<2x70x32xbf16>
    %c0_13 = arith.constant 0 : index
    %c0_14 = arith.constant 0 : index
    %34 = vector.load %arg6[%c0_13, %c0_14] : memref<96x16xbf16, #tpu.memory_space<vmem>>, vector<96x16xbf16>
    %35 = vector.extract_strided_slice %33 {offsets = [0, 1, 0], sizes = [2, 1, 32], strides = [1, 1, 1]} : vector<2x70x32xbf16> to vector<2x1x32xbf16>
    %36 = vector.extract_strided_slice %33 {offsets = [0, 0, 0], sizes = [2, 69, 32], strides = [1, 1, 1]} : vector<2x70x32xbf16> to vector<2x69x32xbf16>
    %37 = tpu.concatenate %35, %36 in 1 : vector<2x1x32xbf16>, vector<2x69x32xbf16> -> vector<2x70x32xbf16>
    %38 = vector.extract_strided_slice %33 {offsets = [0, 1, 0], sizes = [2, 69, 32], strides = [1, 1, 1]} : vector<2x70x32xbf16> to vector<2x69x32xbf16>
    %39 = vector.extract_strided_slice %33 {offsets = [0, 68, 0], sizes = [2, 1, 32], strides = [1, 1, 1]} : vector<2x70x32xbf16> to vector<2x1x32xbf16>
    %40 = tpu.concatenate %38, %39 in 1 : vector<2x69x32xbf16>, vector<2x1x32xbf16> -> vector<2x70x32xbf16>
    %41 = tpu.concatenate %37, %33, %40 in 2 : vector<2x70x32xbf16>, vector<2x70x32xbf16>, vector<2x70x32xbf16> -> vector<2x70x96xbf16>
    "tpu.trace_start"() <{level = 10 : i32, message = "blk,kd->bld"}> : () -> ()
    %cst_15 = arith.constant dense<0.000000e+00> : vector<2x70x16xf32>
    %42 = tpu.matmul %41, %34, %cst_15 {dimension_numbers = #tpu.dot_dimension_numbers<[2], [0], [0, 1], [1], [0, 0, 0, 1, 1, 1], [], []>} : vector<2x70x96xbf16>, vector<96x16xbf16>, vector<2x70x16xf32> -> vector<2x70x16xf32>
    "tpu.trace_stop"() : () -> ()
    %c0_16 = arith.constant 0 : index
    %c0_17 = arith.constant 0 : index
    %43 = vector.load %arg7[%c0_16, %c0_17] : memref<1x16xf32, #tpu.memory_space<vmem>>, vector<1x16xf32>
    %44 = vector.shape_cast %43 : vector<1x16xf32> to vector<1x1x16xf32>
    %45 = vector.broadcast %44 : vector<1x1x16xf32> to vector<2x70x16xf32>
    %46 = arith.addf %42, %45 : vector<2x70x16xf32>
    %cst_18 = arith.constant 0.000000e+00 : f32
    %47 = vector.broadcast %cst_18 : f32 to vector<2x70x16xf32>
    %48 = arith.maximumf %46, %47 : vector<2x70x16xf32>
    %49 = arith.truncf %48 : vector<2x70x16xf32> to vector<2x70x16xbf16>
    %c0_19 = arith.constant 0 : index
    %c0_20 = arith.constant 0 : index
    %50 = vector.load %arg8[%c0_19, %c0_20] : memref<48x12xbf16, #tpu.memory_space<vmem>>, vector<48x12xbf16>
    %51 = vector.extract_strided_slice %49 {offsets = [0, 1, 0], sizes = [2, 1, 16], strides = [1, 1, 1]} : vector<2x70x16xbf16> to vector<2x1x16xbf16>
    %52 = vector.extract_strided_slice %49 {offsets = [0, 0, 0], sizes = [2, 69, 16], strides = [1, 1, 1]} : vector<2x70x16xbf16> to vector<2x69x16xbf16>
    %53 = tpu.concatenate %51, %52 in 1 : vector<2x1x16xbf16>, vector<2x69x16xbf16> -> vector<2x70x16xbf16>
    %54 = vector.extract_strided_slice %49 {offsets = [0, 1, 0], sizes = [2, 69, 16], strides = [1, 1, 1]} : vector<2x70x16xbf16> to vector<2x69x16xbf16>
    %55 = vector.extract_strided_slice %49 {offsets = [0, 68, 0], sizes = [2, 1, 16], strides = [1, 1, 1]} : vector<2x70x16xbf16> to vector<2x1x16xbf16>
    %56 = tpu.concatenate %54, %55 in 1 : vector<2x69x16xbf16>, vector<2x1x16xbf16> -> vector<2x70x16xbf16>
    %57 = tpu.concatenate %53, %49, %56 in 2 : vector<2x70x16xbf16>, vector<2x70x16xbf16>, vector<2x70x16xbf16> -> vector<2x70x48xbf16>
    "tpu.trace_start"() <{level = 10 : i32, message = "blk,kd->bld"}> : () -> ()
    %cst_21 = arith.constant dense<0.000000e+00> : vector<2x70x12xf32>
    %58 = tpu.matmul %57, %50, %cst_21 {dimension_numbers = #tpu.dot_dimension_numbers<[2], [0], [0, 1], [1], [0, 0, 0, 1, 1, 1], [], []>} : vector<2x70x48xbf16>, vector<48x12xbf16>, vector<2x70x12xf32> -> vector<2x70x12xf32>
    "tpu.trace_stop"() : () -> ()
    %c0_22 = arith.constant 0 : index
    %c0_23 = arith.constant 0 : index
    %59 = vector.load %arg9[%c0_22, %c0_23] : memref<1x12xf32, #tpu.memory_space<vmem>>, vector<1x12xf32>
    %60 = vector.shape_cast %59 : vector<1x12xf32> to vector<1x1x12xf32>
    %61 = vector.broadcast %60 : vector<1x1x12xf32> to vector<2x70x12xf32>
    %62 = arith.addf %58, %61 : vector<2x70x12xf32>
    %cst_24 = arith.constant 0.000000e+00 : f32
    %63 = vector.broadcast %cst_24 : f32 to vector<2x70x12xf32>
    %64 = arith.maximumf %62, %63 : vector<2x70x12xf32>
    %65 = arith.truncf %64 : vector<2x70x12xf32> to vector<2x70x12xbf16>
    %c0_25 = arith.constant 0 : index
    %c0_26 = arith.constant 0 : index
    %66 = vector.load %arg10[%c0_25, %c0_26] : memref<36x12xbf16, #tpu.memory_space<vmem>>, vector<36x12xbf16>
    %67 = vector.extract_strided_slice %65 {offsets = [0, 1, 0], sizes = [2, 1, 12], strides = [1, 1, 1]} : vector<2x70x12xbf16> to vector<2x1x12xbf16>
    %68 = vector.extract_strided_slice %65 {offsets = [0, 0, 0], sizes = [2, 69, 12], strides = [1, 1, 1]} : vector<2x70x12xbf16> to vector<2x69x12xbf16>
    %69 = tpu.concatenate %67, %68 in 1 : vector<2x1x12xbf16>, vector<2x69x12xbf16> -> vector<2x70x12xbf16>
    %70 = vector.extract_strided_slice %65 {offsets = [0, 1, 0], sizes = [2, 69, 12], strides = [1, 1, 1]} : vector<2x70x12xbf16> to vector<2x69x12xbf16>
    %71 = vector.extract_strided_slice %65 {offsets = [0, 68, 0], sizes = [2, 1, 12], strides = [1, 1, 1]} : vector<2x70x12xbf16> to vector<2x1x12xbf16>
    %72 = tpu.concatenate %70, %71 in 1 : vector<2x69x12xbf16>, vector<2x1x12xbf16> -> vector<2x70x12xbf16>
    %73 = tpu.concatenate %69, %65, %72 in 2 : vector<2x70x12xbf16>, vector<2x70x12xbf16>, vector<2x70x12xbf16> -> vector<2x70x36xbf16>
    "tpu.trace_start"() <{level = 10 : i32, message = "blk,kd->bld"}> : () -> ()
    %cst_27 = arith.constant dense<0.000000e+00> : vector<2x70x12xf32>
    %74 = tpu.matmul %73, %66, %cst_27 {dimension_numbers = #tpu.dot_dimension_numbers<[2], [0], [0, 1], [1], [0, 0, 0, 1, 1, 1], [], []>} : vector<2x70x36xbf16>, vector<36x12xbf16>, vector<2x70x12xf32> -> vector<2x70x12xf32>
    "tpu.trace_stop"() : () -> ()
    %c0_28 = arith.constant 0 : index
    %c0_29 = arith.constant 0 : index
    %75 = vector.load %arg11[%c0_28, %c0_29] : memref<1x12xf32, #tpu.memory_space<vmem>>, vector<1x12xf32>
    %76 = vector.shape_cast %75 : vector<1x12xf32> to vector<1x1x12xf32>
    %77 = vector.broadcast %76 : vector<1x1x12xf32> to vector<2x70x12xf32>
    %78 = arith.mulf %74, %77 : vector<2x70x12xf32>
    %c0_30 = arith.constant 0 : index
    %c0_31 = arith.constant 0 : index
    %79 = vector.load %arg12[%c0_30, %c0_31] : memref<1x12xf32, #tpu.memory_space<vmem>>, vector<1x12xf32>
    %80 = vector.shape_cast %79 : vector<1x12xf32> to vector<1x1x12xf32>
    %81 = vector.broadcast %80 : vector<1x1x12xf32> to vector<2x70x12xf32>
    %82 = arith.addf %78, %81 : vector<2x70x12xf32>
    %cst_32 = arith.constant 0.000000e+00 : f32
    %83 = vector.broadcast %cst_32 : f32 to vector<2x70x12xf32>
    %84 = arith.maximumf %82, %83 : vector<2x70x12xf32>
    %cst_33 = arith.constant dense<0.000000e+00> : vector<2x70xf32>
    %85 = vector.multi_reduction <add>, %84, %cst_33 [2] : vector<2x70x12xf32> to vector<2x70xf32>
    %86 = arith.truncf %85 : vector<2x70xf32> to vector<2x70xbf16>
    %c0_34 = arith.constant 0 : index
    %c0_35 = arith.constant 0 : index
    %87 = vector.load %arg13[%c0_34, %c0_35] : memref<70x7xbf16, #tpu.memory_space<vmem>>, vector<70x7xbf16>
    %cst_36 = arith.constant dense<0.000000e+00> : vector<2x7xf32>
    %88 = tpu.matmul %86, %87, %cst_36 {dimension_numbers = #tpu.dot_dimension_numbers<[1], [0], [0], [1], [0, 0, 1, 1], [], []>} : vector<2x70xbf16>, vector<70x7xbf16>, vector<2x7xf32> -> vector<2x7xf32>
    %c0_37 = arith.constant 0 : index
    %c0_38 = arith.constant 0 : index
    %89 = vector.load %arg14[%c0_37, %c0_38] : memref<1x7xf32, #tpu.memory_space<vmem>>, vector<1x7xf32>
    %90 = vector.broadcast %89 : vector<1x7xf32> to vector<2x7xf32>
    %91 = arith.addf %88, %90 : vector<2x7xf32>
    %c0_39 = arith.constant 0 : index
    %c0_40 = arith.constant 0 : index
    %92 = vector.load %arg15[%c0_39, %c0_40] : memref<2x7xf32, #tpu.memory_space<vmem>>, vector<2x7xf32>
    tpu.vector_store %arg15[%c0_39, %c0_40], %91 {strides = array<i32>} : memref<2x7xf32, #tpu.memory_space<vmem>>, vector<2x7xf32>,
    return
  }
  func.func @transform_0(%arg0: i32) -> (i32, i32, i32) {
    %c0_i32 = arith.constant 0 : i32
    %c0_i32_0 = arith.constant 0 : i32
    %c0_i32_1 = arith.constant 0 : i32
    return %arg0, %c0_i32, %c0_i32_0 : i32, i32, i32
  }
  func.func @transform_1(%arg0: i32) -> (i32, i32) {
    %c0_i32 = arith.constant 0 : i32
    %c0_i32_0 = arith.constant 0 : i32
    %c0_i32_1 = arith.constant 0 : i32
    return %c0_i32, %c0_i32_0 : i32, i32
  }
  func.func @transform_2(%arg0: i32) -> (i32, i32) {
    %c0_i32 = arith.constant 0 : i32
    %c0_i32_0 = arith.constant 0 : i32
    %c0_i32_1 = arith.constant 0 : i32
    return %c0_i32, %c0_i32_0 : i32, i32
  }
  func.func @transform_3(%arg0: i32) -> (i32, i32) {
    %c0_i32 = arith.constant 0 : i32
    %c0_i32_0 = arith.constant 0 : i32
    %c0_i32_1 = arith.constant 0 : i32
    return %c0_i32, %c0_i32_0 : i32, i32
  }
  func.func @transform_4(%arg0: i32) -> (i32, i32) {
    %c0_i32 = arith.constant 0 : i32
    %c0_i32_0 = arith.constant 0 : i32
    %c0_i32_1 = arith.constant 0 : i32
    return %c0_i32, %c0_i32_0 : i32, i32
  }
  func.func @transform_5(%arg0: i32) -> (i32, i32) {
    %c0_i32 = arith.constant 0 : i32
    %c0_i32_0 = arith.constant 0 : i32
    %c0_i32_1 = arith.constant 0 : i32
    return %c0_i32, %c0_i32_0 : i32, i32
  }
  func.func @transform_6(%arg0: i32) -> (i32, i32) {
    %c0_i32 = arith.constant 0 : i32
    %c0_i32_0 = arith.constant 0 : i32
    %c0_i32_1 = arith.constant 0 : i32
    return %c0_i32, %c0_i32_0 : i32, i32
  }
  func.func @transform_7(%arg0: i32) -> (i32, i32) {
    %c0_i32 = arith.constant 0 : i32
    %c0_i32_0 = arith.constant 0 : i32
    %c0_i32_1 = arith.constant 0 : i32
    return %c0_i32, %c0_i32_0 : i32, i32
  }
  func.func @transform_8(%arg0: i32) -> (i32, i32) {
    %c0_i32 = arith.constant 0 : i32
    %c0_i32_0 = arith.constant 0 : i32
    %c0_i32_1 = arith.constant 0 : i32
    return %c0_i32, %c0_i32_0 : i32, i32
  }
  func.func @transform_9(%arg0: i32) -> (i32, i32) {
    %c0_i32 = arith.constant 0 : i32
    %c0_i32_0 = arith.constant 0 : i32
    %c0_i32_1 = arith.constant 0 : i32
    return %c0_i32, %c0_i32_0 : i32, i32
  }
  func.func @transform_10(%arg0: i32) -> (i32, i32) {
    %c0_i32 = arith.constant 0 : i32
    %c0_i32_0 = arith.constant 0 : i32
    %c0_i32_1 = arith.constant 0 : i32
    return %c0_i32, %c0_i32_0 : i32, i32
  }
  func.func @transform_11(%arg0: i32) -> (i32, i32) {
    %c0_i32 = arith.constant 0 : i32
    %c0_i32_0 = arith.constant 0 : i32
    %c0_i32_1 = arith.constant 0 : i32
    return %c0_i32, %c0_i32_0 : i32, i32
  }
  func.func @transform_12(%arg0: i32) -> (i32, i32) {
    %c0_i32 = arith.constant 0 : i32
    %c0_i32_0 = arith.constant 0 : i32
    %c0_i32_1 = arith.constant 0 : i32
    return %c0_i32, %c0_i32_0 : i32, i32
  }
  func.func @transform_13(%arg0: i32) -> (i32, i32) {
    %c0_i32 = arith.constant 0 : i32
    %c0_i32_0 = arith.constant 0 : i32
    %c0_i32_1 = arith.constant 0 : i32
    return %c0_i32, %c0_i32_0 : i32, i32
  }
  func.func @transform_14(%arg0: i32) -> (i32, i32) {
    %c0_i32 = arith.constant 0 : i32
    %c0_i32_0 = arith.constant 0 : i32
    return %arg0, %c0_i32 : i32, i32
  }
}

</mosaic_0001>

<bundles_post_ra>
// kernel: tpu_custom_call.1
= control target key start
LH: loop header
LB: loop body
LE: loop exit
PB: predicated region body
PF: predicated region fallthrough
CT: control target
= control target key end

     0   :  { %s11944_s15 = smov 1   ;;  %vm165_vm0 = vsmask.f32 7424  ;;  %s11945_s17 = smov 2   ;;  %vm161_vm1 = vcmask 1040384   ;;  %vm198_vm2 = vcmask 1042432   ;;  %s14895_s0 = inlined_call_operand.vmem [shape: f32[2,70,1], index: 0, kind: input, shape index: {}]   ;;  %s14896_s1 = inlined_call_operand.vmem [shape: bf16[3,32], index: 1, kind: input, shape index: {}]   ;;  %s14897_s2 = inlined_call_operand.vmem [shape: f32[1,32], index: 2, kind: input, shape index: {}]   ;;  %s14898_s3 = inlined_call_operand.vmem [shape: bf16[96,32], index: 3, kind: input, shape index: {}]   ;;  %s14899_s4 = inlined_call_operand.vmem [shape: f32[1,32], index: 4, kind: input, shape index: {}]   ;;  %s14900_s5 = inlined_call_operand.vmem [shape: bf16[96,16], index: 5, kind: input, shape index: {}]   ;;  %s14901_s6 = inlined_call_operand.vmem [shape: f32[1,16], index: 6, kind: input, shape index: {}]   ;;  %s14902_s7 = inlined_call_operand.vmem [shape: bf16[48,12], index: 7, kind: input, shape index: {}]   ;;  %s14903_s8 = inlined_call_operand.vmem [shape: f32[1,12], index: 8, kind: input, shape index: {}]   ;;  %s14904_s9 = inlined_call_operand.vmem [shape: bf16[36,12], index: 9, kind: input, shape index: {}]   ;;  %s14905_s10 = inlined_call_operand.vmem [shape: f32[1,12], index: 10, kind: input, shape index: {}]   ;;  %s14906_s11 = inlined_call_operand.vmem [shape: f32[1,12], index: 11, kind: input, shape index: {}]   ;;  %s14907_s12 = inlined_call_operand.vmem [shape: bf16[70,7], index: 12, kind: input, shape index: {}]   ;;  %s14908_s13 = inlined_call_operand.vmem [shape: f32[1,7], index: 13, kind: input, shape index: {}]   ;;  %s14909_s14 = inlined_call_operand.hbm [shape: f32[2,7], index: 14, kind: output, shape index: {}]  }
   0x1   :  { %v49_v0 = vld [vmem:[%s14895_s0] sm:$0xff]  ;;  %v50_v1 = vld [vmem:[%s14895_s0 + $0x8] sm:$0xff]  ;;  %v51_v2 = vld [vmem:[%s14895_s0 + $0x10] sm:$0xff]  ;;  %vm199_vm3 = vsmask.f32 2304  ;;  %vm1286_vm6 = vcmask 1041408  }
   0x2   :  { %v12041_v3 = vpack.c.bf16 %v50_v1, %v49_v0  ;;  %v52_v4 = vld [vmem:[%s14895_s0 + $0x18] sm:$0xff]  ;;  %v53_v5 = vld [vmem:[%s14895_s0 + $0x20] sm:$0xff]  ;;  %v54_v6 = vld [vmem:[%s14895_s0 + $0x28] sm:$0xff]  ;;  %vm86_vm4 = vsmask.f32 256  ;;  %vm11948_vm8 = vmmov 0  }
   0x3   :  { %v12052_v7 = vpack.c.bf16 %v52_v4, %v51_v2  ;;  %v12054_v8 = vpack.c.bf16 %v54_v6, %v53_v5  ;;  %v55_v9 = vld [vmem:[%s14895_s0 + $0x30] sm:$0xff]  ;;  %v56_v10 = vld [vmem:[%s14895_s0 + $0x38] sm:$0xff]  ;;  %v57_v11 = vld [vmem:[%s14895_s0 + $0x40] sm:$0x3f] }
   0x4   :  { %213 = vrot.lane.b32.xlu0 %v12041_v3, %s11944_s15  ;;  %v12068_v12 = vshrl.u32 %v12041_v3, 16  ;;  %v88_v13 = vshll.u32 %v12041_v3, 16  ;;  %v12071_v14 = vpack.c.bf16 %v56_v10, %v55_v9  ;;  %v12073_v15 = vpack.c.bf16 %v57_v11, %v57_v11  ;;  %v58_v20 = vld [vmem:[%s14895_s0 + $0x48] sm:$0xff]  ;;  %v59_v23 = vld [vmem:[%s14895_s0 + $0x50] sm:$0xff]  ;;  %v60_v24 = vld [vmem:[%s14895_s0 + $0x58] sm:$0xff] }
   0x5   :  { %215 = vrot.lane.b32.xlu1 %v12052_v7, %s11944_s15  ;;  %v95_v16 = vshll.u32 %v12052_v7, 16  ;;  %v92_v17 = vshrl.u32 %v12052_v7, 16  ;;  %v103_v18 = vshll.u32 %v12054_v8, 16  ;;  %v100_v19 = vshrl.u32 %v12054_v8, 16  ;;  %v61_v25 = vld [vmem:[%s14895_s0 + $0x60] sm:$0xff]  ;;  %v62_v32 = vld [vmem:[%s14895_s0 + $0x68] sm:$0xff]  ;;  %vm12169_vm5 = vmand %vm161_vm1, %vm86_vm4 }
   0x6   :  { %v166_v21 = vrot.slane %v88_v13, 1  ;;  %v111_v22 = vshll.u32 %v12071_v14, 16  ;;  %v108_v30 = vshrl.u32 %v12071_v14, 16  ;;  %v12105_v31 = vshll.u32 %v12073_v15, 16  ;;  %v63_v33 = vld [vmem:[%s14895_s0 + $0x70] sm:$0xff]  ;;  %v64_v34 = vld [vmem:[%s14895_s0 + $0x78] sm:$0xff]  ;;  %vm12209_vm7 = vmand %vm198_vm2, %vm199_vm3 }
   0x7   :  { %v168_v26 = vrot.slane %v95_v16, 1  ;;  %v171_v27 = vrot.slane %v103_v18, 1  ;;  %v12116_v37 = vpack.c.bf16 %v59_v23, %v58_v20  ;;  %v12118_v38 = vpack.c.bf16 %v61_v25, %v60_v24  ;;  %v65_v40 = vld [vmem:[%s14895_s0 + $0x80] sm:$0xff]  ;;  %v66_v62 = vld [vmem:[%s14895_s0 + $0x88] sm:$0x3f] }
   0x8   :  { %v167_v28 = vor.u32 %v166_v21, %v12068_v12  ;;  %v174_v29 = vrot.slane %v111_v22, 1  ;;  %v177_v45 = vrot.slane %v12105_v31, 1  ;;  %v12130_v46 = vpack.c.bf16 %v63_v33, %v62_v32  ;;  %v77_v3 = vld [vmem:[%s14896_s1] sm:$0x3] }
   0x9   :  { %v170_v35 = vor.u32 %v168_v26, %v92_v17  ;;  %v173_v36 = vor.u32 %v171_v27, %v100_v19  ;;  %v124_v42 = vshll.u32 %v12116_v37, 16  ;;  %v12133_v47 = vshrl.u32 %v12116_v37, 16 }
   0xa   :  { %v169_v39 = vsel %vm165_vm0, %v167_v28, %v168_v26  ;;  %v176_v44 = vor.u32 %v174_v29, %v108_v30  ;;  %v131_v48 = vshll.u32 %v12118_v38, 16  ;;  %v12136_v50 = vpack.c.bf16 %v65_v40, %v64_v34 }
   0xb   :  { %235 = vrot.lane.b32.xlu0 %v169_v39, %s11945_s17  ;;  %v172_v41 = vsel %vm165_vm0, %v170_v35, %v171_v27  ;;  %v175_v43 = vsel %vm165_vm0, %v173_v36, %v174_v29  ;;  %v180_v49 = vrot.slane %v124_v42, 1  ;;  %v94_v51 = vrot.slane %v92_v17, 7 }
   0xc   :  { %237 = vrot.lane.b32.xlu1 %v172_v41, %s11945_s17  ;;  %v102_v52 = vrot.slane %v100_v19, 7  ;;  %v178_v53 = vsel %vm165_vm0, %v176_v44, %v177_v45  ;;  %v139_v54 = vshll.u32 %v12130_v46, 16  ;;  %v116_v55 = vshrl.u32 %v12073_v15, 16 }
   0xd   :  { %v181_v56 = vor.u32 %v180_v49, %v12133_v47  ;;  %v182_v57 = vrot.slane %v131_v48, 1  ;;  %v128_v58 = vshrl.u32 %v12118_v38, 16  ;;  %v147_v59 = vshll.u32 %v12136_v50, 16 }
   0xe   :  { %v110_v60 = vrot.slane %v108_v30, 7  ;;  %v136_v61 = vshrl.u32 %v12130_v46, 16  ;;  %v118_v0 = vrot.slane %v116_v55, 7  ;;  %v185_v1 = vrot.slane %v139_v54, 1 }
   0xf   :  { %217 = vrot.lane.b32.xlu0 %v12054_v8, %s11944_s15  ;;  %v12153_v63 = vrot.slane %v128_v58, 7  ;;  %v87_v4 = vrot.slane %v12068_v12, 7  ;;  %v97_v5 = vor.u32 %v95_v16, %v94_v51  ;;  %v183_v6 = vsel %vm165_vm0, %v181_v56, %v182_v57 }
  0x10   :  { %239 = vrot.lane.b32.xlu1 %v175_v43, %s11945_s17  ;;  %v12158_v2 = vrot.slane %v136_v61, 7  ;;  %v184_v9 = vor.u32 %v182_v57, %v128_v58  ;;  %v188_v10 = vrot.slane %v147_v59, 1  ;;  %v144_v11 = vshrl.u32 %v12136_v50, 16 }
  0x11   :  { %v12175_v19 = vor.u32 %v88_v13, %v87_v4  ;;  %v12178_v7 = vsel %vm86_vm4, %v87_v4, %v97_v5  ;;  %v105_v16 = vor.u32 %v103_v18, %v102_v52  ;;  %v113_v20 = vor.u32 %v111_v22, %v110_v60 }
  0x12   :  { %v179_v21 = vor.u32 %v177_v45, %v116_v55  ;;  %v76_v23 = vpack.c.bf16 %v66_v62, %v66_v62  ;;  %v123_v24 = vrot.slane %v12133_v47, 7  ;;  %v11946_v18 = vmov 0.0  }
  0x13   :  { %219 = vrot.lane.b32.xlu0 %v12071_v14, %s11944_s15  ;;  %v163_v8 = vsel %vm12169_vm5, %v12068_v12, %v12175_v19  ;;  %v12196_v13 = vsel %vm86_vm4, %v94_v51, %v105_v16  ;;  %v12199_v14 = vsel %vm86_vm4, %v102_v52, %v113_v20  ;;  %11650 = vmatprep.subr.bf16.mxu0 %v11946_v18  ;;  %v11947_v28 = vmov 65535  }
  0x14   :  { %241 = vrot.lane.b32.xlu1 %v178_v53, %s11945_s17  ;;  %v186_v22 = vsel %vm165_vm0, %v184_v9, %v185_v1  ;;  %v12203_v25 = vor.u32 %v124_v42, %v123_v24  ;;  %v133_v26 = vor.u32 %v131_v48, %v12153_v63  ;;  %11882 = vmatprep.subr.bf16.mxu1 %v11946_v18  ;;  %v1287_v29 = vsel %vm161_vm1, 4294967295, %v11947_v28 }
  0x15   :  { %v155_v30 = vshll.u32 %v76_v23, 16  ;;  %v1288_v34 = vsel %vm1286_vm6, %v1287_v29, 0  ;;  %11652 = vmatprep.mubr.msk.bf16.mxu0 %vm11948_vm8, %v11946_v18  ;;  %11672 = vmatprep.mubr.msk.bf16.mxu1 %vm11948_vm8, %v11946_v18  ;;  %v201_v36 = vsel %vm12209_vm7, %v179_v21, %v12105_v31 }
  0x16   :  { %v164_v32 = vsel %vm12169_vm5, %v12133_v47, %v12203_v25  ;;  %v12221_v33 = vsel %vm86_vm4, %v123_v24, %v133_v26  ;;  %v1290_v35 = vand.u32 %v1288_v34, %v77_v3 }
  0x17   :  { %223 = vrot.lane.b32.xlu0 %v12116_v37, %s11944_s15  ;;  %v187_v37 = vor.u32 %v185_v1, %v136_v61 }
  0x18   :  { %245 = vrot.lane.b32.xlu1 %v183_v6, %s11945_s17  ;;  %11651 = vmatpush3.bf16.msra.mxu0 %v1290_v35 }
  0x19   :  { %11883 = vmatpush3.bf16.msra.mxu1 %v1290_v35 }
  0x1a   :  { %11688 = vmatprep.subr.bf16.mxu1 %v11946_v18 }
  0x1b   :  { %225 = vrot.lane.b32.xlu0 %v12118_v38, %s11944_s15  ;;  %v121_v38 = vor.u32 %v12105_v31, %v118_v0 }
  0x1c   :  { %247 = vrot.lane.b32.xlu1 %v186_v22, %s11945_s17 }
  0x1d   :  { %v12236_v39 = vsel %vm86_vm4, %v110_v60, %v121_v38 }
  0x1f   :  { %221 = vrot.lane.b32.xlu0 %v12073_v15, %s11944_s15 }
  0x20   :  { %19 = vsyncpa [#allocation3], 0  ;;  %243 = vrot.lane.b32.xlu1 %v201_v36, %s11945_s17  ;;  %v152_v40 = vshrl.u32 %v76_v23, 16  ;;  %11736 = vmatprep.subr.bf16.mxu0 %v11946_v18  ;;  %v189_v41 = vsel %vm165_vm0, %v187_v37, %v188_v10  ;;  %v190_v42 = vor.u32 %v188_v10, %v144_v11  ;;  %v191_v31 = vrot.slane %v155_v30, 1  ;;  %s11951_s24 = smov 32   ;;  %s11952_s27 = smov 64  }
  0x21   :  { %v141_v43 = vor.u32 %v139_v54, %v12158_v2  ;;  %v146_v48 = vrot.slane %v144_v11, 7  ;;  %v11949_v55 = vmov 1966171168   ;;  %v327_v57 = vlaneseq  ;;  %s11954_s20 = smov 12   ;;  %s11955_s1 = smov 24  }
  0x22   :  { %v192_v44 = vsel %vm165_vm0, %v190_v42, %v191_v31  ;;  %v193_v45 = vor.u32 %v191_v31, %v152_v40  ;;  %v154_v52 = vrot.slane %v152_v40, 7  ;;  %v325_v56 = vunpack.c.l.s4 %v11949_v55 }
  0x23   :  { %227 = vrot.lane.b32.xlu0 %v12130_v46, %s11944_s15  ;;  %v12249_v15 = vsel %vm86_vm4, %v12153_v63, %v141_v43  ;;  %v149_v46 = vor.u32 %v147_v59, %v146_v48  ;;  %v12270_v61 = vshrl.u32 %v327_v57, 7  ;;  %vm255_vm9 = vcmask 7168  }
  0x24   :  { %249 = vrot.lane.b32.xlu1 %v189_v41, %s11945_s17  ;;  %v202_v49 = vsel %vm12209_vm7, %v193_v45, %v155_v30  ;;  %v157_v53 = vor.u32 %v155_v30, %v154_v52  ;;  %v326_v60 = vunpack.c.0.s8 %v325_v56  ;;  %vm286_vm10 = vcmask 15360  }
  0x25   :  { %v12264_v51 = vsel %vm86_vm4, %v12158_v2, %v149_v46  ;;  %vm1257_vm11 = vcmask 23552   ;;  %vm2436_vm12 = vcmask 261120   ;;  %vm2467_vm13 = vcmask 523264  }
  0x26   :  { %v12267_v54 = vsel %vm86_vm4, %v146_v48, %v157_v53  ;;  %v12273_v59 = vsub.s32 %v326_v60, %v12270_v61  ;;  %vm3474_vm14 = vcmask 785408   ;;  %vm6847_vm15 = vcmask 130048  }
  0x27   :  { %229 = vrot.lane.b32.xlu0 %v12136_v50, %s11944_s15  ;;  %vm7866_vm1 = vcmask 392192   ;;  %vm9031_vm3 = vcmask 97280  }
  0x28   :  { %251 = vrot.lane.b32.xlu1 %v192_v44, %s11945_s17 }
  0x2b   :  { %231 = vrot.lane.b32.xlu0 %v76_v23, %s11944_s15 }
  0x2c   :  { %253 = vrot.lane.b32.xlu1 %v202_v49, %s11945_s17  ;;  %s11953_s17 = smov 16  }
  0x76   :  { %v214_v58 = vpop.permute.xlu0 %213 }
  0x77   :  { %v216_v50 = vpop.permute.xlu1 %215  ;;  %v258_v63 = vsel %vm255_vm9, %v163_v8, %v214_v58 }
  0x78   :  { %v261_v62 = vsel %vm255_vm9, %v12178_v7, %v216_v50 }
  0x7d   :  { %v236_v0 = vpop.permute.xlu0 %235 }
  0x7e   :  { %v288_v1 = vsel %vm286_vm10, %v258_v63, %v236_v0  ;;  %v238_v2 = vpop.permute.xlu1 %237 }
  0x7f   :  { %v323_v4 = vcombine.high %v288_v1, %v288_v1  ;;  %v330_v5 = vrot.slane %v288_v1, %v12273_v59  ;;  %v290_v6 = vsel %vm286_vm10, %v261_v62, %v238_v2 }
  0x80   :  { %v372_v9 = vcombine.high %v290_v6, %v290_v6  ;;  %v379_v10 = vrot.slane %v290_v6, %v12273_v59 }
  0x81   :  { %v337_v11 = vrot.slane %v323_v4, %v12273_v59  ;;  %v338_v7 = vcombine.high %v330_v5, %v330_v5  ;;  %v346_v16 = vrot.slane %v330_v5, %v12273_v59  ;;  %v218_v12 = vpop.permute.xlu0 %217 }
  0x82   :  { %v386_v19 = vrot.slane %v372_v9, %v12273_v59  ;;  %v387_v20 = vcombine.high %v379_v10, %v379_v10  ;;  %v395_v21 = vrot.slane %v379_v10, %v12273_v59  ;;  %v264_v23 = vsel %vm255_vm9, %v12196_v13, %v218_v12  ;;  %v240_v24 = vpop.permute.xlu1 %239 }
  0x83   :  { %v339_v3 = vcombine.high %v337_v11, %v337_v11  ;;  %v353_v8 = vrot.slane %v337_v11, %v12273_v59  ;;  %v360_v22 = vrot.slane %v338_v7, %v12273_v59  ;;  %v292_v26 = vsel %vm286_vm10, %v264_v23, %v240_v24 }
  0x84   :  { %v388_v28 = vcombine.high %v386_v19, %v386_v19  ;;  %v402_v29 = vrot.slane %v386_v19, %v12273_v59  ;;  %v409_v30 = vrot.slane %v387_v20, %v12273_v59  ;;  %v421_v34 = vcombine.high %v292_v26, %v292_v26 }
  0x85   :  { %v367_v35 = vrot.slane %v339_v3, %v12273_v59  ;;  %v778_v36 = vcombine.low %v346_v16, %v360_v22  ;;  %v11465_v37 = vcombine.high %v346_v16, %v360_v22  ;;  %v428_v13 = vrot.slane %v292_v26, %v12273_v59  ;;  %v220_v38 = vpop.permute.xlu0 %219 }
  0x86   :  { %v416_v40 = vrot.slane %v388_v28, %v12273_v59  ;;  %v827_v41 = vcombine.low %v395_v21, %v409_v30  ;;  %v11467_v42 = vcombine.high %v395_v21, %v409_v30  ;;  %v435_v31 = vrot.slane %v421_v34, %v12273_v59  ;;  %v242_v43 = vpop.permute.xlu1 %241 }
  0x87   :  { %v780_v44 = vcombine.low %v353_v8, %v367_v35  ;;  %v11466_v45 = vcombine.high %v353_v8, %v367_v35  ;;  %v12303_v48 = vrot.slane %v778_v36, %v12273_v59  ;;  %v12306_v49 = vrot.slane %v11465_v37, %v12273_v59 }
  0x88   :  { %v829_v46 = vcombine.low %v402_v29, %v416_v40  ;;  %v11468_v52 = vcombine.high %v402_v29, %v416_v40  ;;  %v12309_v53 = vrot.slane %v827_v41, %v12273_v59  ;;  %v12312_v55 = vrot.slane %v11467_v42, %v12273_v59 }
  0x89   :  { %v12315_v56 = vrot.slane %v780_v44, %v12273_v59  ;;  %v12318_v58 = vrot.slane %v11466_v45, %v12273_v59  ;;  %v436_v60 = vcombine.high %v428_v13, %v428_v13  ;;  %v224_v50 = vpop.permute.xlu0 %223  ;;  %v810_v62 = vcombine.low %v12303_v48, %v12306_v49 }
  0x8a   :  { %v12323_v63 = vrot.slane %v829_v46, %v12273_v59  ;;  %v12326_v0 = vrot.slane %v11468_v52, %v12273_v59  ;;  %v437_v1 = vcombine.high %v435_v31, %v435_v31  ;;  %v246_v2 = vpop.permute.xlu1 %245  ;;  %v444_v4 = vrot.slane %v428_v13, %v12273_v59 }
  0x8b   :  { %v451_v5 = vrot.slane %v435_v31, %v12273_v59  ;;  %v458_v6 = vrot.slane %v436_v60, %v12273_v59  ;;  %v267_v9 = vsel %vm255_vm9, %v12199_v14, %v220_v38  ;;  %v859_v10 = vcombine.low %v12309_v53, %v12312_v55 }
  0x8c   :  { %v465_v11 = vrot.slane %v437_v1, %v12273_v59  ;;  %v294_v7 = vsel %vm286_vm10, %v267_v9, %v242_v43  ;;  %v273_v16 = vsel %vm255_vm9, %v164_v32, %v224_v50  ;;  %v811_v34 = vcombine.low %v12315_v56, %v12318_v58 }
  0x8d   :  { %v876_v12 = vcombine.low %v444_v4, %v458_v6  ;;  %v11469_v19 = vcombine.high %v444_v4, %v458_v6  ;;  %v470_v20 = vcombine.high %v294_v7, %v294_v7  ;;  %v477_v21 = vrot.slane %v294_v7, %v12273_v59  ;;  %v226_v14 = vpop.permute.xlu0 %225 }
  0x8e   :  { %v878_v23 = vcombine.low %v451_v5, %v465_v11  ;;  %v11470_v24 = vcombine.high %v451_v5, %v465_v11  ;;  %v298_v3 = vsel %vm286_vm10, %v273_v16, %v246_v2  ;;  %v276_v8 = vsel %vm255_vm9, %v12221_v33, %v226_v14  ;;  %v248_v26 = vpop.permute.xlu1 %247 }
  0x8f   :  { %v12348_v22 = vrot.slane %v876_v12, %v12273_v59  ;;  %v12351_v47 = vrot.slane %v11469_v19, %v12273_v59  ;;  %v484_v25 = vrot.slane %v470_v20, %v12273_v59  ;;  %v485_v32 = vcombine.high %v477_v21, %v477_v21 }
  0x90   :  { %v12355_v28 = vrot.slane %v878_v23, %v12273_v59  ;;  %v493_v29 = vrot.slane %v477_v21, %v12273_v59  ;;  %v542_v30 = vcombine.high %v298_v3, %v298_v3  ;;  %v12361_v33 = vrot.slane %v11470_v24, %v12273_v59 }
  0x91   :  { %v486_v35 = vcombine.high %v484_v25, %v484_v25  ;;  %v500_v36 = vrot.slane %v484_v25, %v12273_v59  ;;  %v507_v37 = vrot.slane %v485_v32, %v12273_v59  ;;  %v908_v13 = vcombine.low %v12348_v22, %v12351_v47  ;;  %v222_v2 = vpop.permute.xlu0 %221 }
  0x92   :  { %v549_v38 = vrot.slane %v298_v3, %v12273_v59  ;;  %v556_v40 = vrot.slane %v542_v30, %v12273_v59  ;;  %v300_v41 = vsel %vm286_vm10, %v276_v8, %v248_v26  ;;  %v244_v11 = vpop.permute.xlu1 %243  ;;  %v270_v19 = vsel %vm255_vm9, %v12236_v39, %v222_v2 }
  0x93   :  { %v514_v42 = vrot.slane %v486_v35, %v12273_v59  ;;  %v925_v31 = vcombine.low %v493_v29, %v507_v37  ;;  %v11471_v43 = vcombine.high %v493_v29, %v507_v37  ;;  %v591_v44 = vcombine.high %v300_v41, %v300_v41 }
  0x94   :  { %v557_v45 = vcombine.high %v549_v38, %v549_v38  ;;  %v558_v46 = vcombine.high %v556_v40, %v556_v40  ;;  %v12372_v52 = vrot.slane %v549_v38, %v12273_v59  ;;  %v572_v56 = vrot.slane %v556_v40, %v12273_v59 }
  0x95   :  { %v927_v58 = vcombine.low %v500_v36, %v514_v42  ;;  %v11472_v60 = vcombine.high %v500_v36, %v514_v42  ;;  %v12376_v50 = vrot.slane %v925_v31, %v12273_v59  ;;  %v12379_v1 = vrot.slane %v11471_v43, %v12273_v59  ;;  %v228_v38 = vpop.permute.xlu0 %227 }
  0x96   :  { %v579_v4 = vrot.slane %v557_v45, %v12273_v59  ;;  %v586_v5 = vrot.slane %v558_v46, %v12273_v59  ;;  %v587_v6 = vcombine.high %v12372_v52, %v12372_v52  ;;  %v588_v9 = vcombine.high %v572_v56, %v572_v56  ;;  %v250_v43 = vpop.permute.xlu1 %249 }
  0x97   :  { %v12386_v7 = vrot.slane %v927_v58, %v12273_v59  ;;  %v12389_v16 = vrot.slane %v11472_v60, %v12273_v59  ;;  %v598_v12 = vrot.slane %v300_v41, %v12273_v59  ;;  %v957_v24 = vcombine.low %v12376_v50, %v12379_v1 }
  0x98   :  { %v589_v20 = vcombine.high %v579_v4, %v579_v4  ;;  %v12394_v21 = vcombine.low %v579_v4, %v587_v6  ;;  %v1023_v14 = vcombine.low %v586_v5, %v588_v9  ;;  %v590_v23 = vcombine.high %v586_v5, %v586_v5 }
  0x99   :  { %v605_v3 = vrot.slane %v591_v44, %v12273_v59  ;;  %v606_v8 = vcombine.high %v598_v12, %v598_v12  ;;  %v614_v25 = vrot.slane %v598_v12, %v12273_v59  ;;  %v818_v39 = vrot.slane %v810_v62, %v12273_v59 }
  0x9a   :  { %v12400_v32 = vcombine.low %v589_v20, %v572_v56  ;;  %v998_v26 = vrot.slane %v12394_v21, %v12273_v59  ;;  %v825_v29 = vrot.slane %v811_v34, %v12273_v59  ;;  %v1033_v41 = vrot.slane %v1023_v14, %v12273_v59  ;;  %v252_v20 = vpop.permute.xlu1 %251 }
  0x9b   :  { %v607_v30 = vcombine.high %v605_v3, %v605_v3  ;;  %v621_v35 = vrot.slane %v605_v3, %v12273_v59  ;;  %v628_v36 = vrot.slane %v606_v8, %v12273_v59  ;;  %v636_v37 = vcombine.high %v614_v25, %v614_v25 }
  0x9c   :  { %v1024_v40 = vcombine.low %v590_v23, %v614_v25  ;;  %v826_v42 = vcombine.low %v818_v39, %v825_v29  ;;  %v296_v31 = vsel %vm286_vm10, %v270_v19, %v244_v11  ;;  %v279_v46 = vsel %vm255_vm9, %v12249_v15, %v228_v38 }
  0x9d   :  { %v635_v44 = vrot.slane %v607_v30, %v12273_v59  ;;  %v637_v48 = vcombine.high %v621_v35, %v621_v35  ;;  %v638_v49 = vcombine.high %v628_v36, %v628_v36  ;;  %v12414_v62 = vcombine.low %v628_v36, %v636_v37 }
  0x9e   :  { %v1040_v34 = vrot.slane %v1024_v40, %v12273_v59  ;;  %11653 = vmatmul.mubr.msk.bf16.vlgmr.msra.gmra.mrb[0].mxu0 %vm1257_vm11, %v826_v42  ;;  %v525_v45 = vrot.slane %v296_v31, %v12273_v59  ;;  %v860_v56 = vcombine.low %v12323_v63, %v12326_v0  ;;  %v1005_v58 = vrot.slane %v12400_v32, %v12273_v59  ;;  %v230_v63 = vpop.permute.xlu0 %229 }
  0x9f   :  { %v12425_v60 = vcombine.low %v638_v49, %v621_v35  ;;  %v1072_v2 = vcombine.low %v635_v44, %v637_v48  ;;  %v302_v4 = vsel %vm286_vm10, %v279_v46, %v250_v43  ;;  %11656 = vmatprep.mubr.msk.bf16.mxu0 %vm11948_vm8, %v11946_v18  ;;  %v1047_v5 = vrot.slane %v12414_v62, %v12273_v59 }
  0xa0   :  { %v12432_v6 = vcombine.low %v1033_v41, %v1040_v34  ;;  %v526_v15 = vcombine.high %v525_v45, %v525_v45  ;;  %v533_v9 = vrot.slane %v525_v45, %v12273_v59  ;;  %v639_v0 = vcombine.high %v635_v44, %v635_v44 }
  0xa1   :  { %v640_v11 = vcombine.high %v302_v4, %v302_v4  ;;  %v647_v12 = vrot.slane %v302_v4, %v12273_v59  ;;  %v1082_v19 = vrot.slane %v1072_v2, %v12273_v59  ;;  %v867_v3 = vrot.slane %v859_v10, %v12273_v59 }
  0xa2   :  { %v540_v14 = vrot.slane %v526_v15, %v12273_v59  ;;  %v541_v23 = vcombine.high %v533_v9, %v533_v9  ;;  %v874_v8 = vrot.slane %v860_v56, %v12273_v59  ;;  %v282_v30 = vsel %vm255_vm9, %v12264_v51, %v230_v63 }
  0xa3   :  { %v654_v25 = vrot.slane %v640_v11, %v12273_v59  ;;  %v655_v39 = vcombine.high %v647_v12, %v647_v12  ;;  %v663_v29 = vrot.slane %v647_v12, %v12273_v59  ;;  %v304_v38 = vsel %vm286_vm10, %v282_v30, %v252_v20 }
  0xa4   :  { %v974_v35 = vcombine.low %v533_v9, %v540_v14  ;;  %v975_v36 = vcombine.low %v541_v23, %v12372_v52  ;;  %v875_v37 = vcombine.low %v867_v3, %v874_v8  ;;  %v689_v51 = vcombine.high %v304_v38, %v304_v38 }
  0xa5   :  { %v656_v40 = vcombine.high %v654_v25, %v654_v25  ;;  %v670_v53 = vrot.slane %v654_v25, %v12273_v59  ;;  %v677_v55 = vrot.slane %v655_v39, %v12273_v59  ;;  %v685_v10 = vcombine.high %v663_v29, %v663_v29 }
  0xa6   :  { %v984_v41 = vrot.slane %v974_v35, %v12273_v59  ;;  %v991_v42 = vrot.slane %v975_v36, %v12273_v59  ;;  %v1073_v31 = vcombine.low %v639_v0, %v663_v29  ;;  %11657 = vmatmul.mubr.msk.bf16.gmra.mrb[4].mxu0 %vm1257_vm11, %v875_v37  ;;  %v696_v34 = vrot.slane %v304_v38, %v12273_v59  ;;  %v254_v37 = vpop.permute.xlu1 %253 }
  0xa7   :  { %v684_v43 = vrot.slane %v656_v40, %v12273_v59  ;;  %v686_v52 = vcombine.high %v670_v53, %v670_v53  ;;  %v687_v44 = vcombine.high %v677_v55, %v677_v55  ;;  %v1074_v48 = vcombine.low %v677_v55, %v685_v10  ;;  %11660 = vmatprep.mubr.msk.bf16.mxu0 %vm11948_vm8, %v11946_v18 }
  0xa8   :  { %v12457_v49 = vcombine.low %v984_v41, %v991_v42  ;;  %v1089_v62 = vrot.slane %v1073_v31, %v12273_v59  ;;  %v703_v45 = vrot.slane %v689_v51, %v12273_v59  ;;  %v1054_v46 = vrot.slane %v12425_v60, %v12273_v59 }
  0xa9   :  { %v1075_v56 = vcombine.low %v687_v44, %v670_v53  ;;  %v1121_v2 = vcombine.low %v684_v43, %v686_v52  ;;  %v688_v4 = vcombine.high %v684_v43, %v684_v43  ;;  %v704_v9 = vcombine.high %v696_v34, %v696_v34 }
  0xaa   :  { %v1104_v15 = vcombine.low %v1082_v19, %v1089_v62  ;;  %v705_v63 = vcombine.high %v703_v45, %v703_v45  ;;  %v712_v0 = vrot.slane %v696_v34, %v12273_v59  ;;  %v1096_v11 = vrot.slane %v1074_v48, %v12273_v59  ;;  %v232_v19 = vpop.permute.xlu0 %231 }
  0xab   :  { %v719_v12 = vrot.slane %v703_v45, %v12273_v59  ;;  %v1131_v20 = vrot.slane %v1121_v2, %v12273_v59  ;;  %v909_v14 = vcombine.low %v12355_v28, %v12361_v33  ;;  %v726_v23 = vrot.slane %v704_v9, %v12273_v59 }
  0xac   :  { %v733_v60 = vrot.slane %v705_v63, %v12273_v59  ;;  %v734_v3 = vcombine.high %v712_v0, %v712_v0  ;;  %v1122_v8 = vcombine.low %v688_v4, %v712_v0  ;;  %v916_v39 = vrot.slane %v908_v13, %v12273_v59 }
  0xad   :  { %v735_v25 = vcombine.high %v719_v12, %v719_v12  ;;  %v923_v29 = vrot.slane %v909_v14, %v12273_v59  ;;  %v1056_v30 = vcombine.low %v1047_v5, %v1054_v46  ;;  %v736_v35 = vcombine.high %v726_v23, %v726_v23 }
  0xae   :  { %v1123_v36 = vcombine.low %v726_v23, %v734_v3  ;;  %v1138_v28 = vrot.slane %v1122_v8, %v12273_v59  ;;  %v1063_v33 = vrot.slane %v12432_v6, %v12273_v59  ;;  %v1103_v38 = vrot.slane %v1075_v56, %v12273_v59 }
  0xaf   :  { %v924_v40 = vcombine.low %v916_v39, %v923_v29  ;;  %v1070_v53 = vrot.slane %v1056_v30, %v12273_v59  ;;  %v285_v22 = vsel %vm255_vm9, %v12267_v54, %v232_v19  ;;  %v1124_v47 = vcombine.low %v736_v35, %v719_v12 }
  0xb0   :  { %v1145_v13 = vrot.slane %v1123_v36, %v12273_v59  ;;  %v1153_v5 = vcombine.low %v1131_v20, %v1138_v28  ;;  %v958_v55 = vcombine.low %v12386_v7, %v12389_v16  ;;  %v1170_v10 = vcombine.low %v733_v60, %v735_v25 }
  0xb1   :  { %11661 = vmatmul.mubr.msk.bf16.gmra.mrb[8].mxu0 %vm1257_vm11, %v924_v40  ;;  %v1071_v6 = vcombine.low %v1063_v33, %v1070_v53  ;;  %v965_v41 = vrot.slane %v957_v24, %v12273_v59  ;;  %v306_v42 = vsel %vm286_vm10, %v285_v22, %v254_v37  ;;  %v1152_v54 = vrot.slane %v1124_v47, %v12273_v59 }
  0xb2   :  { %11664 = vmatprep.mubr.msk.bf16.mxu0 %vm11948_vm8, %v11946_v18  ;;  %v972_v31 = vrot.slane %v958_v55, %v12273_v59  ;;  %v737_v51 = vcombine.high %v733_v60, %v733_v60  ;;  %v744_v7 = vrot.slane %v306_v42, %v12273_v59  ;;  %v1105_v16 = vcombine.low %v1096_v11, %v1103_v38  ;;  %v11464_v60 = vld [vmem:[%s14897_s2] ss:$0 sm:$0xff] }
  0xb3   :  { %11673 = vmatmul.mubr.msk.bf16.vlgmr.msra.gmra.mrb[0].mxu1 %vm1257_vm11, %v1071_v6  ;;  %v1112_v43 = vrot.slane %v1104_v15, %v12273_v59  ;;  %v1007_v50 = vcombine.low %v998_v26, %v1005_v58  ;;  %v1014_v1 = vrot.slane %v12457_v49, %v12273_v59  ;;  %v1154_v44 = vcombine.low %v1145_v13, %v1152_v54 }
  0xb4   :  { %11676 = vmatprep.mubr.msk.bf16.mxu1 %vm11948_vm8, %v11946_v18  ;;  %v745_v24 = vcombine.high %v744_v7, %v744_v7  ;;  %v752_v52 = vrot.slane %v744_v7, %v12273_v59  ;;  %v1179_v48 = vrot.slane %v1170_v10, %v12273_v59  ;;  %v1119_v62 = vrot.slane %v1105_v16, %v12273_v59 }
  0xb5   :  { %v1021_v32 = vrot.slane %v1007_v50, %v12273_v59  ;;  %v1161_v34 = vrot.slane %v1153_v5, %v12273_v59  ;;  %v1168_v49 = vrot.slane %v1154_v44, %v12273_v59  ;;  %v973_v45 = vcombine.low %v965_v41, %v972_v31 }
  0xb6   :  { %v759_v21 = vrot.slane %v745_v24, %v12273_v59  ;;  %v760_v26 = vcombine.high %v752_v52, %v752_v52  ;;  %v1171_v58 = vcombine.low %v737_v51, %v752_v52  ;;  %v1120_v46 = vcombine.low %v1112_v43, %v1119_v62  ;;  %v11897_v62 = vld [vmem:[%s14898_s3] sm:$0xff]  }
  0xb7   :  { %v1022_v56 = vcombine.low %v1014_v1, %v1021_v32  ;;  %v1169_v15 = vcombine.low %v1161_v34, %v1168_v49  ;;  %v11950_v20 = vmov 1983009808   ;;  %v761_v3 = vcombine.high %v11464_v60, %v11464_v60  ;;  %11689 = vmatpush3.bf16.msra.mxu1 %v11897_v62 }
  0xb8   :  { %v1172_v2 = vcombine.low %v759_v21, %v760_v26  ;;  %v1186_v4 = vrot.slane %v1171_v58, %v12273_v59  ;;  %v763_v14 = vunpack.c.l.s4 %v11950_v20  ;;  %11690 = vmatprep.subr.bf16.mxu1 %v11946_v18  ;;  %vm11303_vm9 = vcmask 392512  }
  0xb9   :  { %11665 = vmatmul.mubr.msk.bf16.gmra.mrb[12].mxu0 %vm1257_vm11, %v973_v45  ;;  %vm11310_vm10 = vcmask 458112  }
  0xba   :  { %v1193_v9 = vrot.slane %v1172_v2, %v12273_v59  ;;  %v1194_v63 = vcombine.low %v1179_v48, %v1186_v4  ;;  %11668 = vmatprep.mubr.msk.bf16.mxu0 %vm11948_vm8, %v11946_v18  ;;  %v764_v23 = vunpack.c.0.s8 %v763_v14  ;;  %v11898_v4 = vld [vmem:[%s14898_s3 + $0x8] sm:$0xff]  }
  0xbb   :  { %11677 = vmatmul.mubr.msk.bf16.gmra.mrb[4].mxu1 %vm1257_vm11, %v1120_v46 }
  0xbc   :  { %11680 = vmatprep.mubr.msk.bf16.mxu1 %vm11948_vm8, %v11946_v18  ;;  %v1201_v0 = vrot.slane %v1194_v63, %v12273_v59  ;;  %v1208_v11 = vrot.slane %v1193_v9, %v12273_v59  ;;  %v12540_v8 = vsub.s32 %v764_v23, %v12270_v61  ;;  %11691 = vmatpush3.bf16.msra.mxu1 %v11898_v4 }
  0xbd   :  { %11692 = vmatprep.subr.bf16.mxu1 %v11946_v18 }
  0xbe   :  { %v1209_v12 = vcombine.low %v1201_v0, %v1208_v11  ;;  %v768_v19 = vrot.slane %v11464_v60, %v12540_v8  ;;  %v775_v25 = vrot.slane %v761_v3, %v12540_v8 }
  0xc0   :  { %v776_v39 = vcombine.high %v768_v19, %v768_v19  ;;  %v777_v29 = vcombine.high %v775_v25, %v775_v25  ;;  %v1227_v48 = vcombine.low %v775_v25, %v768_v19 }
  0xc1   :  { %11669 = vmatmul.mubr.msk.bf16.gmra.mrb[16].mxu0 %vm1257_vm11, %v1022_v56 }
  0xc2   :  { %11748 = vmatprep.mubr.msk.bf16.mxu0 %vm11948_vm8, %v11946_v18  ;;  %v1210_v30 = vcombine.low %v768_v19, %v776_v39  ;;  %v1211_v35 = vcombine.low %v775_v25, %v777_v29  ;;  %v1236_v43 = vcombine.low %v776_v39, %v775_v25  ;;  %v1237_v50 = vcombine.low %v777_v29, %v768_v19 }
  0xc3   :  { %11681 = vmatmul.mubr.msk.bf16.gmra.mrb[8].mxu1 %vm1257_vm11, %v1169_v15  ;;  %v12575_v19 = vrot.slane %v1227_v48, %v12540_v8 }
  0xc4   :  { %11684 = vmatprep.mubr.msk.bf16.mxu1 %vm11948_vm8, %v11946_v18  ;;  %v12545_v36 = vrot.slane %v1210_v30, %v12540_v8  ;;  %v1225_v28 = vrot.slane %v1211_v35, %v12540_v8  ;;  %v12567_v0 = vrot.slane %v1236_v43, %v12540_v8  ;;  %v1251_v3 = vrot.slane %v1237_v50, %v12540_v8 }
  0xc6   :  { %v12549_v33 = vcombine.low %v12545_v36, %v1225_v28 }
  0xcb   :  { %11685 = vmatmul.mubr.msk.bf16.gmra.mrb[12].mxu1 %vm1257_vm11, %v1209_v12  ;;  %vm11317_vm11 = vcmask 523712  }
  0xcc   :  { %11700 = vmatprep.mubr.msk.bf16.mxu1 %vm11948_vm8, %v11946_v18 }
 0x171   :  { %v1326_v37 = vpop.f32.mrb[0].mxu0 }
 0x172   :  { %v1327_v38 = vadd.f32 %v1326_v37, %v12549_v33  ;;  %v11654_v40 = vpop.f32.mrb[1].mxu0 }
 0x173   :  { %v1329_v53 = vpop.f32.mrb[2].mxu0 }
 0x174   :  { %v1415_v22 = vcombine.high %v1327_v38, %v1327_v38  ;;  %v1422_v47 = vrot.slane %v1327_v38, %v12540_v8  ;;  %v1330_v13 = vadd.f32 %v1329_v53, %v12549_v33  ;;  %v11655_v5 = vpop.f32.mrb[3].mxu0 }
 0x176   :  { %v1429_v55 = vrot.slane %v1415_v22, %v12540_v8  ;;  %v1430_v10 = vcombine.high %v1422_v47, %v1422_v47  ;;  %v1432_v6 = vcombine.high %v1330_v13, %v1330_v13  ;;  %v1439_v41 = vrot.slane %v1330_v13, %v12540_v8 }
 0x177   :  { %v1782_v51 = vmax.f32 %v1422_v47, 0.0 }
 0x178   :  { %v1431_v42 = vcombine.high %v1429_v55, %v1429_v55  ;;  %v1783_v54 = vmax.f32 %v1430_v10, 0.0  ;;  %v1446_v31 = vrot.slane %v1432_v6, %v12540_v8  ;;  %v1447_v7 = vcombine.high %v1439_v41, %v1439_v41 }
 0x179   :  { %v1334_v16 = vpop.f32.mrb[4].mxu0  ;;  %v1784_v1 = vmax.f32 %v1429_v55, 0.0  ;;  %v1786_v34 = vmax.f32 %v1439_v41, 0.0 }
 0x17a   :  { %v1785_v24 = vmax.f32 %v1431_v42, 0.0  ;;  %v1448_v52 = vcombine.high %v1446_v31, %v1446_v31  ;;  %v11658_v44 = vpop.f32.mrb[5].mxu0  ;;  %v1922_v32 = vcombine.low %v1782_v51, %v1783_v54  ;;  %v1787_v21 = vmax.f32 %v1447_v7, 0.0 }
 0x17b   :  { %v1335_v26 = vadd.f32 %v1334_v16, %v12549_v33  ;;  %v1337_v58 = vpop.f32.mrb[6].mxu0  ;;  %v1788_v45 = vmax.f32 %v1446_v31, 0.0  ;;  %v12587_v31 = vcombine.low %v12567_v0, %v1251_v3 }
 0x17c   :  { %v1923_v49 = vcombine.low %v1784_v1, %v1785_v24  ;;  %v1789_v46 = vmax.f32 %v1448_v52, 0.0  ;;  %v1338_v56 = vadd.f32 %v1337_v58, %v12549_v33  ;;  %v11659_v2 = vpop.f32.mrb[7].mxu0  ;;  %v1939_v15 = vcombine.low %v1786_v34, %v1787_v21 }
 0x17d   :  { %v1449_v9 = vcombine.high %v1335_v26, %v1335_v26  ;;  %v1456_v63 = vrot.slane %v1335_v26, %v12540_v8  ;;  %v1930_v30 = vrot.slane %v1922_v32, %v12540_v8  ;;  %v1235_v52 = vcombine.low %v12545_v36, %v12575_v19 }
 0x17e   :  { %v1940_v11 = vcombine.low %v1788_v45, %v1789_v46  ;;  %v1466_v12 = vcombine.high %v1338_v56, %v1338_v56  ;;  %v1473_v20 = vrot.slane %v1338_v56, %v12540_v8  ;;  %v1937_v14 = vrot.slane %v1923_v49, %v12540_v8 }
 0x17f   :  { %v1463_v23 = vrot.slane %v1449_v9, %v12540_v8  ;;  %v1464_v60 = vcombine.high %v1456_v63, %v1456_v63  ;;  %v1790_v25 = vmax.f32 %v1456_v63, 0.0  ;;  %v1947_v37 = vrot.slane %v1939_v15, %v12540_v8 }
 0x180   :  { %v1480_v39 = vrot.slane %v1466_v12, %v12540_v8  ;;  %v1481_v29 = vcombine.high %v1473_v20, %v1473_v20  ;;  %v1954_v38 = vrot.slane %v1940_v11, %v12540_v8  ;;  %v1794_v53 = vmax.f32 %v1473_v20, 0.0 }
 0x181   :  { %v1465_v35 = vcombine.high %v1463_v23, %v1463_v23  ;;  %v1791_v28 = vmax.f32 %v1464_v60, 0.0  ;;  %v1938_v47 = vcombine.low %v1930_v30, %v1937_v14  ;;  %v1792_v13 = vmax.f32 %v1463_v23, 0.0 }
 0x182   :  { %v1482_v40 = vcombine.high %v1480_v39, %v1480_v39  ;;  %v1795_v22 = vmax.f32 %v1481_v29, 0.0  ;;  %v1955_v10 = vcombine.low %v1947_v37, %v1954_v38  ;;  %v1796_v6 = vmax.f32 %v1480_v39, 0.0 }
 0x183   :  { %v1793_v5 = vmax.f32 %v1465_v35, 0.0  ;;  %v12582_v55 = vcombine.low %v1790_v25, %v1791_v28 }
 0x184   :  { %v1797_v41 = vmax.f32 %v1482_v40, 0.0  ;;  %v12584_v42 = vcombine.low %v1794_v53, %v1795_v22  ;;  %v1342_v54 = vpop.f32.mrb[8].mxu0  ;;  %v12592_v43 = vpack.c.bf16 %v1955_v10, %v1938_v47 }
 0x185   :  { %v12589_v51 = vcombine.low %v1792_v13, %v1793_v5  ;;  %v1343_v7 = vadd.f32 %v1342_v54, %v12549_v33  ;;  %v11662_v16 = vpop.f32.mrb[9].mxu0  ;;  %v1964_v21 = vrot.slane %v12582_v55, %v12540_v8 }
 0x186   :  { %v12594_v50 = vcombine.low %v1796_v6, %v1797_v41  ;;  %v1345_v1 = vpop.f32.mrb[10].mxu0  ;;  %v1366_v24 = vpop.f32.mrb[0].mxu1  ;;  %2394 = vrot.lane.b32.xlu0 %v12592_v43, %s11951_s24  ;;  %v12605_v26 = vshrl.u32 %v12592_v43, 16  ;;  %v2275_v58 = vshll.u32 %v12592_v43, 16  ;;  %v1981_v46 = vrot.slane %v12584_v42, %v12540_v8 }
 0x187   :  { %v1483_v44 = vcombine.high %v1343_v7, %v1343_v7  ;;  %v1490_v48 = vrot.slane %v1343_v7, %v12540_v8  ;;  %v1346_v62 = vadd.f32 %v1345_v1, %v12549_v33  ;;  %v11663_v32 = vpop.f32.mrb[11].mxu0  ;;  %v11674_v34 = vpop.f32.mrb[1].mxu1  ;;  %v1367_v49 = vadd.f32 %v1366_v24, %v12587_v31 }
 0x188   :  { %v1369_v45 = vpop.f32.mrb[2].mxu1  ;;  %v1971_v9 = vrot.slane %v12589_v51, %v12540_v8  ;;  %v1988_v20 = vrot.slane %v12594_v50, %v12540_v8 }
 0x189   :  { %v1497_v56 = vrot.slane %v1483_v44, %v12540_v8  ;;  %v1498_v2 = vcombine.high %v1490_v48, %v1490_v48  ;;  %v1500_v4 = vcombine.high %v1346_v62, %v1346_v62  ;;  %v11675_v15 = vpop.f32.mrb[3].mxu1  ;;  %v1507_v63 = vrot.slane %v1346_v62, %v12540_v8 }
 0x18a   :  { %v1585_v11 = vcombine.high %v1367_v49, %v1367_v49  ;;  %v12616_v12 = vrot.slane %v1367_v49, %v12540_v8  ;;  %v1798_v23 = vmax.f32 %v1490_v48, 0.0  ;;  %v1370_v35 = vadd.f32 %v1369_v45, %v12587_v31 }
 0x18b   :  { %v1499_v14 = vcombine.high %v1497_v56, %v1497_v56  ;;  %v1799_v60 = vmax.f32 %v1498_v2, 0.0  ;;  %v1514_v3 = vrot.slane %v1500_v4, %v12540_v8  ;;  %v1515_v25 = vcombine.high %v1507_v63, %v1507_v63 }
 0x18c   :  { %v1599_v39 = vrot.slane %v1585_v11, %v12540_v8  ;;  %v1600_v29 = vcombine.high %v12616_v12, %v12616_v12  ;;  %v1350_v30 = vpop.f32.mrb[12].mxu0  ;;  %v1800_v28 = vmax.f32 %v1497_v56, 0.0  ;;  %v1802_v40 = vmax.f32 %v1507_v63, 0.0 }
 0x18d   :  { %v1801_v37 = vmax.f32 %v1499_v14, 0.0  ;;  %v1516_v38 = vcombine.high %v1514_v3, %v1514_v3  ;;  %v11666_v53 = vpop.f32.mrb[13].mxu0  ;;  %v12625_v22 = vcombine.low %v1798_v23, %v1799_v60  ;;  %v1803_v47 = vmax.f32 %v1515_v25, 0.0 }
 0x18e   :  { %v1804_v13 = vmax.f32 %v1514_v3, 0.0  ;;  %v1601_v5 = vcombine.high %v1599_v39, %v1599_v39  ;;  %v1353_v10 = vpop.f32.mrb[14].mxu0  ;;  %v1374_v6 = vpop.f32.mrb[4].mxu1  ;;  %v1822_v54 = vmax.f32 %v12616_v12, 0.0  ;;  %v1823_v7 = vmax.f32 %v1600_v29, 0.0 }
 0x18f   :  { %v1805_v41 = vmax.f32 %v1516_v38, 0.0  ;;  %v1351_v16 = vadd.f32 %v1350_v30, %v12549_v33  ;;  %v11667_v1 = vpop.f32.mrb[15].mxu0  ;;  %v11678_v24 = vpop.f32.mrb[5].mxu1  ;;  %v12629_v44 = vcombine.low %v1800_v28, %v1801_v37  ;;  %v1602_v62 = vcombine.high %v1370_v35, %v1370_v35 }
 0x190   :  { %v1825_v48 = vmax.f32 %v1601_v5, 0.0  ;;  %v1609_v32 = vrot.slane %v1370_v35, %v12540_v8  ;;  %v12632_v34 = vpop.f32.mrb[6].mxu1  ;;  %v12634_v49 = vcombine.low %v1802_v40, %v1803_v47  ;;  %v1824_v45 = vmax.f32 %v1599_v39, 0.0  ;;  %v11899_v39 = vld [vmem:[%s14898_s3 + $0x10] sm:$0xff]  }
 0x191   :  { %v1517_v56 = vcombine.high %v1351_v16, %v1351_v16  ;;  %v1524_v2 = vrot.slane %v1351_v16, %v12540_v8  ;;  %v11679_v4 = vpop.f32.mrb[7].mxu1  ;;  %v1616_v15 = vrot.slane %v1602_v62, %v12540_v8  ;;  %v1354_v14 = vadd.f32 %v1353_v10, %v12549_v33  ;;  %11693 = vmatpush3.bf16.msra.mxu1 %v11899_v39 }
 0x192   :  { %v1617_v63 = vcombine.high %v1609_v32, %v1609_v32  ;;  %v1826_v11 = vmax.f32 %v1609_v32, 0.0  ;;  %v12639_v23 = vcombine.low %v1804_v13, %v1805_v41  ;;  %v1375_v25 = vadd.f32 %v1374_v6, %v12587_v31  ;;  %11694 = vmatprep.subr.bf16.mxu1 %v11946_v18 }
 0x193   :  { %v1531_v60 = vrot.slane %v1517_v56, %v12540_v8  ;;  %v1532_v3 = vcombine.high %v1524_v2, %v1524_v2  ;;  %v1618_v29 = vcombine.high %v1616_v15, %v1616_v15  ;;  %v1828_v35 = vmax.f32 %v1616_v15, 0.0 }
 0x194   :  { %v1827_v30 = vmax.f32 %v1617_v63, 0.0  ;;  %v2108_v28 = vcombine.low %v1825_v48, %v1826_v11  ;;  %v1358_v37 = vpop.f32.mrb[16].mxu0  ;;  %v12646_v38 = vcombine.low %v1823_v7, %v1824_v45  ;;  %v1534_v53 = vcombine.high %v1354_v14, %v1354_v14 }
 0x195   :  { %v1533_v40 = vcombine.high %v1531_v60, %v1531_v60  ;;  %v1807_v33 = vmax.f32 %v1532_v3, 0.0  ;;  %v11670_v47 = vpop.f32.mrb[17].mxu0  ;;  %v1806_v13 = vmax.f32 %v1524_v2, 0.0  ;;  %v12650_v6 = vrot.slane %v1354_v14, %v12540_v8 }
 0x196   :  { %v2109_v5 = vcombine.low %v1827_v30, %v1828_v35  ;;  %v2116_v10 = vrot.slane %v2108_v28, %v12540_v8  ;;  %v1382_v41 = vpop.f32.mrb[8].mxu1  ;;  %v12652_v16 = vpop.f32.mrb[18].mxu0  ;;  %v1808_v1 = vmax.f32 %v1531_v60, 0.0  ;;  %v12656_v24 = vrot.slane %v1534_v53, %v12540_v8 }
 0x197   :  { %v1809_v7 = vmax.f32 %v1533_v40, 0.0  ;;  %v1619_v48 = vcombine.high %v1375_v25, %v1375_v25  ;;  %v11671_v62 = vpop.f32.mrb[19].mxu0  ;;  %v11682_v32 = vpop.f32.mrb[9].mxu1  ;;  %v1829_v45 = vmax.f32 %v1618_v29, 0.0  ;;  %v1549_v2 = vcombine.high %v12650_v6, %v12650_v6 }
 0x198   :  { %v2123_v56 = vrot.slane %v2109_v5, %v12540_v8  ;;  %v1626_v4 = vrot.slane %v1375_v25, %v12540_v8  ;;  %v12662_v15 = vpop.f32.mrb[10].mxu1  ;;  %v12664_v63 = vcombine.low %v1806_v13, %v1807_v33  ;;  %v1550_v11 = vcombine.high %v12656_v24, %v12656_v24 }
 0x199   :  { %v1810_v14 = vmax.f32 %v12650_v6, 0.0  ;;  %v1633_v60 = vrot.slane %v1619_v48, %v12540_v8  ;;  %v11683_v3 = vpop.f32.mrb[11].mxu1  ;;  %v12670_v39 = vcombine.low %v1808_v1, %v1809_v7  ;;  %v1811_v28 = vmax.f32 %v1549_v2, 0.0 }
 0x19a   :  { %v2124_v29 = vcombine.low %v2116_v10, %v2123_v56  ;;  %v1634_v30 = vcombine.high %v1626_v4, %v1626_v4  ;;  %v1830_v35 = vmax.f32 %v1626_v4, 0.0  ;;  %v1812_v25 = vmax.f32 %v12656_v24, 0.0 }
 0x19b   :  { %v1635_v40 = vcombine.high %v1633_v60, %v1633_v60  ;;  %v1832_v53 = vmax.f32 %v1633_v60, 0.0  ;;  %v1972_v13 = vcombine.low %v1964_v21, %v1971_v9  ;;  %v1989_v5 = vcombine.low %v1981_v46, %v1988_v20 }
 0x19c   :  { %v1831_v33 = vmax.f32 %v1634_v30, 0.0  ;;  %v2125_v47 = vcombine.low %v1829_v45, %v1830_v35  ;;  %v1813_v10 = vmax.f32 %v1550_v11, 0.0  ;;  %v1378_v1 = vadd.f32 %v12632_v34, %v12587_v31 }
 0x19d   :  { %v1833_v6 = vmax.f32 %v1635_v40, 0.0  ;;  %v1359_v51 = vadd.f32 %v1358_v37, %v1235_v52  ;;  %v12691_v21 = vpack.c.bf16 %v1989_v5, %v1972_v13  ;;  %v1383_v50 = vadd.f32 %v1382_v41, %v12587_v31 }
 0x19e   :  { %v2126_v7 = vcombine.low %v1831_v33, %v1832_v53  ;;  %v2133_v55 = vrot.slane %v2125_v47, %v12540_v8  ;;  %v12694_v9 = vpop.f32.mrb[12].mxu1  ;;  %v1636_v42 = vcombine.high %v1378_v1, %v1378_v1  ;;  %v1643_v46 = vrot.slane %v1378_v1, %v12540_v8 }
 0x19f   :  { %v1551_v20 = vcombine.high %v1359_v51, %v1359_v51  ;;  %v1558_v24 = vrot.slane %v1359_v51, %v12540_v8  ;;  %v11686_v34 = vpop.f32.mrb[13].mxu1  ;;  %2396 = vrot.lane.b32.xlu0 %v12691_v21, %s11951_s24  ;;  %v1653_v36 = vcombine.high %v1383_v50, %v1383_v50  ;;  %v1660_v19 = vrot.slane %v1383_v50, %v12540_v8 }
 0x1a0   :  { %v2140_v48 = vrot.slane %v2126_v7, %v12540_v8  ;;  %v2282_v52 = vshll.u32 %v12691_v21, 16  ;;  %v12703_v37 = vpop.f32.mrb[14].mxu1  ;;  %v1650_v41 = vrot.slane %v1636_v42, %v12540_v8  ;;  %v1651_v62 = vcombine.high %v1643_v46, %v1643_v46 }
 0x1a1   :  { %v1834_v32 = vmax.f32 %v1643_v46, 0.0  ;;  %v1565_v45 = vrot.slane %v1551_v20, %v12540_v8  ;;  %v11687_v56 = vpop.f32.mrb[15].mxu1  ;;  %v1566_v4 = vcombine.high %v1558_v24, %v1558_v24  ;;  %v1814_v11 = vmax.f32 %v1558_v24, 0.0 }
 0x1a2   :  { %v2141_v2 = vcombine.low %v2133_v55, %v2140_v48  ;;  %v1667_v60 = vrot.slane %v1653_v36, %v12540_v8  ;;  %v1652_v3 = vcombine.high %v1650_v41, %v1650_v41  ;;  %v1835_v30 = vmax.f32 %v1651_v62, 0.0 }
 0x1a3   :  { %v1836_v35 = vmax.f32 %v1650_v41, 0.0  ;;  %v12708_v40 = vcombine.low %v1833_v6, %v1834_v32  ;;  %v1567_v33 = vcombine.high %v1565_v45, %v1565_v45  ;;  %v1815_v47 = vmax.f32 %v1566_v4, 0.0 }
 0x1a4   :  { %v12710_v53 = vpack.c.bf16 %v2141_v2, %v2124_v29  ;;  %v1816_v13 = vmax.f32 %v1565_v45, 0.0  ;;  %v12712_v5 = vcombine.low %v1810_v14, %v1811_v28  ;;  %v1837_v1 = vmax.f32 %v1652_v3, 0.0 }
 0x1a5   :  { %v1668_v51 = vcombine.high %v1660_v19, %v1660_v19  ;;  %v1669_v7 = vcombine.high %v1667_v60, %v1667_v60  ;;  %v12714_v55 = vcombine.low %v1812_v25, %v1813_v10  ;;  %v12716_v50 = vcombine.low %v1835_v30, %v1836_v35 }
 0x1a6   :  { %v2058_v42 = vcombine.low %v1814_v11, %v1815_v47  ;;  %v1838_v46 = vmax.f32 %v1660_v19, 0.0  ;;  %v1817_v20 = vmax.f32 %v1567_v33, 0.0  ;;  %v1840_v6 = vmax.f32 %v1667_v60, 0.0 }
 0x1a7   :  { %v1839_v24 = vmax.f32 %v1668_v51, 0.0  ;;  %v2350_v29 = vrot.slane %v2275_v58, 1  ;;  %v2072_v34 = vrot.slane %v1816_v13, %v12540_v8  ;;  %v2352_v14 = vrot.slane %v2282_v52, 1 }
 0x1a8   :  { %v12721_v48 = vcombine.low %v1837_v1, %v1838_v46  ;;  %v1362_v28 = vadd.f32 %v12652_v16, %v12587_v31  ;;  %v2065_v25 = vrot.slane %v2058_v42, %v12540_v8  ;;  %v1841_v10 = vmax.f32 %v1669_v7, 0.0 }
 0x1a9   :  { %v2351_v36 = vor.u32 %v2350_v29, %v12605_v26  ;;  %v2005_v19 = vrot.slane %v12629_v44, %v12540_v8  ;;  %v12731_v41 = vcombine.low %v1839_v24, %v1840_v6  ;;  %v1998_v45 = vrot.slane %v12625_v22, %v12540_v8  ;;  %v11900_v29 = vld [vmem:[%s14898_s3 + $0x18] sm:$0xff]  }
 0x1aa   :  { %v1568_v62 = vcombine.high %v1362_v28, %v1362_v28  ;;  %v1575_v32 = vrot.slane %v1362_v28, %v12540_v8  ;;  %v2015_v16 = vrot.slane %v12634_v49, %v12540_v8  ;;  %v2022_v2 = vrot.slane %v12639_v23, %v12540_v8  ;;  %11695 = vmatpush3.bf16.msra.mxu1 %v11900_v29 }
 0x1ab   :  { %v2353_v56 = vsel %vm165_vm0, %v2351_v36, %v2352_v14  ;;  %v1386_v4 = vadd.f32 %v12662_v15, %v12587_v31  ;;  %v2006_v3 = vcombine.low %v1998_v45, %v2005_v19  ;;  %v1391_v49 = vadd.f32 %v12694_v9, %v12587_v31  ;;  %11696 = vmatprep.subr.bf16.mxu1 %v11946_v18 }
 0x1ac   :  { %2416 = vrot.lane.b32.xlu1 %v2353_v56, %s11952_s27  ;;  %v1582_v44 = vrot.slane %v1568_v62, %v12540_v8  ;;  %v1583_v11 = vcombine.high %v1575_v32, %v1575_v32  ;;  %v1818_v60 = vmax.f32 %v1575_v32, 0.0  ;;  %v2023_v22 = vcombine.low %v2015_v16, %v2022_v2 }
 0x1ad   :  { %v1670_v30 = vcombine.high %v1386_v4, %v1386_v4  ;;  %v1677_v35 = vrot.slane %v1386_v4, %v12540_v8  ;;  %v2073_v33 = vcombine.low %v2065_v25, %v2072_v34  ;;  %v1687_v24 = vcombine.high %v1391_v49, %v1391_v49 }
 0x1ae   :  { %v1584_v23 = vcombine.high %v1582_v44, %v1582_v44  ;;  %v1819_v47 = vmax.f32 %v1583_v11, 0.0  ;;  %v2074_v13 = vcombine.low %v1817_v20, %v1818_v60  ;;  %v12748_v15 = vpack.c.bf16 %v2023_v22, %v2006_v3 }
 0x1af   :  { %v1684_v1 = vrot.slane %v1670_v30, %v12540_v8  ;;  %v1685_v51 = vcombine.high %v1677_v35, %v1677_v35  ;;  %v1842_v7 = vmax.f32 %v1677_v35, 0.0  ;;  %v1820_v42 = vmax.f32 %v1582_v44, 0.0  ;;  %v11901_v35 = vld [vmem:[%s14898_s3 + $0x20] sm:$0xff]  }
 0x1b0   :  { %v1821_v46 = vmax.f32 %v1584_v23, 0.0  ;;  %v1694_v6 = vrot.slane %v1391_v49, %v12540_v8  ;;  %2398 = vrot.lane.b32.xlu0 %v12748_v15, %s11951_s24  ;;  %v1701_v25 = vrot.slane %v1687_v24, %v12540_v8  ;;  %v12762_v62 = vpack.c.bf16 %v2073_v33, %v2073_v33  ;;  %11697 = vmatpush3.bf16.msra.mxu1 %v11901_v35 }
 0x1b1   :  { %v1686_v31 = vcombine.high %v1684_v1, %v1684_v1  ;;  %v1843_v9 = vmax.f32 %v1685_v51, 0.0  ;;  %v1844_v20 = vmax.f32 %v1684_v1, 0.0  ;;  %v12757_v34 = vcombine.low %v1841_v10, %v1842_v7  ;;  %v11902_v1 = vld [vmem:[%s14898_s3 + $0x28] sm:$0xff]   ;;  %11698 = vmatprep.subr.bf16.mxu1 %v11946_v18 }
 0x1b2   :  { %v2091_v28 = vcombine.low %v1821_v46, %v1822_v54  ;;  %v1702_v36 = vcombine.high %v1694_v6, %v1694_v6  ;;  %v1846_v19 = vmax.f32 %v1694_v6, 0.0  ;;  %v2279_v45 = vshrl.u32 %v12691_v21, 16 }
 0x1b3   :  { %v1845_v32 = vmax.f32 %v1686_v31, 0.0  ;;  %v2290_v56 = vshll.u32 %v12748_v15, 16  ;;  %v2075_v16 = vcombine.low %v1819_v47, %v1820_v42  ;;  %v12767_v10 = vcombine.low %v1843_v9, %v1844_v20 }
 0x1b4   :  { %v1703_v2 = vcombine.high %v1701_v25, %v1701_v25  ;;  %v1394_v12 = vadd.f32 %v12703_v37, %v12567_v0  ;;  %v1847_v54 = vmax.f32 %v1702_v36, 0.0  ;;  %v2354_v44 = vor.u32 %v2352_v14, %v2279_v45  ;;  %11699 = vmatpush3.bf16.msra.mxu1 %v11902_v1 }
 0x1b5   :  { %v12771_v4 = vcombine.low %v1845_v32, %v1846_v19  ;;  %v2355_v11 = vrot.slane %v2290_v56, 1  ;;  %v1848_v60 = vmax.f32 %v1701_v25, 0.0  ;;  %v2032_v30 = vrot.slane %v12664_v63, %v12540_v8  ;;  %11784 = vmatprep.subr.bf16.mxu1 %v11946_v18 }
 0x1b6   :  { %v1849_v3 = vmax.f32 %v1703_v2, 0.0  ;;  %v1710_v22 = vrot.slane %v1394_v12, %v12540_v8  ;;  %v2039_v37 = vrot.slane %v12670_v39, %v12540_v8  ;;  %v2049_v14 = vrot.slane %v12712_v5, %v12540_v8 }
 0x1b7   :  { %v2356_v0 = vsel %vm165_vm0, %v2354_v44, %v2355_v11  ;;  %v2056_v49 = vrot.slane %v12714_v55, %v12540_v8  ;;  %v2287_v63 = vshrl.u32 %v12748_v15, 16  ;;  %v2082_v47 = vrot.slane %v2074_v13, %v12540_v8 }
 0x1b8   :  { %2418 = vrot.lane.b32.xlu1 %v2356_v0, %s11952_s27  ;;  %v1711_v33 = vcombine.high %v1710_v22, %v1710_v22  ;;  %v1850_v23 = vmax.f32 %v1710_v22, 0.0  ;;  %v2040_v39 = vcombine.low %v2032_v30, %v2039_v37  ;;  %v2089_v5 = vrot.slane %v2075_v16, %v12540_v8 }
 0x1b9   :  { %v2057_v51 = vcombine.low %v2049_v14, %v2056_v49  ;;  %v2099_v7 = vrot.slane %v2091_v28, %v12540_v8  ;;  %v2194_v55 = vcombine.low %v1847_v54, %v1848_v60  ;;  %v12797_v42 = vrot.slane %v2279_v45, 7 }
 0x1ba   :  { %v1851_v46 = vmax.f32 %v1711_v33, 0.0  ;;  %v2210_v24 = vcombine.low %v1849_v3, %v1850_v23  ;;  %v2090_v13 = vcombine.low %v2082_v47, %v2089_v5  ;;  %v2106_v29 = vrot.slane %v12646_v38, %v12540_v8 }
 0x1bb   :  { %v12799_v6 = vpack.c.bf16 %v2057_v51, %v2040_v39  ;;  %v12804_v31 = vshll.u32 %v12762_v62, 16  ;;  %v2318_v9 = vshll.u32 %v12710_v53, 16  ;;  %v2303_v20 = vshrl.u32 %v12762_v62, 16 }
 0x1bc   :  { %v2150_v28 = vrot.slane %v12708_v40, %v12540_v8  ;;  %v2157_v25 = vrot.slane %v12716_v50, %v12540_v8  ;;  %v12814_v36 = vrot.slane %v2287_v63, 7  ;;  %v2107_v19 = vcombine.low %v2099_v7, %v2106_v29 }
 0x1bd   :  { %2400 = vrot.lane.b32.xlu0 %v12799_v6, %s11951_s24  ;;  %v2298_v38 = vshll.u32 %v12799_v6, 16  ;;  %v2361_v32 = vrot.slane %v12804_v31, 1  ;;  %v2357_v45 = vor.u32 %v2355_v11, %v2287_v63  ;;  %v2295_v16 = vshrl.u32 %v12799_v6, 16 }
 0x1be   :  { %v2158_v40 = vcombine.low %v2150_v28, %v2157_v25  ;;  %v2167_v50 = vrot.slane %v12721_v48, %v12540_v8  ;;  %v2249_v12 = vpack.c.bf16 %v2107_v19, %v2090_v13  ;;  %v2366_v54 = vrot.slane %v2318_v9, 1 }
 0x1bf   :  { %v2358_v2 = vrot.slane %v2298_v38, 1  ;;  %v12824_v44 = vor.u32 %v2361_v32, %v2303_v20  ;;  %v12826_v60 = vrot.slane %v2303_v20, 7  ;;  %v2174_v3 = vrot.slane %v12731_v41, %v12540_v8 }
 0x1c0   :  { %v2184_v11 = vrot.slane %v12757_v34, %v12540_v8  ;;  %v2191_v22 = vrot.slane %v12767_v10, %v12540_v8  ;;  %v2311_v30 = vshll.u32 %v2249_v12, 16  ;;  %v2315_v0 = vshrl.u32 %v12710_v53, 16 }
 0x1c1   :  { %v2359_v48 = vsel %vm165_vm0, %v2357_v45, %v2358_v2  ;;  %2404 = vrot.lane.b32.xlu0 %v2249_v12, %s11951_s24  ;;  %v2360_v35 = vor.u32 %v2358_v2, %v2295_v16  ;;  %v12838_v37 = vshrl.u32 %v2249_v12, 16  ;;  %v2297_v14 = vrot.slane %v2295_v16, 7 }
 0x1c2   :  { %2420 = vrot.lane.b32.xlu1 %v2359_v48, %s11952_s27  ;;  %v2382_v41 = vsel %vm12209_vm7, %v12824_v44, %v12804_v31  ;;  %v2175_v34 = vcombine.low %v2167_v50, %v2174_v3  ;;  %v2364_v49 = vrot.slane %v2311_v30, 1  ;;  %v2192_v33 = vcombine.low %v2184_v11, %v2191_v22 }
 0x1c3   :  { %v2362_v10 = vsel %vm165_vm0, %v2360_v35, %v2361_v32  ;;  %v2201_v23 = vrot.slane %v12771_v4, %v12540_v8  ;;  %v2208_v47 = vrot.slane %v2194_v55, %v12540_v8  ;;  %v2217_v1 = vrot.slane %v2210_v24, %v12540_v8 }
 0x1c4   :  { %v2251_v63 = vpack.c.bf16 %v2175_v34, %v2158_v40  ;;  %v2224_v39 = vrot.slane %v1851_v46, %v12540_v8  ;;  %v2365_v51 = vor.u32 %v2364_v49, %v12838_v37  ;;  %v2317_v5 = vrot.slane %v2315_v0, 7 }
 0x1c5   :  { %2402 = vrot.lane.b32.xlu0 %v12762_v62, %s11951_s24  ;;  %v2274_v7 = vrot.slane %v12605_v26, 7  ;;  %v2284_v6 = vor.u32 %v2282_v52, %v12797_v42  ;;  %v2209_v55 = vcombine.low %v2201_v23, %v2208_v47  ;;  %v2292_v20 = vor.u32 %v2290_v56, %v12814_v36 }
 0x1c6   :  { %2422 = vrot.lane.b32.xlu1 %v2362_v10, %s11952_s27  ;;  %v2326_v4 = vshll.u32 %v2251_v63, 16  ;;  %v2323_v13 = vshrl.u32 %v2251_v63, 16  ;;  %v2225_v24 = vcombine.low %v2217_v1, %v2224_v39  ;;  %v2367_v46 = vsel %vm165_vm0, %v2365_v51, %v2366_v54 }
 0x1c7   :  { %v2277_v62 = vor.u32 %v2275_v58, %v2274_v7  ;;  %v12862_v29 = vsel %vm86_vm4, %v2274_v7, %v2284_v6  ;;  %v2368_v21 = vor.u32 %v2366_v54, %v2315_v0  ;;  %v2252_v28 = vpack.c.bf16 %v2209_v55, %v2192_v33 }
 0x1c8   :  { %v2369_v52 = vrot.slane %v2326_v4, 1  ;;  %v2253_v25 = vpack.c.bf16 %v2225_v24, %v2225_v24  ;;  %v12874_v43 = vsel %vm86_vm4, %v12797_v42, %v2292_v20  ;;  %v2300_v58 = vor.u32 %v2298_v38, %v2297_v14 }
 0x1c9   :  { %2406 = vrot.lane.b32.xlu0 %v12710_v53, %s11951_s24  ;;  %v2348_v19 = vsel %vm12169_vm5, %v12605_v26, %v2277_v62  ;;  %v2310_v32 = vrot.slane %v12838_v37, 7  ;;  %v2325_v56 = vrot.slane %v2323_v13, 7  ;;  %v2334_v45 = vshll.u32 %v2252_v28, 16 }
 0x1ca   :  { %2426 = vrot.lane.b32.xlu1 %v2367_v46, %s11952_s27  ;;  %v2370_v15 = vsel %vm165_vm0, %v2368_v21, %v2369_v52  ;;  %v2342_v16 = vshll.u32 %v2253_v25, 16  ;;  %v2331_v40 = vshrl.u32 %v2252_v28, 16  ;;  %v2339_v50 = vshrl.u32 %v2253_v25, 16 }
 0x1cb   :  { %v12881_v2 = vsel %vm86_vm4, %v12814_v36, %v2300_v58  ;;  %v12883_v26 = vor.u32 %v2311_v30, %v2310_v32  ;;  %v2371_v42 = vor.u32 %v2369_v52, %v2323_v13  ;;  %v2372_v12 = vrot.slane %v2334_v45, 1 }
 0x1cc   :  { %v2375_v38 = vrot.slane %v2342_v16, 1  ;;  %v2308_v54 = vor.u32 %v12804_v31, %v12826_v60  ;;  %v2333_v44 = vrot.slane %v2331_v40, 7  ;;  %v2341_v3 = vrot.slane %v2339_v50, 7 }
 0x1cd   :  { %2408 = vrot.lane.b32.xlu0 %v2251_v63, %s11951_s24  ;;  %v2349_v11 = vsel %vm12169_vm5, %v12838_v37, %v12883_v26  ;;  %v2320_v36 = vor.u32 %v2318_v9, %v2317_v5  ;;  %v2373_v22 = vsel %vm165_vm0, %v2371_v42, %v2372_v12  ;;  %v2374_v48 = vor.u32 %v2372_v12, %v2331_v40 }
 0x1ce   :  { %2424 = vrot.lane.b32.xlu1 %v2382_v41, %s11952_s27  ;;  %v12897_v30 = vsel %vm86_vm4, %v2297_v14, %v2308_v54  ;;  %v2328_v60 = vor.u32 %v2326_v4, %v2325_v56  ;;  %v2336_v35 = vor.u32 %v2334_v45, %v2333_v44  ;;  %v2344_v0 = vor.u32 %v2342_v16, %v2341_v3 }
 0x1cf   :  { %v12900_v31 = vsel %vm86_vm4, %v2310_v32, %v2320_v36  ;;  %v2376_v34 = vsel %vm165_vm0, %v2374_v48, %v2375_v38  ;;  %v2377_v14 = vor.u32 %v2375_v38, %v2339_v50 }
 0x1d0   :  { %v12905_v53 = vsel %vm86_vm4, %v2317_v5, %v2328_v60  ;;  %v12908_v9 = vsel %vm86_vm4, %v2325_v56, %v2336_v35  ;;  %v12911_v41 = vsel %vm86_vm4, %v2333_v44, %v2344_v0 }
 0x1d1   :  { %2410 = vrot.lane.b32.xlu0 %v2252_v28, %s11951_s24  ;;  %v2383_v10 = vsel %vm12209_vm7, %v2377_v14, %v2342_v16 }
 0x1d2   :  { %2428 = vrot.lane.b32.xlu1 %v2370_v15, %s11952_s27 }
 0x1d5   :  { %2412 = vrot.lane.b32.xlu0 %v2253_v25, %s11951_s24 }
 0x1d6   :  { %2430 = vrot.lane.b32.xlu1 %v2373_v22, %s11952_s27 }
 0x1da   :  { %2432 = vrot.lane.b32.xlu1 %v2376_v34, %s11952_s27 }
 0x1de   :  { %2434 = vrot.lane.b32.xlu1 %v2383_v10, %s11952_s27 }
 0x1f8   :  { %v2395_v49 = vpop.permute.xlu0 %2394 }
 0x1f9   :  { %v2439_v33 = vsel %vm2436_vm12, %v2348_v19, %v2395_v49 }
 0x211   :  { %v2397_v46 = vpop.permute.xlu0 %2396 }
 0x212   :  { %v2442_v28 = vsel %vm2436_vm12, %v12862_v29, %v2397_v46 }
 0x21e   :  { %v2417_v23 = vpop.permute.xlu1 %2416 }
 0x21f   :  { %v2469_v63 = vsel %vm2467_vm13, %v2439_v33, %v2417_v23 }
 0x220   :  { %v2504_v47 = vcombine.high %v2469_v63, %v2469_v63  ;;  %v2511_v1 = vrot.slane %v2469_v63, %v12273_v59 }
 0x222   :  { %v2518_v39 = vrot.slane %v2504_v47, %v12273_v59  ;;  %v2519_v51 = vcombine.high %v2511_v1, %v2511_v1  ;;  %v2527_v7 = vrot.slane %v2511_v1, %v12273_v59  ;;  %v2399_v15 = vpop.permute.xlu0 %2398 }
 0x223   :  { %v2445_v0 = vsel %vm2436_vm12, %v12874_v43, %v2399_v15 }
 0x224   :  { %v2520_v5 = vcombine.high %v2518_v39, %v2518_v39  ;;  %v2541_v6 = vrot.slane %v2519_v51, %v12273_v59  ;;  %v2534_v4 = vrot.slane %v2518_v39, %v12273_v59 }
 0x226   :  { %v2548_v55 = vrot.slane %v2520_v5, %v12273_v59  ;;  %v2959_v13 = vcombine.low %v2527_v7, %v2541_v6  ;;  %v11483_v24 = vcombine.high %v2527_v7, %v2541_v6 }
 0x228   :  { %v2961_v62 = vcombine.low %v2534_v4, %v2548_v55  ;;  %v11484_v20 = vcombine.high %v2534_v4, %v2548_v55  ;;  %v2969_v21 = vrot.slane %v2959_v13, %v12273_v59  ;;  %v2976_v52 = vrot.slane %v11483_v24, %v12273_v59 }
 0x22a   :  { %v2983_v25 = vrot.slane %v2961_v62, %v12273_v59  ;;  %v2990_v19 = vrot.slane %v11484_v20, %v12273_v59  ;;  %v2991_v58 = vcombine.low %v2969_v21, %v2976_v52  ;;  %v2419_v32 = vpop.permute.xlu1 %2418 }
 0x22b   :  { %v2471_v56 = vsel %vm2467_vm13, %v2442_v28, %v2419_v32 }
 0x22c   :  { %v2992_v45 = vcombine.low %v2983_v25, %v2990_v19  ;;  %v2553_v16 = vcombine.high %v2471_v56, %v2471_v56  ;;  %v2560_v40 = vrot.slane %v2471_v56, %v12273_v59  ;;  %v2999_v50 = vrot.slane %v2991_v58, %v12273_v59 }
 0x22e   :  { %v3006_v42 = vrot.slane %v2992_v45, %v12273_v59  ;;  %v2567_v12 = vrot.slane %v2553_v16, %v12273_v59  ;;  %v2568_v29 = vcombine.high %v2560_v40, %v2560_v40  ;;  %v2576_v3 = vrot.slane %v2560_v40, %v12273_v59 }
 0x22f   :  { %v2401_v38 = vpop.permute.xlu0 %2400 }
 0x230   :  { %v3007_v54 = vcombine.low %v2999_v50, %v3006_v42  ;;  %v2569_v44 = vcombine.high %v2567_v12, %v2567_v12  ;;  %v2590_v36 = vrot.slane %v2568_v29, %v12273_v59  ;;  %v2583_v22 = vrot.slane %v2567_v12, %v12273_v59 }
 0x231   :  { %v2448_v7 = vsel %vm2436_vm12, %v12881_v2, %v2401_v38 }
 0x232   :  { %v2597_v48 = vrot.slane %v2569_v44, %v12273_v59  ;;  %v3008_v60 = vcombine.low %v2576_v3, %v2590_v36  ;;  %v11485_v35 = vcombine.high %v2576_v3, %v2590_v36  ;;  %11701 = vmatmul.mubr.msk.bf16.vlgmr.msra.gmra.mrb[16].mxu1 %vm3474_vm14, %v3007_v54 }
 0x233   :  { %v2405_v34 = vpop.permute.xlu0 %2404  ;;  %11704 = vmatprep.mubr.msk.bf16.mxu1 %vm11948_vm8, %v11946_v18 }
 0x234   :  { %v3010_v14 = vcombine.low %v2583_v22, %v2597_v48  ;;  %v11486_v10 = vcombine.high %v2583_v22, %v2597_v48  ;;  %v3018_v49 = vrot.slane %v3008_v60, %v12273_v59  ;;  %v3025_v33 = vrot.slane %v11485_v35, %v12273_v59  ;;  %v2421_v23 = vpop.permute.xlu1 %2420 }
 0x235   :  { %v2473_v63 = vsel %vm2467_vm13, %v2445_v0, %v2421_v23  ;;  %v2454_v62 = vsel %vm2436_vm12, %v2349_v11, %v2405_v34 }
 0x236   :  { %v3032_v47 = vrot.slane %v3010_v14, %v12273_v59  ;;  %v3039_v1 = vrot.slane %v11486_v10, %v12273_v59  ;;  %v2602_v39 = vcombine.high %v2473_v63, %v2473_v63  ;;  %v3040_v51 = vcombine.low %v3018_v49, %v3025_v33 }
 0x237   :  { %v2609_v43 = vrot.slane %v2473_v63, %v12273_v59  ;;  %v2403_v5 = vpop.permute.xlu0 %2402 }
 0x238   :  { %v2616_v6 = vrot.slane %v2602_v39, %v12273_v59  ;;  %v2423_v4 = vpop.permute.xlu1 %2422  ;;  %v3041_v24 = vcombine.low %v3032_v47, %v3039_v1  ;;  %v2451_v28 = vsel %vm2436_vm12, %v12897_v30, %v2403_v5  ;;  %v3048_v19 = vrot.slane %v3040_v51, %v12273_v59 }
 0x239   :  { %v2617_v55 = vcombine.high %v2609_v43, %v2609_v43  ;;  %v2475_v13 = vsel %vm2467_vm13, %v2448_v7, %v2423_v4  ;;  %v2625_v2 = vrot.slane %v2609_v43, %v12273_v59 }
 0x23a   :  { %v2618_v46 = vcombine.high %v2616_v6, %v2616_v6  ;;  %v2651_v20 = vcombine.high %v2475_v13, %v2475_v13  ;;  %v2658_v21 = vrot.slane %v2475_v13, %v12273_v59  ;;  %v2632_v58 = vrot.slane %v2616_v6, %v12273_v59 }
 0x23b   :  { %v2639_v52 = vrot.slane %v2617_v55, %v12273_v59  ;;  %v2407_v25 = vpop.permute.xlu0 %2406  ;;  %v3055_v16 = vrot.slane %v3041_v24, %v12273_v59 }
 0x23c   :  { %v2646_v32 = vrot.slane %v2618_v46, %v12273_v59  ;;  %v2665_v37 = vrot.slane %v2651_v20, %v12273_v59  ;;  %v2666_v26 = vcombine.high %v2658_v21, %v2658_v21  ;;  %v2427_v11 = vpop.permute.xlu1 %2426  ;;  %v2674_v30 = vrot.slane %v2658_v21, %v12273_v59 }
 0x23d   :  { %v3057_v15 = vcombine.low %v2625_v2, %v2639_v52  ;;  %v11487_v56 = vcombine.high %v2625_v2, %v2639_v52  ;;  %v2479_v45 = vsel %vm2467_vm13, %v2454_v62, %v2427_v11  ;;  %v2457_v42 = vsel %vm2436_vm12, %v12900_v31, %v2407_v25 }
 0x23e   :  { %v3059_v40 = vcombine.low %v2632_v58, %v2646_v32  ;;  %v2667_v50 = vcombine.high %v2665_v37, %v2665_v37  ;;  %v11488_v12 = vcombine.high %v2632_v58, %v2646_v32  ;;  %v2681_v29 = vrot.slane %v2665_v37, %v12273_v59 }
 0x23f   :  { %v2688_v38 = vrot.slane %v2666_v26, %v12273_v59  ;;  %v2723_v54 = vcombine.high %v2479_v45, %v2479_v45  ;;  %v3067_v44 = vrot.slane %v3057_v15, %v12273_v59  ;;  %v3074_v3 = vrot.slane %v11487_v56, %v12273_v59  ;;  %v2409_v13 = vpop.permute.xlu0 %2408 }
 0x240   :  { %v2695_v36 = vrot.slane %v2667_v50, %v12273_v59  ;;  %v2730_v22 = vrot.slane %v2479_v45, %v12273_v59  ;;  %v2425_v48 = vpop.permute.xlu1 %2424  ;;  %v3081_v60 = vrot.slane %v3059_v40, %v12273_v59  ;;  %v3088_v1 = vrot.slane %v11488_v12, %v12273_v59 }
 0x241   :  { %v3106_v35 = vcombine.low %v2674_v30, %v2688_v38  ;;  %v11489_v0 = vcombine.high %v2674_v30, %v2688_v38  ;;  %v2737_v31 = vrot.slane %v2723_v54, %v12273_v59  ;;  %v3089_v39 = vcombine.low %v3067_v44, %v3074_v3 }
 0x242   :  { %v3108_v34 = vcombine.low %v2681_v29, %v2695_v36  ;;  %v11490_v14 = vcombine.high %v2681_v29, %v2695_v36  ;;  %v2738_v10 = vcombine.high %v2730_v22, %v2730_v22  ;;  %v2746_v49 = vrot.slane %v2730_v22, %v12273_v59 }
 0x243   :  { %v12988_v33 = vrot.slane %v3106_v35, %v12273_v59  ;;  %v12991_v23 = vrot.slane %v11489_v0, %v12273_v59  ;;  %v2739_v63 = vcombine.high %v2737_v31, %v2737_v31  ;;  %v2753_v47 = vrot.slane %v2737_v31, %v12273_v59  ;;  %v2411_v3 = vpop.permute.xlu0 %2410 }
 0x244   :  { %v2760_v51 = vrot.slane %v2738_v10, %v12273_v59  ;;  %v2768_v43 = vcombine.high %v2746_v49, %v2746_v49  ;;  %v2429_v5 = vpop.permute.xlu1 %2428  ;;  %v12997_v7 = vrot.slane %v3108_v34, %v12273_v59  ;;  %v3056_v55 = vcombine.low %v3048_v19, %v3055_v16 }
 0x245   :  { %v2767_v6 = vrot.slane %v2739_v63, %v12273_v59  ;;  %v2769_v4 = vcombine.high %v2753_v47, %v2753_v47  ;;  %v13001_v24 = vrot.slane %v11490_v14, %v12273_v59  ;;  %v2477_v20 = vsel %vm2467_vm13, %v2451_v28, %v2425_v48 }
 0x246   :  { %v2770_v46 = vcombine.high %v2760_v51, %v2760_v51  ;;  %v13003_v62 = vcombine.low %v2760_v51, %v2768_v43  ;;  %v3138_v21 = vcombine.low %v12988_v33, %v12991_v23  ;;  %11705 = vmatmul.mubr.msk.bf16.gmra.mrb[20].mxu1 %vm3474_vm14, %v3056_v55  ;;  %v2706_v52 = vrot.slane %v2477_v20, %v12273_v59 }
 0x247   :  { %v3204_v2 = vcombine.low %v2767_v6, %v2769_v4  ;;  %v2481_v25 = vsel %vm2467_vm13, %v2457_v42, %v2429_v5  ;;  %v2460_v19 = vsel %vm2436_vm12, %v12905_v53, %v2409_v13  ;;  %v2771_v58 = vcombine.high %v2767_v6, %v2767_v6  ;;  %11708 = vmatprep.mubr.msk.bf16.mxu1 %vm11948_vm8, %v11946_v18 }
 0x248   :  { %v2772_v32 = vcombine.high %v2481_v25, %v2481_v25  ;;  %v2779_v37 = vrot.slane %v2481_v25, %v12273_v59  ;;  %v13016_v28 = vcombine.low %v2770_v46, %v2753_v47  ;;  %v3179_v26 = vrot.slane %v13003_v62, %v12273_v59  ;;  %v2431_v40 = vpop.permute.xlu1 %2430 }
 0x249   :  { %v2707_v11 = vcombine.high %v2706_v52, %v2706_v52  ;;  %v2714_v15 = vrot.slane %v2706_v52, %v12273_v59  ;;  %v3214_v16 = vrot.slane %v3204_v2, %v12273_v59  ;;  %v3090_v42 = vcombine.low %v3081_v60, %v3088_v1  ;;  %v2413_v2 = vpop.permute.xlu0 %2412 }
 0x24a   :  { %v2786_v56 = vrot.slane %v2772_v32, %v12273_v59  ;;  %v2787_v45 = vcombine.high %v2779_v37, %v2779_v37  ;;  %v2795_v53 = vrot.slane %v2779_v37, %v12273_v59  ;;  %v3097_v12 = vrot.slane %v3089_v39, %v12273_v59 }
 0x24b   :  { %v2721_v50 = vrot.slane %v2707_v11, %v12273_v59  ;;  %v2722_v30 = vcombine.high %v2714_v15, %v2714_v15  ;;  %v3104_v35 = vrot.slane %v3090_v42, %v12273_v59  ;;  %v2483_v51 = vsel %vm2467_vm13, %v2460_v19, %v2431_v40 }
 0x24c   :  { %v2788_v29 = vcombine.high %v2786_v56, %v2786_v56  ;;  %v2802_v38 = vrot.slane %v2786_v56, %v12273_v59  ;;  %v2809_v54 = vrot.slane %v2787_v45, %v12273_v59  ;;  %v2817_v44 = vcombine.high %v2795_v53, %v2795_v53  ;;  %v2433_v43 = vpop.permute.xlu1 %2432 }
 0x24d   :  { %v3155_v36 = vcombine.low %v2714_v15, %v2721_v50  ;;  %v3156_v22 = vcombine.low %v2722_v30, %v2746_v49  ;;  %v3205_v48 = vcombine.low %v2771_v58, %v2795_v53  ;;  %v3105_v47 = vcombine.low %v3097_v12, %v3104_v35 }
 0x24e   :  { %v2816_v0 = vrot.slane %v2788_v29, %v12273_v59  ;;  %v2818_v31 = vcombine.high %v2802_v38, %v2802_v38  ;;  %v2819_v34 = vcombine.high %v2809_v54, %v2809_v54  ;;  %v13030_v14 = vcombine.low %v2809_v54, %v2817_v44 }
 0x24f   :  { %v3165_v60 = vrot.slane %v3155_v36, %v12273_v59  ;;  %v3172_v10 = vrot.slane %v3156_v22, %v12273_v59  ;;  %v3221_v63 = vrot.slane %v3205_v48, %v12273_v59  ;;  %v2463_v49 = vsel %vm2436_vm12, %v12908_v9, %v2411_v3  ;;  %11709 = vmatmul.mubr.msk.bf16.gmra.mrb[24].mxu1 %vm3474_vm14, %v3105_v47 }
 0x250   :  { %v13035_v1 = vcombine.low %v2819_v34, %v2802_v38  ;;  %v3253_v39 = vcombine.low %v2816_v0, %v2818_v31  ;;  %v3186_v5 = vrot.slane %v13016_v28, %v12273_v59  ;;  %v2821_v55 = vcombine.high %v2483_v51, %v2483_v51  ;;  %11712 = vmatprep.mubr.msk.bf16.mxu1 %vm11948_vm8, %v11946_v18  ;;  %v2435_v29 = vpop.permute.xlu1 %2434 }
 0x251   :  { %v13042_v6 = vcombine.low %v3165_v60, %v3172_v10  ;;  %v13044_v4 = vcombine.low %v3214_v16, %v3221_v63  ;;  %v3228_v13 = vrot.slane %v13030_v14, %v12273_v59  ;;  %v2820_v9 = vcombine.high %v2816_v0, %v2816_v0 }
 0x252   :  { %v3235_v46 = vrot.slane %v13035_v1, %v12273_v59  ;;  %v2828_v20 = vrot.slane %v2483_v51, %v12273_v59  ;;  %v2835_v52 = vrot.slane %v2821_v55, %v12273_v59  ;;  %v3263_v25 = vrot.slane %v3253_v39, %v12273_v59 }
 0x253   :  { %v2485_v19 = vsel %vm2467_vm13, %v2463_v49, %v2433_v43  ;;  %v3139_v58 = vcombine.low %v12997_v7, %v13001_v24  ;;  %v2466_v45 = vsel %vm2436_vm12, %v12911_v41, %v2413_v2  ;;  %v3146_v53 = vrot.slane %v3138_v21, %v12273_v59 }
 0x254   :  { %v2836_v32 = vcombine.high %v2828_v20, %v2828_v20  ;;  %v2844_v37 = vrot.slane %v2828_v20, %v12273_v59  ;;  %v2870_v28 = vcombine.high %v2485_v19, %v2485_v19  ;;  %v2877_v11 = vrot.slane %v2485_v19, %v12273_v59 }
 0x255   :  { %v2837_v15 = vcombine.high %v2835_v52, %v2835_v52  ;;  %v2851_v56 = vrot.slane %v2835_v52, %v12273_v59  ;;  %v3153_v33 = vrot.slane %v3139_v58, %v12273_v59  ;;  %v2487_v35 = vsel %vm2467_vm13, %v2466_v45, %v2435_v29 }
 0x256   :  { %v2858_v16 = vrot.slane %v2836_v32, %v12273_v59  ;;  %v2866_v7 = vcombine.high %v2844_v37, %v2844_v37  ;;  %v3254_v24 = vcombine.low %v2820_v9, %v2844_v37  ;;  %v2884_v40 = vrot.slane %v2870_v28, %v12273_v59 }
 0x257   :  { %v2865_v50 = vrot.slane %v2837_v15, %v12273_v59  ;;  %v2867_v30 = vcombine.high %v2851_v56, %v2851_v56  ;;  %v2885_v42 = vcombine.high %v2877_v11, %v2877_v11  ;;  %v2893_v12 = vrot.slane %v2877_v11, %v12273_v59 }
 0x258   :  { %v2868_v38 = vcombine.high %v2858_v16, %v2858_v16  ;;  %v3270_v41 = vrot.slane %v3254_v24, %v12273_v59  ;;  %v2886_v54 = vcombine.high %v2884_v40, %v2884_v40  ;;  %v2900_v44 = vrot.slane %v2884_v40, %v12273_v59 }
 0x259   :  { %v3302_v23 = vcombine.low %v2865_v50, %v2867_v30  ;;  %v2869_v21 = vcombine.high %v2865_v50, %v2865_v50  ;;  %v2907_v3 = vrot.slane %v2885_v42, %v12273_v59  ;;  %v3255_v0 = vcombine.low %v2858_v16, %v2866_v7 }
 0x25a   :  { %v3256_v36 = vcombine.low %v2868_v38, %v2851_v56  ;;  %v3285_v22 = vcombine.low %v3263_v25, %v3270_v41  ;;  %v2914_v48 = vrot.slane %v2886_v54, %v12273_v59  ;;  %v2915_v31 = vcombine.high %v2893_v12, %v2893_v12  ;;  %v11482_v54 = vld [vmem:[%s14899_s4] ss:$0 sm:$0xff] }
 0x25b   :  { %v2916_v34 = vcombine.high %v2900_v44, %v2900_v44  ;;  %v2917_v14 = vcombine.high %v2907_v3, %v2907_v3  ;;  %v3312_v10 = vrot.slane %v3302_v23, %v12273_v59  ;;  %v3303_v63 = vcombine.low %v2869_v21, %v2893_v12 }
 0x25c   :  { %v3284_v60 = vrot.slane %v3256_v36, %v12273_v59  ;;  %v3154_v47 = vcombine.low %v3146_v53, %v3153_v33  ;;  %v3304_v1 = vcombine.low %v2907_v3, %v2915_v31  ;;  %v2918_v49 = vcombine.high %v2914_v48, %v2914_v48 }
 0x25d   :  { %v3305_v39 = vcombine.low %v2917_v14, %v2900_v44  ;;  %v2925_v51 = vrot.slane %v2487_v35, %v12273_v59  ;;  %v3319_v43 = vrot.slane %v3303_v63, %v12273_v59  ;;  %v3188_v55 = vcombine.low %v3179_v26, %v3186_v5 }
 0x25e   :  { %11713 = vmatmul.mubr.msk.bf16.gmra.mrb[28].mxu1 %vm3474_vm14, %v3154_v47  ;;  %v3195_v9 = vrot.slane %v13042_v6, %v12273_v59  ;;  %v3237_v20 = vcombine.low %v3228_v13, %v3235_v46  ;;  %v3277_v2 = vrot.slane %v3255_v0, %v12273_v59  ;;  %v3351_v25 = vcombine.low %v2914_v48, %v2916_v34  ;;  %v11903_v48 = vld [vmem:[%s14900_s5] sm:$0xff]  }
 0x25f   :  { %v3333_v52 = vrot.slane %v3305_v39, %v12273_v59  ;;  %v2926_v19 = vcombine.high %v2925_v51, %v2925_v51  ;;  %11716 = vmatprep.mubr.msk.bf16.mxu1 %vm11948_vm8, %v11946_v18  ;;  %v3326_v58 = vrot.slane %v3304_v1, %v12273_v59  ;;  %v3334_v32 = vcombine.low %v3312_v10, %v3319_v43 }
 0x260   :  { %v2933_v37 = vrot.slane %v2925_v51, %v12273_v59  ;;  %v3202_v62 = vrot.slane %v3188_v55, %v12273_v59  ;;  %v3244_v5 = vrot.slane %v13044_v4, %v12273_v59  ;;  %v3251_v6 = vrot.slane %v3237_v20, %v12273_v59  ;;  %11737 = vmatpush3.bf16.msra.mxu0 %v11903_v48 }
 0x261   :  { %v2940_v26 = vrot.slane %v2926_v19, %v12273_v59  ;;  %v3286_v13 = vcombine.low %v3277_v2, %v3284_v60  ;;  %v3335_v15 = vcombine.low %v3326_v58, %v3333_v52  ;;  %v3360_v56 = vrot.slane %v3351_v25, %v12273_v59  ;;  %11738 = vmatprep.subr.bf16.mxu0 %v11946_v18  ;;  %v11904_v25 = vld [vmem:[%s14900_s5 + $0x8] sm:$0xff]  }
 0x262   :  { %v2941_v46 = vcombine.high %v2933_v37, %v2933_v37  ;;  %v3352_v28 = vcombine.low %v2918_v49, %v2933_v37  ;;  %v3203_v11 = vcombine.low %v3195_v9, %v3202_v62  ;;  %v3252_v45 = vcombine.low %v3244_v5, %v3251_v6 }
 0x263   :  { %v3293_v53 = vrot.slane %v3285_v22, %v12273_v59  ;;  %v3300_v16 = vrot.slane %v3286_v13, %v12273_v59  ;;  %v3342_v40 = vrot.slane %v3334_v32, %v12273_v59  ;;  %v3349_v4 = vrot.slane %v3335_v15, %v12273_v59 }
 0x264   :  { %v3353_v7 = vcombine.low %v2940_v26, %v2941_v46  ;;  %v3367_v24 = vrot.slane %v3352_v28, %v12273_v59  ;;  %v2942_v33 = vcombine.high %v11482_v54, %v11482_v54  ;;  %v13127_v23 = vrot.slane %v11482_v54, %v12540_v8  ;;  %11739 = vmatpush3.bf16.msra.mxu0 %v11904_v25 }
 0x265   :  { %v3301_v50 = vcombine.low %v3293_v53, %v3300_v16  ;;  %v3350_v12 = vcombine.low %v3342_v40, %v3349_v4  ;;  %11740 = vmatprep.subr.bf16.mxu0 %v11946_v18 }
 0x266   :  { %v3374_v30 = vrot.slane %v3353_v7, %v12273_v59  ;;  %v3375_v42 = vcombine.low %v3360_v56, %v3367_v24  ;;  %11717 = vmatmul.mubr.msk.bf16.gmra.mrb[32].mxu1 %vm3474_vm14, %v3203_v11  ;;  %v13130_v21 = vrot.slane %v2942_v33, %v12540_v8  ;;  %v13134_v44 = vcombine.high %v13127_v23, %v13127_v23 }
 0x267   :  { %11720 = vmatprep.mubr.msk.bf16.mxu1 %vm11948_vm8, %v11946_v18 }
 0x268   :  { %v3382_v29 = vrot.slane %v3375_v42, %v12273_v59  ;;  %v3389_v38 = vrot.slane %v3374_v30, %v12273_v59  ;;  %v13138_v3 = vcombine.high %v13130_v21, %v13130_v21  ;;  %v3427_v36 = vcombine.low %v13127_v23, %v13134_v44 }
 0x26a   :  { %v3390_v41 = vcombine.low %v3382_v29, %v3389_v38  ;;  %v3428_v22 = vcombine.low %v13130_v21, %v13138_v3  ;;  %v13148_v35 = vrot.slane %v3427_v36, %v12540_v8 }
 0x26c   :  { %v3442_v0 = vrot.slane %v3428_v22, %v12540_v8 }
 0x26e   :  { %11721 = vmatmul.mubr.msk.bf16.gmra.mrb[36].mxu1 %vm3474_vm14, %v3252_v45  ;;  %v13153_v31 = vcombine.low %v13148_v35, %v3442_v0 }
 0x26f   :  { %11724 = vmatprep.mubr.msk.bf16.mxu1 %vm11948_vm8, %v11946_v18 }
 0x276   :  { %11725 = vmatmul.mubr.msk.bf16.gmra.mrb[40].mxu1 %vm3474_vm14, %v3301_v50 }
 0x277   :  { %11728 = vmatprep.mubr.msk.bf16.mxu1 %vm11948_vm8, %v11946_v18 }
 0x27e   :  { %11729 = vmatmul.mubr.msk.bf16.gmra.mrb[44].mxu1 %vm3474_vm14, %v3350_v12 }
 0x27f   :  { %11732 = vmatprep.mubr.msk.bf16.mxu1 %vm11948_vm8, %v11946_v18 }
 0x286   :  { %11733 = vmatmul.mubr.msk.bf16.gmra.mrb[48].mxu1 %vm3474_vm14, %v3390_v41 }
 0x287   :  { %11790 = vmatprep.mubr.msk.bf16.mxu1 %vm11948_vm8, %v11946_v18 }
 0x305   :  { %v3536_v34 = vpop.f32.mrb[16].mxu1 }
 0x306   :  { %v3537_v14 = vadd.f32 %v3536_v34, %v13153_v31  ;;  %v11702_v60 = vpop.f32.mrb[17].mxu1 }
 0x307   :  { %v3539_v10 = vpop.f32.mrb[18].mxu1 }
 0x308   :  { %v3625_v63 = vcombine.high %v3537_v14, %v3537_v14  ;;  %v3632_v47 = vrot.slane %v3537_v14, %v12540_v8  ;;  %v3540_v1 = vadd.f32 %v3539_v10, %v13153_v31  ;;  %v11703_v39 = vpop.f32.mrb[19].mxu1 }
 0x30a   :  { %v3639_v49 = vrot.slane %v3625_v63, %v12540_v8  ;;  %v3640_v51 = vcombine.high %v3632_v47, %v3632_v47  ;;  %v3642_v43 = vcombine.high %v3540_v1, %v3540_v1  ;;  %v3649_v55 = vrot.slane %v3540_v1, %v12540_v8 }
 0x30b   :  { %v3992_v19 = vmax.f32 %v3632_v47, 0.0 }
 0x30c   :  { %v3641_v9 = vcombine.high %v3639_v49, %v3639_v49  ;;  %v3993_v20 = vmax.f32 %v3640_v51, 0.0  ;;  %v3656_v2 = vrot.slane %v3642_v43, %v12540_v8  ;;  %v3657_v52 = vcombine.high %v3649_v55, %v3649_v55  ;;  %v11905_v51 = vld [vmem:[%s14900_s5 + $0x10] sm:$0xff]  }
 0x30d   :  { %v3994_v58 = vmax.f32 %v3639_v49, 0.0  ;;  %v3996_v62 = vmax.f32 %v3649_v55, 0.0  ;;  %11741 = vmatpush3.bf16.msra.mxu0 %v11905_v51 }
 0x30e   :  { %v3995_v32 = vmax.f32 %v3641_v9, 0.0  ;;  %v3658_v37 = vcombine.high %v3656_v2, %v3656_v2  ;;  %v3997_v26 = vmax.f32 %v3657_v52, 0.0  ;;  %v4132_v5 = vcombine.low %v3992_v19, %v3993_v20  ;;  %11742 = vmatprep.subr.bf16.mxu0 %v11946_v18 }
 0x30f   :  { %v3998_v13 = vmax.f32 %v3656_v2, 0.0  ;;  %v3444_v2 = vcombine.low %v13130_v21, %v13127_v23 }
 0x310   :  { %v4133_v6 = vcombine.low %v3994_v58, %v3995_v32  ;;  %v3999_v46 = vmax.f32 %v3658_v37, 0.0  ;;  %v4149_v28 = vcombine.low %v3996_v62, %v3997_v26  ;;  %v4140_v56 = vrot.slane %v4132_v5, %v12540_v8 }
 0x312   :  { %v4150_v11 = vcombine.low %v3998_v13, %v3999_v46  ;;  %v4147_v15 = vrot.slane %v4133_v6, %v12540_v8  ;;  %v4157_v45 = vrot.slane %v4149_v28, %v12540_v8 }
 0x314   :  { %v4164_v53 = vrot.slane %v4150_v11, %v12540_v8  ;;  %v4148_v16 = vcombine.low %v4140_v56, %v4147_v15 }
 0x316   :  { %v4165_v7 = vcombine.low %v4157_v45, %v4164_v53  ;;  %v13206_v53 = vrot.slane %v3444_v2, %v12540_v8 }
 0x318   :  { %v13169_v24 = vpack.c.bf16 %v4165_v7, %v4148_v16 }
 0x319   :  { %v3544_v40 = vpop.f32.mrb[20].mxu1 }
 0x31a   :  { %v13172_v4 = vshrl.u32 %v13169_v24, 16  ;;  %4604 = vrot.lane.b32.xlu0 %v13169_v24, %s11951_s24  ;;  %v3545_v50 = vadd.f32 %v3544_v40, %v13153_v31  ;;  %v11706_v30 = vpop.f32.mrb[21].mxu1  ;;  %v4485_v12 = vshll.u32 %v13169_v24, 16 }
 0x31b   :  { %v3547_v42 = vpop.f32.mrb[22].mxu1 }
 0x31c   :  { %v4484_v29 = vrot.slane %v13172_v4, 7  ;;  %v3659_v38 = vcombine.high %v3545_v50, %v3545_v50  ;;  %v3666_v41 = vrot.slane %v3545_v50, %v12540_v8  ;;  %v3548_v54 = vadd.f32 %v3547_v42, %v13153_v31  ;;  %v11707_v33 = vpop.f32.mrb[23].mxu1 }
 0x31e   :  { %v13185_v36 = vor.u32 %v4485_v12, %v4484_v29  ;;  %v3673_v22 = vrot.slane %v3659_v38, %v12540_v8  ;;  %v3674_v48 = vcombine.high %v3666_v41, %v3666_v41  ;;  %v3676_v0 = vcombine.high %v3548_v54, %v3548_v54 }
 0x31f   :  { %v3683_v34 = vrot.slane %v3548_v54, %v12540_v8  ;;  %v4000_v43 = vmax.f32 %v3666_v41, 0.0  ;;  %v3453_v41 = vcombine.low %v13134_v44, %v13130_v21 }
 0x320   :  { %v4558_v14 = vsel %vm12169_vm5, %v13172_v4, %v13185_v36  ;;  %v3675_v60 = vcombine.high %v3673_v22, %v3673_v22  ;;  %v3690_v10 = vrot.slane %v3676_v0, %v12540_v8  ;;  %v4001_v63 = vmax.f32 %v3674_v48, 0.0 }
 0x321   :  { %v3691_v47 = vcombine.high %v3683_v34, %v3683_v34  ;;  %v4002_v1 = vmax.f32 %v3673_v22, 0.0  ;;  %v4004_v55 = vmax.f32 %v3683_v34, 0.0  ;;  %v3454_v48 = vcombine.low %v13138_v3, %v13127_v23 }
 0x322   :  { %v4003_v39 = vmax.f32 %v3675_v60, 0.0  ;;  %v3692_v49 = vcombine.high %v3690_v10, %v3690_v10  ;;  %v3552_v20 = vpop.f32.mrb[24].mxu1  ;;  %v4006_v25 = vmax.f32 %v3690_v10, 0.0  ;;  %v4166_v37 = vcombine.low %v4000_v43, %v4001_v63 }
 0x323   :  { %v4005_v9 = vmax.f32 %v3691_v47, 0.0  ;;  %v3553_v58 = vadd.f32 %v3552_v20, %v13153_v31  ;;  %v11710_v32 = vpop.f32.mrb[25].mxu1  ;;  %v13221_v20 = vrot.slane %v3453_v41, %v12540_v8  ;;  %v3468_v2 = vrot.slane %v3454_v48, %v12540_v8 }
 0x324   :  { %v4167_v52 = vcombine.low %v4002_v1, %v4003_v39  ;;  %v4007_v19 = vmax.f32 %v3692_v49, 0.0  ;;  %v3555_v26 = vpop.f32.mrb[26].mxu1  ;;  %v4174_v7 = vrot.slane %v4166_v37, %v12540_v8  ;;  %v4560_v39 = vrot.slane %v4485_v12, 1 }
 0x325   :  { %v4183_v62 = vcombine.low %v4004_v55, %v4005_v9  ;;  %v3693_v6 = vcombine.high %v3553_v58, %v3553_v58  ;;  %v3700_v13 = vrot.slane %v3553_v58, %v12540_v8  ;;  %v3556_v46 = vadd.f32 %v3555_v26, %v13153_v31  ;;  %v11711_v28 = vpop.f32.mrb[27].mxu1 }
 0x326   :  { %v4184_v5 = vcombine.low %v4006_v25, %v4007_v19  ;;  %v4181_v11 = vrot.slane %v4167_v52, %v12540_v8  ;;  %v4561_v25 = vor.u32 %v4560_v39, %v13172_v4  ;;  %v3452_v37 = vcombine.low %v13148_v35, %v13206_v53 }
 0x327   :  { %v3707_v15 = vrot.slane %v3693_v6, %v12540_v8  ;;  %v3708_v56 = vcombine.high %v3700_v13, %v3700_v13  ;;  %v3710_v45 = vcombine.high %v3556_v46, %v3556_v46  ;;  %v3717_v16 = vrot.slane %v3556_v46, %v12540_v8 }
 0x328   :  { %v4191_v40 = vrot.slane %v4183_v62, %v12540_v8  ;;  %v4198_v50 = vrot.slane %v4184_v5, %v12540_v8  ;;  %v4182_v33 = vcombine.low %v4174_v7, %v4181_v11  ;;  %v4008_v0 = vmax.f32 %v3700_v13, 0.0 }
 0x329   :  { %v3709_v30 = vcombine.high %v3707_v15, %v3707_v15  ;;  %v4009_v42 = vmax.f32 %v3708_v56, 0.0  ;;  %v3724_v38 = vrot.slane %v3710_v45, %v12540_v8  ;;  %v3725_v54 = vcombine.high %v3717_v16, %v3717_v16 }
 0x32a   :  { %v4199_v22 = vcombine.low %v4191_v40, %v4198_v50  ;;  %v4010_v34 = vmax.f32 %v3707_v15, 0.0  ;;  %v4012_v63 = vmax.f32 %v3717_v16, 0.0  ;;  %v13239_v15 = vcombine.low %v13221_v20, %v3468_v2 }
 0x32b   :  { %v4011_v60 = vmax.f32 %v3709_v30, 0.0  ;;  %v3726_v10 = vcombine.high %v3724_v38, %v3724_v38  ;;  %v4013_v47 = vmax.f32 %v3725_v54, 0.0  ;;  %v4200_v49 = vcombine.low %v4008_v0, %v4009_v42 }
 0x32c   :  { %v4455_v1 = vpack.c.bf16 %v4199_v22, %v4182_v33  ;;  %v4014_v43 = vmax.f32 %v3724_v38, 0.0 }
 0x32d   :  { %v4201_v51 = vcombine.low %v4010_v34, %v4011_v60  ;;  %v4015_v21 = vmax.f32 %v3726_v10, 0.0  ;;  %v4217_v44 = vcombine.low %v4012_v63, %v4013_v47  ;;  %v4208_v62 = vrot.slane %v4200_v49, %v12540_v8 }
 0x32e   :  { %4606 = vrot.lane.b32.xlu0 %v4455_v1, %s11951_s24  ;;  %v4492_v55 = vshll.u32 %v4455_v1, 16  ;;  %v4489_v9 = vshrl.u32 %v4455_v1, 16 }
 0x32f   :  { %v4218_v23 = vcombine.low %v4014_v43, %v4015_v21  ;;  %v4215_v52 = vrot.slane %v4201_v51, %v12540_v8  ;;  %v4225_v26 = vrot.slane %v4217_v44, %v12540_v8 }
 0x330   :  { %v4562_v19 = vrot.slane %v4492_v55, 1  ;;  %v13227_v58 = vrot.slane %v4489_v9, 7 }
 0x331   :  { %v3560_v3 = vpop.f32.mrb[28].mxu1  ;;  %v4232_v5 = vrot.slane %v4218_v23, %v12540_v8  ;;  %v4216_v35 = vcombine.low %v4208_v62, %v4215_v52 }
 0x332   :  { %v3561_v24 = vadd.f32 %v3560_v3, %v13153_v31  ;;  %v11714_v12 = vpop.f32.mrb[29].mxu1  ;;  %v4563_v11 = vsel %vm165_vm0, %v4561_v25, %v4562_v19  ;;  %v4494_v45 = vor.u32 %v4492_v55, %v13227_v58  ;;  %v4564_v40 = vor.u32 %v4562_v19, %v4489_v9 }
 0x333   :  { %v3563_v32 = vpop.f32.mrb[30].mxu1  ;;  %4626 = vrot.lane.b32.xlu1 %v4563_v11, %s11952_s27  ;;  %v4233_v56 = vcombine.low %v4225_v26, %v4232_v5  ;;  %v11907_v26 = vld [vmem:[%s14900_s5 + $0x20] sm:$0xff]  }
 0x334   :  { %v3727_v6 = vcombine.high %v3561_v24, %v3561_v24  ;;  %v3734_v13 = vrot.slane %v3561_v24, %v12540_v8  ;;  %v3564_v46 = vadd.f32 %v3563_v32, %v13153_v31  ;;  %v11715_v28 = vpop.f32.mrb[31].mxu1  ;;  %v13249_v42 = vsel %vm86_vm4, %v4484_v29, %v4494_v45  ;;  %v11906_v29 = vld [vmem:[%s14900_s5 + $0x18] sm:$0xff]  }
 0x335   :  { %v13244_v30 = vpack.c.bf16 %v4233_v56, %v4216_v35  ;;  %11743 = vmatpush3.bf16.msra.mxu0 %v11906_v29 }
 0x336   :  { %v3741_v53 = vrot.slane %v3727_v6, %v12540_v8  ;;  %v3742_v16 = vcombine.high %v3734_v13, %v3734_v13  ;;  %v3744_v7 = vcombine.high %v3564_v46, %v3564_v46  ;;  %v4016_v50 = vmax.f32 %v3734_v13, 0.0  ;;  %11744 = vmatprep.subr.bf16.mxu0 %v11946_v18 }
 0x337   :  { %v3751_v31 = vrot.slane %v3564_v46, %v12540_v8  ;;  %4608 = vrot.lane.b32.xlu0 %v13244_v30, %s11951_s24  ;;  %v4500_v34 = vshll.u32 %v13244_v30, 16  ;;  %v4497_v60 = vshrl.u32 %v13244_v30, 16 }
 0x338   :  { %v3743_v38 = vcombine.high %v3741_v53, %v3741_v53  ;;  %v4017_v41 = vmax.f32 %v3742_v16, 0.0  ;;  %v4018_v54 = vmax.f32 %v3741_v53, 0.0  ;;  %v3758_v33 = vrot.slane %v3744_v7, %v12540_v8 }
 0x339   :  { %v3759_v22 = vcombine.high %v3751_v31, %v3751_v31  ;;  %v4020_v48 = vmax.f32 %v3751_v31, 0.0  ;;  %v3568_v0 = vpop.f32.mrb[32].mxu1  ;;  %v4565_v21 = vrot.slane %v4500_v34, 1  ;;  %v13263_v44 = vrot.slane %v4497_v60, 7  ;;  %11745 = vmatpush3.bf16.msra.mxu0 %v11907_v26 }
 0x33a   :  { %v4019_v10 = vmax.f32 %v3743_v38, 0.0  ;;  %v4234_v63 = vcombine.low %v4016_v50, %v4017_v41  ;;  %v3760_v47 = vcombine.high %v3758_v33, %v3758_v33  ;;  %v4022_v1 = vmax.f32 %v3758_v33, 0.0  ;;  %v11718_v39 = vpop.f32.mrb[33].mxu1  ;;  %11746 = vmatprep.subr.bf16.mxu0 %v11946_v18 }
 0x33b   :  { %v4021_v49 = vmax.f32 %v3759_v22, 0.0  ;;  %v3569_v51 = vadd.f32 %v3568_v0, %v3452_v37  ;;  %v3571_v43 = vpop.f32.mrb[34].mxu1  ;;  %v4566_v25 = vsel %vm165_vm0, %v4564_v40, %v4565_v21 }
 0x33c   :  { %v4235_v55 = vcombine.low %v4018_v54, %v4019_v10  ;;  %v4023_v9 = vmax.f32 %v3760_v47, 0.0  ;;  %v3572_v23 = vadd.f32 %v3571_v43, %v13239_v15  ;;  %v11719_v3 = vpop.f32.mrb[35].mxu1  ;;  %v4242_v2 = vrot.slane %v4234_v63, %v12540_v8  ;;  %4628 = vrot.lane.b32.xlu1 %v4566_v25, %s11952_s27 }
 0x33d   :  { %v4251_v52 = vcombine.low %v4020_v48, %v4021_v49  ;;  %v3761_v24 = vcombine.high %v3569_v51, %v3569_v51  ;;  %v3768_v12 = vrot.slane %v3569_v51, %v12540_v8 }
 0x33e   :  { %v4252_v19 = vcombine.low %v4022_v1, %v4023_v9  ;;  %v3778_v32 = vcombine.high %v3572_v23, %v3572_v23  ;;  %v3785_v37 = vrot.slane %v3572_v23, %v12540_v8  ;;  %v4249_v62 = vrot.slane %v4235_v55, %v12540_v8 }
 0x33f   :  { %v3775_v5 = vrot.slane %v3761_v24, %v12540_v8  ;;  %v3776_v6 = vcombine.high %v3768_v12, %v3768_v12  ;;  %v4024_v13 = vmax.f32 %v3768_v12, 0.0  ;;  %v4259_v46 = vrot.slane %v4251_v52, %v12540_v8 }
 0x340   :  { %v3792_v28 = vrot.slane %v3778_v32, %v12540_v8  ;;  %v3793_v11 = vcombine.high %v3785_v37, %v3785_v37  ;;  %v4028_v35 = vmax.f32 %v3785_v37, 0.0  ;;  %v4250_v56 = vcombine.low %v4242_v2, %v4249_v62 }
 0x341   :  { %v3777_v45 = vcombine.high %v3775_v5, %v3775_v5  ;;  %v4025_v53 = vmax.f32 %v3776_v6, 0.0  ;;  %v4026_v16 = vmax.f32 %v3775_v5, 0.0  ;;  %v3576_v7 = vpop.f32.mrb[36].mxu1  ;;  %v4266_v40 = vrot.slane %v4252_v19, %v12540_v8 }
 0x342   :  { %v3794_v50 = vcombine.high %v3792_v28, %v3792_v28  ;;  %v4029_v31 = vmax.f32 %v3793_v11, 0.0  ;;  %v4030_v38 = vmax.f32 %v3792_v28, 0.0  ;;  %v3577_v41 = vadd.f32 %v3576_v7, %v13239_v15  ;;  %v11722_v54 = vpop.f32.mrb[37].mxu1 }
 0x343   :  { %v4027_v33 = vmax.f32 %v3777_v45, 0.0  ;;  %v4268_v22 = vcombine.low %v4024_v13, %v4025_v53  ;;  %v4282_v48 = vrot.slane %v4026_v16, %v12540_v8  ;;  %v3579_v0 = vpop.f32.mrb[38].mxu1  ;;  %v4267_v29 = vcombine.low %v4259_v46, %v4266_v40  ;;  %v11908_v40 = vld [vmem:[%s14900_s5 + $0x28] sm:$0xff]  }
 0x344   :  { %v4031_v10 = vmax.f32 %v3794_v50, 0.0  ;;  %v13283_v63 = vcombine.low %v4029_v31, %v4030_v38  ;;  %v3795_v47 = vcombine.high %v3577_v41, %v3577_v41  ;;  %v3802_v1 = vrot.slane %v3577_v41, %v12540_v8  ;;  %v11723_v39 = vpop.f32.mrb[39].mxu1  ;;  %11747 = vmatpush3.bf16.msra.mxu0 %v11908_v40 }
 0x345   :  { %v4275_v49 = vrot.slane %v4268_v22, %v12540_v8  ;;  %v13287_v51 = vcombine.low %v4027_v33, %v4028_v35  ;;  %v3580_v43 = vadd.f32 %v3579_v0, %v13239_v15  ;;  %v13290_v55 = vpack.c.bf16 %v4267_v29, %v4250_v56  ;;  %11826 = vmatprep.subr.bf16.mxu0 %v11946_v18 }
 0x346   :  { %v3809_v9 = vrot.slane %v3795_v47, %v12540_v8  ;;  %v3810_v23 = vcombine.high %v3802_v1, %v3802_v1  ;;  %v4032_v3 = vmax.f32 %v3802_v1, 0.0  ;;  %v4567_v2 = vor.u32 %v4565_v21, %v4497_v60 }
 0x347   :  { %v4283_v52 = vcombine.low %v4275_v49, %v4282_v48  ;;  %v3812_v24 = vcombine.high %v3580_v43, %v3580_v43  ;;  %v3819_v12 = vrot.slane %v3580_v43, %v12540_v8  ;;  %4610 = vrot.lane.b32.xlu0 %v13290_v55, %s11951_s24  ;;  %v4508_v25 = vshll.u32 %v13290_v55, 16 }
 0x348   :  { %v3811_v19 = vcombine.high %v3809_v9, %v3809_v9  ;;  %v4033_v32 = vmax.f32 %v3810_v23, 0.0  ;;  %v4034_v37 = vmax.f32 %v3809_v9, 0.0  ;;  %v13299_v62 = vcombine.low %v4031_v10, %v4032_v3 }
 0x349   :  { %v13301_v26 = vpack.c.bf16 %v4283_v52, %v4283_v52  ;;  %v3826_v5 = vrot.slane %v3812_v24, %v12540_v8  ;;  %v3827_v6 = vcombine.high %v3819_v12, %v3819_v12  ;;  %v4036_v60 = vmax.f32 %v3819_v12, 0.0  ;;  %v3584_v21 = vpop.f32.mrb[40].mxu1 }
 0x34a   :  { %v4035_v13 = vmax.f32 %v3811_v19, 0.0  ;;  %v13304_v46 = vcombine.low %v4033_v32, %v4034_v37  ;;  %v3585_v28 = vadd.f32 %v3584_v21, %v13239_v15  ;;  %v11726_v11 = vpop.f32.mrb[41].mxu1  ;;  %v4568_v35 = vrot.slane %v4508_v25, 1 }
 0x34b   :  { %v3828_v56 = vcombine.high %v3826_v5, %v3826_v5  ;;  %v4037_v45 = vmax.f32 %v3827_v6, 0.0  ;;  %v4038_v53 = vmax.f32 %v3826_v5, 0.0  ;;  %v3587_v16 = vpop.f32.mrb[42].mxu1  ;;  %v4505_v7 = vshrl.u32 %v13290_v55, 16 }
 0x34c   :  { %v13313_v50 = vcombine.low %v4035_v13, %v4036_v60  ;;  %v3829_v31 = vcombine.high %v3585_v28, %v3585_v28  ;;  %v3836_v38 = vrot.slane %v3585_v28, %v12540_v8  ;;  %v4569_v41 = vsel %vm165_vm0, %v4567_v2, %v4568_v35  ;;  %v11727_v54 = vpop.f32.mrb[43].mxu1 }
 0x34d   :  { %v4039_v33 = vmax.f32 %v3828_v56, 0.0  ;;  %v4319_v22 = vcombine.low %v4037_v45, %v4038_v53  ;;  %4630 = vrot.lane.b32.xlu1 %v4569_v41, %s11952_s27  ;;  %v3588_v48 = vadd.f32 %v3587_v16, %v13239_v15  ;;  %v13319_v0 = vrot.slane %v4505_v7, 7 }
 0x34e   :  { %v3843_v29 = vrot.slane %v3829_v31, %v12540_v8  ;;  %v3844_v10 = vcombine.high %v3836_v38, %v3836_v38  ;;  %v4040_v47 = vmax.f32 %v3836_v38, 0.0  ;;  %v13323_v1 = vshll.u32 %v13301_v26, 16 }
 0x34f   :  { %v3846_v39 = vcombine.high %v3588_v48, %v3588_v48  ;;  %v3853_v49 = vrot.slane %v3588_v48, %v12540_v8  ;;  %v4570_v43 = vor.u32 %v4568_v35, %v4505_v7  ;;  %v4292_v9 = vrot.slane %v13287_v51, %v12540_v8 }
 0x350   :  { %v3845_v23 = vcombine.high %v3843_v29, %v3843_v29  ;;  %v4041_v3 = vmax.f32 %v3844_v10, 0.0  ;;  %v4042_v2 = vmax.f32 %v3843_v29, 0.0  ;;  %v4335_v52 = vcombine.low %v4039_v33, %v4040_v47 }
 0x351   :  { %v3860_v24 = vrot.slane %v3846_v39, %v12540_v8  ;;  %v3861_v12 = vcombine.high %v3853_v49, %v3853_v49  ;;  %v4044_v19 = vmax.f32 %v3853_v49, 0.0  ;;  %v4571_v32 = vrot.slane %v13323_v1, 1  ;;  %v3592_v37 = vpop.f32.mrb[44].mxu1 }
 0x352   :  { %v4043_v5 = vmax.f32 %v3845_v23, 0.0  ;;  %v4336_v6 = vcombine.low %v4041_v3, %v4042_v2  ;;  %v3593_v60 = vadd.f32 %v3592_v37, %v13239_v15  ;;  %v4299_v21 = vrot.slane %v13283_v63, %v12540_v8  ;;  %v11730_v13 = vpop.f32.mrb[45].mxu1 }
 0x353   :  { %v3862_v51 = vcombine.high %v3860_v24, %v3860_v24  ;;  %v4045_v28 = vmax.f32 %v3861_v12, 0.0  ;;  %v4046_v11 = vmax.f32 %v3860_v24, 0.0  ;;  %v4572_v35 = vsel %vm165_vm0, %v4570_v43, %v4571_v32  ;;  %v3595_v56 = vpop.f32.mrb[46].mxu1 }
 0x354   :  { %v13337_v45 = vcombine.low %v4043_v5, %v4044_v19  ;;  %4632 = vrot.lane.b32.xlu1 %v4572_v35, %s11952_s27  ;;  %v3863_v53 = vcombine.high %v3593_v60, %v3593_v60  ;;  %v3870_v16 = vrot.slane %v3593_v60, %v12540_v8  ;;  %v4300_v7 = vcombine.low %v4292_v9, %v4299_v21  ;;  %v11731_v40 = vpop.f32.mrb[47].mxu1 }
 0x355   :  { %v4047_v31 = vmax.f32 %v3862_v51, 0.0  ;;  %v13341_v63 = vcombine.low %v4045_v28, %v4046_v11  ;;  %v4309_v38 = vrot.slane %v13299_v62, %v12540_v8  ;;  %v4316_v41 = vrot.slane %v13304_v46, %v12540_v8 }
 0x356   :  { %v3877_v54 = vrot.slane %v3863_v53, %v12540_v8  ;;  %v3878_v33 = vcombine.high %v3870_v16, %v3870_v16  ;;  %v4048_v48 = vmax.f32 %v3870_v16, 0.0  ;;  %v3596_v29 = vadd.f32 %v3595_v56, %v13239_v15 }
 0x357   :  { %v4317_v10 = vcombine.low %v4309_v38, %v4316_v41  ;;  %v4326_v47 = vrot.slane %v13313_v50, %v12540_v8  ;;  %v4333_v39 = vrot.slane %v4319_v22, %v12540_v8  ;;  %v4343_v49 = vrot.slane %v4335_v52, %v12540_v8 }
 0x358   :  { %v3879_v43 = vcombine.high %v3877_v54, %v3877_v54  ;;  %v4049_v9 = vmax.f32 %v3878_v33, 0.0  ;;  %v4050_v62 = vmax.f32 %v3877_v54, 0.0  ;;  %v4369_v23 = vcombine.low %v4047_v31, %v4048_v48 }
 0x359   :  { %v13353_v3 = vpack.c.bf16 %v4317_v10, %v4300_v7  ;;  %v3880_v46 = vcombine.high %v3596_v29, %v3596_v29  ;;  %v3887_v2 = vrot.slane %v3596_v29, %v12540_v8  ;;  %v3600_v24 = vpop.f32.mrb[48].mxu1  ;;  %v4334_v12 = vcombine.low %v4326_v47, %v4333_v39 }
 0x35a   :  { %v4051_v19 = vmax.f32 %v3879_v43, 0.0  ;;  %v4370_v37 = vcombine.low %v4049_v9, %v4050_v62  ;;  %v3601_v5 = vadd.f32 %v3600_v24, %v13239_v15  ;;  %v4350_v50 = vrot.slane %v4336_v6, %v12540_v8  ;;  %v11734_v22 = vpop.f32.mrb[49].mxu1 }
 0x35b   :  { %4614 = vrot.lane.b32.xlu0 %v13353_v3, %s11951_s24  ;;  %v13361_v52 = vshrl.u32 %v13353_v3, 16  ;;  %v4521_v60 = vshll.u32 %v13353_v3, 16  ;;  %v3894_v21 = vrot.slane %v3880_v46, %v12540_v8  ;;  %v3895_v13 = vcombine.high %v3887_v2, %v3887_v2  ;;  %v3603_v51 = vpop.f32.mrb[50].mxu1 }
 0x35c   :  { %v4052_v28 = vmax.f32 %v3887_v2, 0.0  ;;  %v3897_v11 = vcombine.high %v3601_v5, %v3601_v5  ;;  %v3904_v35 = vrot.slane %v3601_v5, %v12540_v8  ;;  %v4351_v15 = vcombine.low %v4343_v49, %v4350_v50  ;;  %v11735_v56 = vpop.f32.mrb[51].mxu1 }
 0x35d   :  { %v3896_v6 = vcombine.high %v3894_v21, %v3894_v21  ;;  %v4053_v53 = vmax.f32 %v3895_v13, 0.0  ;;  %v4054_v16 = vmax.f32 %v3894_v21, 0.0  ;;  %v3604_v7 = vadd.f32 %v3603_v51, %v13221_v20 }
 0x35e   :  { %v4386_v40 = vcombine.low %v4051_v19, %v4052_v28  ;;  %v3911_v31 = vrot.slane %v3897_v11, %v12540_v8  ;;  %v3912_v38 = vcombine.high %v3904_v35, %v3904_v35  ;;  %v4056_v41 = vmax.f32 %v3904_v35, 0.0 }
 0x35f   :  { %v4055_v54 = vmax.f32 %v3896_v6, 0.0  ;;  %v4387_v33 = vcombine.low %v4053_v53, %v4054_v16  ;;  %4612 = vrot.lane.b32.xlu0 %v13301_v26, %s11951_s24  ;;  %v4460_v48 = vpack.c.bf16 %v4351_v15, %v4334_v12  ;;  %v3920_v29 = vrot.slane %v3604_v7, %v12540_v8 }
 0x360   :  { %v3913_v10 = vcombine.high %v3911_v31, %v3911_v31  ;;  %v4057_v47 = vmax.f32 %v3912_v38, 0.0  ;;  %v4058_v39 = vmax.f32 %v3911_v31, 0.0  ;;  %v4574_v49 = vrot.slane %v4521_v60, 1 }
 0x361   :  { %v4403_v20 = vcombine.low %v4055_v54, %v4056_v41  ;;  %v3921_v43 = vcombine.high %v3920_v29, %v3920_v29  ;;  %v4060_v9 = vmax.f32 %v3920_v29, 0.0  ;;  %v4528_v62 = vshll.u32 %v4460_v48, 16 }
 0x362   :  { %v4059_v46 = vmax.f32 %v3913_v10, 0.0  ;;  %v4404_v2 = vcombine.low %v4057_v47, %v4058_v39  ;;  %v4575_v24 = vor.u32 %v4574_v49, %v13361_v52  ;;  %v4360_v19 = vrot.slane %v13337_v45, %v12540_v8 }
 0x363   :  { %4616 = vrot.lane.b32.xlu0 %v4460_v48, %s11951_s24  ;;  %v4061_v12 = vmax.f32 %v3921_v43, 0.0  ;;  %v4576_v5 = vrot.slane %v4528_v62, 1  ;;  %v4367_v50 = vrot.slane %v13341_v63, %v12540_v8  ;;  %v4377_v22 = vrot.slane %v4369_v23, %v12540_v8 }
 0x364   :  { %v4420_v21 = vcombine.low %v4059_v46, %v4060_v9  ;;  %v4384_v13 = vrot.slane %v4370_v37, %v12540_v8  ;;  %v4513_v51 = vshrl.u32 %v13301_v26, 16  ;;  %v4525_v28 = vshrl.u32 %v4460_v48, 16 }
 0x365   :  { %v4577_v11 = vsel %vm165_vm0, %v4575_v24, %v4576_v5  ;;  %v4368_v35 = vcombine.low %v4360_v19, %v4367_v50  ;;  %v4394_v45 = vrot.slane %v4386_v40, %v12540_v8  ;;  %v4401_v15 = vrot.slane %v4387_v33, %v12540_v8 }
 0x366   :  { %4636 = vrot.lane.b32.xlu1 %v4577_v11, %s11952_s27  ;;  %v4385_v56 = vcombine.low %v4377_v22, %v4384_v13  ;;  %v4515_v6 = vrot.slane %v4513_v51, 7  ;;  %v4573_v63 = vor.u32 %v4571_v32, %v4513_v51  ;;  %v4527_v23 = vrot.slane %v4525_v28, 7 }
 0x367   :  { %v4578_v53 = vor.u32 %v4576_v5, %v4525_v28  ;;  %v4402_v37 = vcombine.low %v4394_v45, %v4401_v15  ;;  %v4411_v26 = vrot.slane %v4403_v20, %v12540_v8  ;;  %v4418_v16 = vrot.slane %v4404_v2, %v12540_v8 }
 0x368   :  { %v4461_v7 = vpack.c.bf16 %v4385_v56, %v4368_v35  ;;  %v4592_v40 = vsel %vm12209_vm7, %v4573_v63, %v13323_v1  ;;  %v4427_v31 = vrot.slane %v4420_v21, %v12540_v8  ;;  %v4434_v38 = vrot.slane %v4061_v12, %v12540_v8 }
 0x369   :  { %v4419_v41 = vcombine.low %v4411_v26, %v4418_v16  ;;  %v4502_v32 = vor.u32 %v4500_v34, %v13263_v44  ;;  %v4510_v54 = vor.u32 %v4508_v25, %v13319_v0  ;;  %v4520_v33 = vrot.slane %v13361_v52, 7 }
 0x36a   :  { %4618 = vrot.lane.b32.xlu0 %v4461_v7, %s11951_s24  ;;  %4634 = vrot.lane.b32.xlu1 %v4592_v40, %s11952_s27  ;;  %v4536_v48 = vshll.u32 %v4461_v7, 16  ;;  %v4435_v29 = vcombine.low %v4427_v31, %v4434_v38  ;;  %v4533_v10 = vshrl.u32 %v4461_v7, 16  ;;  %v4518_v47 = vor.u32 %v13323_v1, %v4515_v6 }
 0x36b   :  { %v4462_v39 = vpack.c.bf16 %v4419_v41, %v4402_v37  ;;  %v13407_v30 = vsel %vm86_vm4, %v13227_v58, %v4502_v32  ;;  %v13411_v34 = vsel %vm86_vm4, %v13263_v44, %v4510_v54  ;;  %v13415_v55 = vor.u32 %v4521_v60, %v4520_v33 }
 0x36c   :  { %v4579_v25 = vrot.slane %v4536_v48, 1  ;;  %v4463_v49 = vpack.c.bf16 %v4435_v29, %v4435_v29  ;;  %v4535_v20 = vrot.slane %v4533_v10, 7  ;;  %v13419_v43 = vsel %vm86_vm4, %v13319_v0, %v4518_v47 }
 0x36d   :  { %v4544_v1 = vshll.u32 %v4462_v39, 16  ;;  %v4541_v9 = vshrl.u32 %v4462_v39, 16  ;;  %v4559_v58 = vsel %vm12169_vm5, %v13361_v52, %v13415_v55  ;;  %v4530_v44 = vor.u32 %v4528_v62, %v4527_v23 }
 0x36e   :  { %v4580_v46 = vsel %vm165_vm0, %v4578_v53, %v4579_v25  ;;  %4620 = vrot.lane.b32.xlu0 %v4462_v39, %s11951_s24  ;;  %v4552_v3 = vshll.u32 %v4463_v49, 16  ;;  %v4581_v60 = vor.u32 %v4579_v25, %v4533_v10  ;;  %v4549_v2 = vshrl.u32 %v4463_v49, 16 }
 0x36f   :  { %4638 = vrot.lane.b32.xlu1 %v4580_v46, %s11952_s27  ;;  %v4582_v24 = vrot.slane %v4544_v1, 1  ;;  %v4543_v0 = vrot.slane %v4541_v9, 7  ;;  %v13429_v19 = vsel %vm86_vm4, %v4520_v33, %v4530_v44  ;;  %v4538_v12 = vor.u32 %v4536_v48, %v4535_v20 }
 0x370   :  { %v4585_v5 = vrot.slane %v4552_v3, 1  ;;  %v4551_v50 = vrot.slane %v4549_v2, 7 }
 0x371   :  { %v4583_v22 = vsel %vm165_vm0, %v4581_v60, %v4582_v24  ;;  %v4584_v62 = vor.u32 %v4582_v24, %v4541_v9  ;;  %v13433_v21 = vsel %vm86_vm4, %v4527_v23, %v4538_v12  ;;  %v4546_v13 = vor.u32 %v4544_v1, %v4543_v0 }
 0x372   :  { %4622 = vrot.lane.b32.xlu0 %v4463_v49, %s11951_s24  ;;  %v4554_v51 = vor.u32 %v4552_v3, %v4551_v50  ;;  %v4587_v45 = vor.u32 %v4585_v5, %v4549_v2 }
 0x373   :  { %4640 = vrot.lane.b32.xlu1 %v4583_v22, %s11952_s27  ;;  %v4586_v28 = vsel %vm165_vm0, %v4584_v62, %v4585_v5  ;;  %v13439_v11 = vsel %vm86_vm4, %v4535_v20, %v4546_v13 }
 0x374   :  { %v13442_v35 = vsel %vm86_vm4, %v4543_v0, %v4554_v51  ;;  %v4593_v15 = vsel %vm12209_vm7, %v4587_v45, %v4552_v3 }
 0x377   :  { %4642 = vrot.lane.b32.xlu1 %v4586_v28, %s11952_s27 }
 0x37b   :  { %4644 = vrot.lane.b32.xlu1 %v4593_v15, %s11952_s27 }
 0x38c   :  { %v4605_v56 = vpop.permute.xlu0 %4604 }
 0x38d   :  { %v4648_v6 = vsel %vm2436_vm12, %v4558_v14, %v4605_v56 }
 0x3a0   :  { %v4607_v7 = vpop.permute.xlu0 %4606 }
 0x3a1   :  { %v4651_v32 = vsel %vm2436_vm12, %v13249_v42, %v4607_v7 }
 0x3a5   :  { %v4627_v63 = vpop.permute.xlu1 %4626 }
 0x3a6   :  { %v4677_v23 = vsel %vm2467_vm13, %v4648_v6, %v4627_v63 }
 0x3a7   :  { %v4712_v53 = vcombine.high %v4677_v23, %v4677_v23  ;;  %v4719_v37 = vrot.slane %v4677_v23, %v12273_v59 }
 0x3a9   :  { %v4726_v26 = vrot.slane %v4712_v53, %v12273_v59  ;;  %v4727_v16 = vcombine.high %v4719_v37, %v4719_v37  ;;  %v4735_v31 = vrot.slane %v4719_v37, %v12273_v59  ;;  %v4609_v51 = vpop.permute.xlu0 %4608 }
 0x3aa   :  { %v4654_v63 = vsel %vm2436_vm12, %v13407_v30, %v4609_v51 }
 0x3ab   :  { %v4728_v40 = vcombine.high %v4726_v26, %v4726_v26  ;;  %v4749_v38 = vrot.slane %v4727_v16, %v12273_v59  ;;  %v4742_v41 = vrot.slane %v4726_v26, %v12273_v59 }
 0x3ad   :  { %v4756_v4 = vrot.slane %v4728_v40, %v12273_v59  ;;  %v5167_v36 = vcombine.low %v4735_v31, %v4749_v38  ;;  %v11507_v14 = vcombine.high %v4735_v31, %v4749_v38 }
 0x3ae   :  { %v4629_v54 = vpop.permute.xlu1 %4628 }
 0x3af   :  { %v5169_v33 = vcombine.low %v4742_v41, %v4756_v4  ;;  %v11508_v48 = vcombine.high %v4742_v41, %v4756_v4  ;;  %v5177_v29 = vrot.slane %v5167_v36, %v12273_v59  ;;  %v5184_v10 = vrot.slane %v11507_v14, %v12273_v59 }
 0x3b0   :  { %v4679_v47 = vsel %vm2467_vm13, %v4651_v32, %v4629_v54 }
 0x3b1   :  { %v5191_v39 = vrot.slane %v5169_v33, %v12273_v59  ;;  %v5198_v25 = vrot.slane %v11508_v48, %v12273_v59  ;;  %v5199_v49 = vcombine.low %v5177_v29, %v5184_v10  ;;  %v4761_v20 = vcombine.high %v4679_v47, %v4679_v47 }
 0x3b2   :  { %v4768_v1 = vrot.slane %v4679_v47, %v12273_v59 }
 0x3b3   :  { %v5200_v9 = vcombine.low %v5191_v39, %v5198_v25  ;;  %v4775_v42 = vrot.slane %v4761_v20, %v12273_v59  ;;  %v5207_v46 = vrot.slane %v5199_v49, %v12273_v59 }
 0x3b4   :  { %v4776_v44 = vcombine.high %v4768_v1, %v4768_v1  ;;  %v4784_v2 = vrot.slane %v4768_v1, %v12273_v59 }
 0x3b5   :  { %v5214_v3 = vrot.slane %v5200_v9, %v12273_v59  ;;  %v4777_v60 = vcombine.high %v4775_v42, %v4775_v42  ;;  %v4791_v12 = vrot.slane %v4775_v42, %v12273_v59 }
 0x3b6   :  { %v4798_v24 = vrot.slane %v4776_v44, %v12273_v59 }
 0x3b7   :  { %v5215_v0 = vcombine.low %v5207_v46, %v5214_v3  ;;  %v4805_v5 = vrot.slane %v4777_v60, %v12273_v59 }
 0x3b8   :  { %v5216_v50 = vcombine.low %v4784_v2, %v4798_v24  ;;  %v11509_v22 = vcombine.high %v4784_v2, %v4798_v24 }
 0x3b9   :  { %v5218_v62 = vcombine.low %v4791_v12, %v4805_v5  ;;  %v11510_v13 = vcombine.high %v4791_v12, %v4805_v5  ;;  %11749 = vmatmul.mubr.msk.bf16.vlgmr.msra.gmra.mrb[20].mxu0 %vm3474_vm14, %v5215_v0  ;;  %v4611_v31 = vpop.permute.xlu0 %4610 }
 0x3ba   :  { %v5226_v28 = vrot.slane %v5216_v50, %v12273_v59  ;;  %v5233_v45 = vrot.slane %v11509_v22, %v12273_v59  ;;  %11752 = vmatprep.mubr.msk.bf16.mxu0 %vm11948_vm8, %v11946_v18  ;;  %v4657_v32 = vsel %vm2436_vm12, %v13411_v34, %v4611_v31 }
 0x3bb   :  { %v5240_v15 = vrot.slane %v5218_v62, %v12273_v59  ;;  %v5247_v56 = vrot.slane %v11510_v13, %v12273_v59 }
 0x3bc   :  { %v5248_v6 = vcombine.low %v5226_v28, %v5233_v45 }
 0x3bd   :  { %v5249_v53 = vcombine.low %v5240_v15, %v5247_v56 }
 0x3be   :  { %v5256_v7 = vrot.slane %v5248_v6, %v12273_v59 }
 0x3bf   :  { %v4631_v23 = vpop.permute.xlu1 %4630  ;;  %v5263_v40 = vrot.slane %v5249_v53, %v12273_v59 }
 0x3c0   :  { %v4681_v37 = vsel %vm2467_vm13, %v4654_v63, %v4631_v23 }
 0x3c1   :  { %v4810_v26 = vcombine.high %v4681_v37, %v4681_v37  ;;  %v4817_v16 = vrot.slane %v4681_v37, %v12273_v59  ;;  %v5264_v4 = vcombine.low %v5256_v7, %v5263_v40 }
 0x3c3   :  { %v4824_v38 = vrot.slane %v4810_v26, %v12273_v59  ;;  %v4825_v41 = vcombine.high %v4817_v16, %v4817_v16  ;;  %v4833_v14 = vrot.slane %v4817_v16, %v12273_v59  ;;  %11753 = vmatmul.mubr.msk.bf16.gmra.mrb[24].mxu0 %vm3474_vm14, %v5264_v4 }
 0x3c4   :  { %11756 = vmatprep.mubr.msk.bf16.mxu0 %vm11948_vm8, %v11946_v18 }
 0x3c5   :  { %v4826_v36 = vcombine.high %v4824_v38, %v4824_v38  ;;  %v4847_v30 = vrot.slane %v4825_v41, %v12273_v59  ;;  %v4840_v54 = vrot.slane %v4824_v38, %v12273_v59 }
 0x3c6   :  { %v4633_v33 = vpop.permute.xlu1 %4632 }
 0x3c7   :  { %v4854_v48 = vrot.slane %v4826_v36, %v12273_v59  ;;  %v5265_v29 = vcombine.low %v4833_v14, %v4847_v30  ;;  %v11511_v10 = vcombine.high %v4833_v14, %v4847_v30  ;;  %v4683_v47 = vsel %vm2467_vm13, %v4657_v32, %v4633_v33 }
 0x3c8   :  { %v4859_v39 = vcombine.high %v4683_v47, %v4683_v47  ;;  %v4866_v25 = vrot.slane %v4683_v47, %v12273_v59 }
 0x3c9   :  { %v5267_v49 = vcombine.low %v4840_v54, %v4854_v48  ;;  %v11512_v20 = vcombine.high %v4840_v54, %v4854_v48  ;;  %v5275_v1 = vrot.slane %v5265_v29, %v12273_v59  ;;  %v5282_v34 = vrot.slane %v11511_v10, %v12273_v59 }
 0x3ca   :  { %v4873_v9 = vrot.slane %v4859_v39, %v12273_v59  ;;  %v4874_v42 = vcombine.high %v4866_v25, %v4866_v25  ;;  %v4882_v2 = vrot.slane %v4866_v25, %v12273_v59 }
 0x3cb   :  { %v5289_v44 = vrot.slane %v5267_v49, %v12273_v59  ;;  %v5296_v46 = vrot.slane %v11512_v20, %v12273_v59  ;;  %v5297_v3 = vcombine.low %v5275_v1, %v5282_v34 }
 0x3cc   :  { %v4875_v60 = vcombine.high %v4873_v9, %v4873_v9  ;;  %v4896_v24 = vrot.slane %v4874_v42, %v12273_v59  ;;  %v4889_v5 = vrot.slane %v4873_v9, %v12273_v59 }
 0x3cd   :  { %v4615_v0 = vpop.permute.xlu0 %4614  ;;  %v5298_v12 = vcombine.low %v5289_v44, %v5296_v46  ;;  %v5305_v13 = vrot.slane %v5297_v3, %v12273_v59 }
 0x3ce   :  { %v4903_v50 = vrot.slane %v4875_v60, %v12273_v59  ;;  %v5314_v22 = vcombine.low %v4882_v2, %v4896_v24  ;;  %v11513_v62 = vcombine.high %v4882_v2, %v4896_v24  ;;  %v4663_v40 = vsel %vm2436_vm12, %v4559_v58, %v4615_v0 }
 0x3cf   :  { %v5312_v51 = vrot.slane %v5298_v12, %v12273_v59 }
 0x3d0   :  { %v5316_v28 = vcombine.low %v4889_v5, %v4903_v50  ;;  %v11514_v45 = vcombine.high %v4889_v5, %v4903_v50  ;;  %v5324_v15 = vrot.slane %v5314_v22, %v12273_v59  ;;  %v5331_v56 = vrot.slane %v11513_v62, %v12273_v59 }
 0x3d1   :  { %v5313_v6 = vcombine.low %v5305_v13, %v5312_v51  ;;  %v4613_v53 = vpop.permute.xlu0 %4612 }
 0x3d2   :  { %v5338_v63 = vrot.slane %v5316_v28, %v12273_v59  ;;  %v5345_v23 = vrot.slane %v11514_v45, %v12273_v59  ;;  %v5346_v37 = vcombine.low %v5324_v15, %v5331_v56  ;;  %v4660_v30 = vsel %vm2436_vm12, %v13419_v43, %v4613_v53 }
 0x3d3   :  { %11757 = vmatmul.mubr.msk.bf16.gmra.mrb[28].mxu0 %vm3474_vm14, %v5313_v6 }
 0x3d4   :  { %11760 = vmatprep.mubr.msk.bf16.mxu0 %vm11948_vm8, %v11946_v18  ;;  %v5347_v26 = vcombine.low %v5338_v63, %v5345_v23  ;;  %v5354_v7 = vrot.slane %v5346_v37, %v12273_v59 }
 0x3d5   :  { %v4617_v31 = vpop.permute.xlu0 %4616 }
 0x3d6   :  { %v5361_v16 = vrot.slane %v5347_v26, %v12273_v59  ;;  %v4666_v44 = vsel %vm2436_vm12, %v13429_v19, %v4617_v31 }
 0x3d8   :  { %v4637_v38 = vpop.permute.xlu1 %4636  ;;  %v5362_v4 = vcombine.low %v5354_v7, %v5361_v16 }
 0x3d9   :  { %v4687_v41 = vsel %vm2467_vm13, %v4663_v40, %v4637_v38 }
 0x3da   :  { %v4931_v36 = vcombine.high %v4687_v41, %v4687_v41  ;;  %v4938_v14 = vrot.slane %v4687_v41, %v12273_v59 }
 0x3db   :  { %11761 = vmatmul.mubr.msk.bf16.gmra.mrb[32].mxu0 %vm3474_vm14, %v5362_v4 }
 0x3dc   :  { %v4945_v32 = vrot.slane %v4931_v36, %v12273_v59  ;;  %v4946_v54 = vcombine.high %v4938_v14, %v4938_v14  ;;  %v4954_v52 = vrot.slane %v4938_v14, %v12273_v59  ;;  %v4619_v55 = vpop.permute.xlu0 %4618  ;;  %v4635_v58 = vpop.permute.xlu1 %4634  ;;  %11764 = vmatprep.mubr.msk.bf16.mxu0 %vm11948_vm8, %v11946_v18 }
 0x3dd   :  { %v4685_v33 = vsel %vm2467_vm13, %v4660_v30, %v4635_v58  ;;  %v4669_v60 = vsel %vm2436_vm12, %v13433_v21, %v4619_v55 }
 0x3de   :  { %v4947_v48 = vcombine.high %v4945_v32, %v4945_v32  ;;  %v4961_v29 = vrot.slane %v4945_v32, %v12273_v59  ;;  %v4968_v10 = vrot.slane %v4946_v54, %v12273_v59  ;;  %v4976_v47 = vcombine.high %v4954_v52, %v4954_v52 }
 0x3df   :  { %v4914_v43 = vrot.slane %v4685_v33, %v12273_v59 }
 0x3e0   :  { %v4975_v39 = vrot.slane %v4947_v48, %v12273_v59  ;;  %v4977_v25 = vcombine.high %v4961_v29, %v4961_v29  ;;  %v4978_v49 = vcombine.high %v4968_v10, %v4968_v10  ;;  %v13541_v20 = vcombine.low %v4968_v10, %v4976_v47  ;;  %v4621_v1 = vpop.permute.xlu0 %4620 }
 0x3e1   :  { %v4915_v34 = vcombine.high %v4914_v43, %v4914_v43  ;;  %v4922_v9 = vrot.slane %v4914_v43, %v12273_v59  ;;  %v4639_v42 = vpop.permute.xlu1 %4638  ;;  %v4672_v12 = vsel %vm2436_vm12, %v13439_v11, %v4621_v1 }
 0x3e2   :  { %v13546_v46 = vcombine.low %v4978_v49, %v4961_v29  ;;  %v5412_v3 = vcombine.low %v4975_v39, %v4977_v25  ;;  %v4689_v0 = vsel %vm2467_vm13, %v4666_v44, %v4639_v42  ;;  %v5387_v5 = vrot.slane %v13541_v20, %v12273_v59 }
 0x3e3   :  { %v4929_v2 = vrot.slane %v4915_v34, %v12273_v59  ;;  %v4930_v24 = vcombine.high %v4922_v9, %v4922_v9  ;;  %v4979_v50 = vcombine.high %v4975_v39, %v4975_v39  ;;  %v4980_v22 = vcombine.high %v4689_v0, %v4689_v0 }
 0x3e4   :  { %v4987_v19 = vrot.slane %v4689_v0, %v12273_v59  ;;  %v5394_v62 = vrot.slane %v13546_v46, %v12273_v59  ;;  %v5422_v51 = vrot.slane %v5412_v3, %v12273_v59  ;;  %v4623_v38 = vpop.permute.xlu0 %4622 }
 0x3e5   :  { %v5363_v13 = vcombine.low %v4922_v9, %v4929_v2  ;;  %v5364_v21 = vcombine.low %v4930_v24, %v4954_v52  ;;  %v4641_v28 = vpop.permute.xlu1 %4640  ;;  %v4994_v45 = vrot.slane %v4980_v22, %v12273_v59  ;;  %v4675_v10 = vsel %vm2436_vm12, %v13442_v35, %v4623_v38 }
 0x3e6   :  { %v4995_v15 = vcombine.high %v4987_v19, %v4987_v19  ;;  %v5003_v11 = vrot.slane %v4987_v19, %v12273_v59  ;;  %v4691_v56 = vsel %vm2467_vm13, %v4669_v60, %v4641_v28  ;;  %v5396_v19 = vcombine.low %v5387_v5, %v5394_v62 }
 0x3e7   :  { %v5373_v6 = vrot.slane %v5363_v13, %v12273_v59  ;;  %v5380_v63 = vrot.slane %v5364_v21, %v12273_v59  ;;  %v5029_v23 = vcombine.high %v4691_v56, %v4691_v56  ;;  %v5036_v53 = vrot.slane %v4691_v56, %v12273_v59 }
 0x3e8   :  { %v4996_v37 = vcombine.high %v4994_v45, %v4994_v45  ;;  %v5010_v26 = vrot.slane %v4994_v45, %v12273_v59  ;;  %v5017_v16 = vrot.slane %v4995_v15, %v12273_v59  ;;  %v5025_v7 = vcombine.high %v5003_v11, %v5003_v11 }
 0x3e9   :  { %v5395_v40 = vcombine.low %v5373_v6, %v5380_v63  ;;  %v5413_v31 = vcombine.low %v4979_v50, %v5003_v11  ;;  %v5043_v41 = vrot.slane %v5029_v23, %v12273_v59  ;;  %v5044_v4 = vcombine.high %v5036_v53, %v5036_v53  ;;  %v4643_v54 = vpop.permute.xlu1 %4642 }
 0x3ea   :  { %v5024_v36 = vrot.slane %v4996_v37, %v12273_v59  ;;  %v5026_v14 = vcombine.high %v5010_v26, %v5010_v26  ;;  %v5027_v30 = vcombine.high %v5017_v16, %v5017_v16  ;;  %v5414_v32 = vcombine.low %v5017_v16, %v5025_v7 }
 0x3eb   :  { %v5429_v52 = vrot.slane %v5413_v31, %v12273_v59  ;;  %v5045_v55 = vcombine.high %v5043_v41, %v5043_v41  ;;  %v5052_v58 = vrot.slane %v5036_v53, %v12273_v59  ;;  %v5059_v33 = vrot.slane %v5043_v41, %v12273_v59 }
 0x3ec   :  { %v5415_v48 = vcombine.low %v5027_v30, %v5010_v26  ;;  %v5461_v29 = vcombine.low %v5024_v36, %v5026_v14  ;;  %v5028_v47 = vcombine.high %v5024_v36, %v5024_v36  ;;  %v5066_v39 = vrot.slane %v5044_v4, %v12273_v59 }
 0x3ed   :  { %v5444_v43 = vcombine.low %v5422_v51, %v5429_v52  ;;  %v5073_v25 = vrot.slane %v5045_v55, %v12273_v59  ;;  %v5074_v49 = vcombine.high %v5052_v58, %v5052_v58  ;;  %v5436_v20 = vrot.slane %v5414_v32, %v12273_v59  ;;  %v4645_v0 = vpop.permute.xlu1 %4644 }
 0x3ee   :  { %v5443_v1 = vrot.slane %v5415_v48, %v12273_v59  ;;  %v5075_v34 = vcombine.high %v5059_v33, %v5059_v33  ;;  %v5462_v9 = vcombine.low %v5028_v47, %v5052_v58  ;;  %v5471_v42 = vrot.slane %v5461_v29, %v12273_v59 }
 0x3ef   :  { %v5076_v44 = vcombine.high %v5066_v39, %v5066_v39  ;;  %v5463_v46 = vcombine.low %v5066_v39, %v5074_v49  ;;  %v4693_v3 = vsel %vm2467_vm13, %v4672_v12, %v4643_v54  ;;  %v5077_v60 = vcombine.high %v5073_v25, %v5073_v25 }
 0x3f0   :  { %v5478_v35 = vrot.slane %v5462_v9, %v12273_v59  ;;  %v5078_v2 = vcombine.high %v4693_v3, %v4693_v3  ;;  %v5085_v24 = vrot.slane %v4693_v3, %v12273_v59  ;;  %v5510_v22 = vcombine.low %v5073_v25, %v5075_v34 }
 0x3f1   :  { %v5464_v50 = vcombine.low %v5076_v44, %v5059_v33  ;;  %v5403_v13 = vrot.slane %v5395_v40, %v12273_v59  ;;  %v5485_v21 = vrot.slane %v5463_v46, %v12273_v59  ;;  %v5410_v11 = vrot.slane %v5396_v19, %v12273_v59 }
 0x3f2   :  { %v5493_v51 = vcombine.low %v5471_v42, %v5478_v35  ;;  %v5092_v28 = vrot.slane %v5078_v2, %v12273_v59  ;;  %v5093_v45 = vcombine.high %v5085_v24, %v5085_v24  ;;  %v5101_v15 = vrot.slane %v5085_v24, %v12273_v59 }
 0x3f3   :  { %v5492_v12 = vrot.slane %v5464_v50, %v12273_v59  ;;  %v4695_v56 = vsel %vm2467_vm13, %v4675_v10, %v4645_v0  ;;  %v5411_v37 = vcombine.low %v5403_v13, %v5410_v11  ;;  %v5445_v26 = vcombine.low %v5436_v20, %v5443_v1  ;;  %v11506_v0 = vld [vmem:[%s14901_s6] ss:$0 sm:$0xff] }
 0x3f4   :  { %v5094_v6 = vcombine.high %v5092_v28, %v5092_v28  ;;  %v5108_v63 = vrot.slane %v5092_v28, %v12273_v59  ;;  %v5115_v5 = vrot.slane %v5093_v45, %v12273_v59  ;;  %v5133_v62 = vrot.slane %v4695_v56, %v12273_v59  ;;  %v11910_v56 = vld [vmem:[%s14902_s7 + $0x8] sm:$0xff]  }
 0x3f5   :  { %v5123_v23 = vcombine.high %v5101_v15, %v5101_v15  ;;  %v5511_v53 = vcombine.low %v5077_v60, %v5101_v15  ;;  %v5520_v38 = vrot.slane %v5510_v22, %v12273_v59  ;;  %11765 = vmatmul.mubr.msk.bf16.gmra.mrb[36].mxu0 %vm3474_vm14, %v5411_v37  ;;  %v5452_v58 = vrot.slane %v5444_v43, %v12273_v59  ;;  %v11909_v15 = vld [vmem:[%s14902_s7] sm:$0xff]  }
 0x3f6   :  { %v5122_v16 = vrot.slane %v5094_v6, %v12273_v59  ;;  %v5124_v7 = vcombine.high %v5108_v63, %v5108_v63  ;;  %v5125_v40 = vcombine.high %v5115_v5, %v5115_v5  ;;  %v5134_v31 = vcombine.high %v5133_v62, %v5133_v62  ;;  %11768 = vmatprep.mubr.msk.bf16.mxu0 %vm11948_vm8, %v11946_v18 }
 0x3f7   :  { %v5512_v41 = vcombine.low %v5115_v5, %v5123_v23  ;;  %v5527_v4 = vrot.slane %v5511_v53, %v12273_v59  ;;  %v5141_v36 = vrot.slane %v5133_v62, %v12273_v59  ;;  %v5459_v33 = vrot.slane %v5445_v26, %v12273_v59  ;;  %11785 = vmatpush3.bf16.msra.mxu1 %v11909_v15 }
 0x3f8   :  { %v5513_v14 = vcombine.low %v5125_v40, %v5108_v63  ;;  %v5559_v30 = vcombine.low %v5122_v16, %v5124_v7  ;;  %v5126_v32 = vcombine.high %v5122_v16, %v5122_v16  ;;  %v5148_v54 = vrot.slane %v5134_v31, %v12273_v59  ;;  %11786 = vmatprep.subr.bf16.mxu1 %v11946_v18 }
 0x3f9   :  { %v5542_v52 = vcombine.low %v5520_v38, %v5527_v4  ;;  %v5149_v55 = vcombine.high %v5141_v36, %v5141_v36  ;;  %v5534_v48 = vrot.slane %v5512_v41, %v12273_v59  ;;  %v5494_v47 = vcombine.low %v5485_v21, %v5492_v12 }
 0x3fa   :  { %v5541_v29 = vrot.slane %v5513_v14, %v12273_v59  ;;  %v5560_v10 = vcombine.low %v5126_v32, %v5141_v36  ;;  %v5568_v39 = vrot.slane %v5559_v30, %v12273_v59  ;;  %v5460_v49 = vcombine.low %v5452_v58, %v5459_v33 }
 0x3fb   :  { %v5561_v25 = vcombine.low %v5148_v54, %v5149_v55  ;;  %v5501_v1 = vrot.slane %v5493_v51, %v12273_v59  ;;  %v5508_v34 = vrot.slane %v5494_v47, %v12273_v59  ;;  %v5550_v46 = vrot.slane %v5542_v52, %v12273_v59  ;;  %11787 = vmatpush3.bf16.msra.mxu1 %v11910_v56 }
 0x3fc   :  { %v5575_v20 = vrot.slane %v5560_v10, %v12273_v59  ;;  %v5543_v9 = vcombine.low %v5534_v48, %v5541_v29  ;;  %v5150_v50 = vcombine.high %v11506_v0, %v11506_v0  ;;  %v13630_v22 = vrot.slane %v11506_v0, %v12540_v8  ;;  %11788 = vmatprep.subr.bf16.mxu1 %v11946_v18 }
 0x3fd   :  { %v5582_v43 = vrot.slane %v5561_v25, %v12273_v59  ;;  %v5509_v44 = vcombine.low %v5501_v1, %v5508_v34  ;;  %11769 = vmatmul.mubr.msk.bf16.gmra.mrb[40].mxu0 %vm3474_vm14, %v5460_v49  ;;  %vm11370_vm13 = vcmask 1041409  }
 0x3fe   :  { %v5583_v42 = vcombine.low %v5568_v39, %v5575_v20  ;;  %v5557_v3 = vrot.slane %v5543_v9, %v12273_v59  ;;  %11772 = vmatprep.mubr.msk.bf16.mxu0 %vm11948_vm8, %v11946_v18  ;;  %v13633_v19 = vrot.slane %v5150_v50, %v12540_v8  ;;  %v13637_v13 = vcombine.high %v13630_v22, %v13630_v22 }
 0x3ff   :  { %v5597_v2 = vrot.slane %v5582_v43, %v12273_v59 }
 0x400   :  { %v5558_v35 = vcombine.low %v5550_v46, %v5557_v3  ;;  %v5590_v60 = vrot.slane %v5583_v42, %v12273_v59  ;;  %v13641_v21 = vcombine.high %v13633_v19, %v13633_v19  ;;  %v5635_v51 = vcombine.low %v13630_v22, %v13637_v13 }
 0x402   :  { %v5598_v24 = vcombine.low %v5590_v60, %v5597_v2  ;;  %v5636_v28 = vcombine.low %v13633_v19, %v13641_v21  ;;  %v13648_v45 = vrot.slane %v5635_v51, %v12540_v8 }
 0x404   :  { %v5650_v12 = vrot.slane %v5636_v28, %v12540_v8 }
 0x405   :  { %11773 = vmatmul.mubr.msk.bf16.gmra.mrb[44].mxu0 %vm3474_vm14, %v5509_v44 }
 0x406   :  { %11776 = vmatprep.mubr.msk.bf16.mxu0 %vm11948_vm8, %v11946_v18  ;;  %v13655_v11 = vcombine.low %v13648_v45, %v5650_v12 }
 0x40d   :  { %11777 = vmatmul.mubr.msk.bf16.gmra.mrb[48].mxu0 %vm3474_vm14, %v5558_v35 }
 0x40e   :  { %11780 = vmatprep.mubr.msk.bf16.mxu0 %vm11948_vm8, %v11946_v18 }
 0x415   :  { %11781 = vmatmul.mubr.msk.bf16.gmra.mrb[52].mxu0 %vm3474_vm14, %v5598_v24  ;;  %vm11400_vm14 = vcmask 572416  }
 0x416   :  { %11832 = vmatprep.mubr.msk.bf16.mxu0 %vm11948_vm8, %v11946_v18 }
 0x48c   :  { %v5743_v6 = vpop.f32.mrb[20].mxu0 }
 0x48d   :  { %v5744_v63 = vadd.f32 %v5743_v6, %v13655_v11  ;;  %v11750_v5 = vpop.f32.mrb[21].mxu0 }
 0x48e   :  { %v5746_v62 = vpop.f32.mrb[22].mxu0 }
 0x48f   :  { %v5832_v23 = vcombine.high %v5744_v63, %v5744_v63  ;;  %v5839_v53 = vrot.slane %v5744_v63, %v12540_v8  ;;  %v5747_v37 = vadd.f32 %v5746_v62, %v13655_v11  ;;  %v11751_v26 = vpop.f32.mrb[23].mxu0 }
 0x491   :  { %v5846_v16 = vrot.slane %v5832_v23, %v12540_v8  ;;  %v5847_v7 = vcombine.high %v5839_v53, %v5839_v53  ;;  %v5849_v40 = vcombine.high %v5747_v37, %v5747_v37  ;;  %v5856_v31 = vrot.slane %v5747_v37, %v12540_v8 }
 0x492   :  { %v6199_v54 = vmax.f32 %v5839_v53, 0.0 }
 0x493   :  { %v5848_v38 = vcombine.high %v5846_v16, %v5846_v16  ;;  %v5863_v41 = vrot.slane %v5849_v40, %v12540_v8  ;;  %v6200_v4 = vmax.f32 %v5847_v7, 0.0  ;;  %v5864_v36 = vcombine.high %v5856_v31, %v5856_v31 }
 0x494   :  { %v6201_v14 = vmax.f32 %v5846_v16, 0.0  ;;  %v6203_v52 = vmax.f32 %v5856_v31, 0.0 }
 0x495   :  { %v6202_v30 = vmax.f32 %v5848_v38, 0.0  ;;  %v5865_v32 = vcombine.high %v5863_v41, %v5863_v41  ;;  %v6204_v55 = vmax.f32 %v5864_v36, 0.0  ;;  %v6205_v48 = vmax.f32 %v5863_v41, 0.0 }
 0x496   :  { %v5751_v58 = vpop.f32.mrb[24].mxu0  ;;  %v6339_v39 = vcombine.low %v6199_v54, %v6200_v4 }
 0x497   :  { %v6340_v33 = vcombine.low %v6201_v14, %v6202_v30  ;;  %v6206_v29 = vmax.f32 %v5865_v32, 0.0  ;;  %v5752_v10 = vadd.f32 %v5751_v58, %v13655_v11  ;;  %v11754_v47 = vpop.f32.mrb[25].mxu0  ;;  %v6356_v25 = vcombine.low %v6203_v52, %v6204_v55 }
 0x498   :  { %v5754_v49 = vpop.f32.mrb[26].mxu0  ;;  %v6347_v60 = vrot.slane %v6339_v39, %v12540_v8 }
 0x499   :  { %v6357_v20 = vcombine.low %v6205_v48, %v6206_v29  ;;  %v5866_v1 = vcombine.high %v5752_v10, %v5752_v10  ;;  %v5873_v34 = vrot.slane %v5752_v10, %v12540_v8  ;;  %v5755_v9 = vadd.f32 %v5754_v49, %v13655_v11  ;;  %v11755_v43 = vpop.f32.mrb[27].mxu0 }
 0x49a   :  { %v6354_v42 = vrot.slane %v6340_v33, %v12540_v8  ;;  %v6364_v2 = vrot.slane %v6356_v25, %v12540_v8 }
 0x49b   :  { %v5880_v44 = vrot.slane %v5866_v1, %v12540_v8  ;;  %v5881_v46 = vcombine.high %v5873_v34, %v5873_v34  ;;  %v5883_v3 = vcombine.high %v5755_v9, %v5755_v9  ;;  %v5890_v35 = vrot.slane %v5755_v9, %v12540_v8 }
 0x49c   :  { %v6371_v24 = vrot.slane %v6357_v20, %v12540_v8  ;;  %v6355_v12 = vcombine.low %v6347_v60, %v6354_v42  ;;  %v6207_v5 = vmax.f32 %v5873_v34, 0.0 }
 0x49d   :  { %v5882_v0 = vcombine.high %v5880_v44, %v5880_v44  ;;  %v5897_v50 = vrot.slane %v5883_v3, %v12540_v8  ;;  %v6208_v51 = vmax.f32 %v5881_v46, 0.0  ;;  %v5898_v28 = vcombine.high %v5890_v35, %v5890_v35 }
 0x49e   :  { %v6372_v15 = vcombine.low %v6364_v2, %v6371_v24  ;;  %v6209_v56 = vmax.f32 %v5880_v44, 0.0  ;;  %v6211_v62 = vmax.f32 %v5890_v35, 0.0 }
 0x49f   :  { %v6210_v6 = vmax.f32 %v5882_v0, 0.0  ;;  %v5899_v63 = vcombine.high %v5897_v50, %v5897_v50  ;;  %v6212_v23 = vmax.f32 %v5898_v28, 0.0  ;;  %v6213_v26 = vmax.f32 %v5897_v50, 0.0 }
 0x4a0   :  { %v6661_v53 = vpack.c.bf16 %v6372_v15, %v6355_v12  ;;  %v6373_v7 = vcombine.low %v6207_v5, %v6208_v51 }
 0x4a1   :  { %v6374_v37 = vcombine.low %v6209_v56, %v6210_v6  ;;  %v6214_v16 = vmax.f32 %v5899_v63, 0.0  ;;  %v6390_v40 = vcombine.low %v6211_v62, %v6212_v23 }
 0x4a2   :  { %6805 = vrot.lane.b32.xlu0 %v6661_v53, %s11953_s17  ;;  %v13679_v31 = vshrl.u32 %v6661_v53, 16  ;;  %v6686_v38 = vshll.u32 %v6661_v53, 16  ;;  %v6381_v58 = vrot.slane %v6373_v7, %v12540_v8 }
 0x4a3   :  { %v6391_v41 = vcombine.low %v6213_v26, %v6214_v16  ;;  %v6388_v36 = vrot.slane %v6374_v37, %v12540_v8  ;;  %v6398_v54 = vrot.slane %v6390_v40, %v12540_v8 }
 0x4a4   :  { %v6685_v14 = vrot.slane %v13679_v31, 7  ;;  %v6761_v33 = vrot.slane %v6686_v38, 1 }
 0x4a5   :  { %v6405_v52 = vrot.slane %v6391_v41, %v12540_v8  ;;  %v6389_v49 = vcombine.low %v6381_v58, %v6388_v36 }
 0x4a6   :  { %v5759_v4 = vpop.f32.mrb[28].mxu0  ;;  %v13689_v48 = vor.u32 %v6686_v38, %v6685_v14  ;;  %v6762_v35 = vor.u32 %v6761_v33, %v13679_v31 }
 0x4a7   :  { %v5760_v30 = vadd.f32 %v5759_v4, %v13655_v11  ;;  %v11758_v32 = vpop.f32.mrb[29].mxu0  ;;  %v6406_v25 = vcombine.low %v6398_v54, %v6405_v52 }
 0x4a8   :  { %v5762_v55 = vpop.f32.mrb[30].mxu0  ;;  %v6759_v20 = vsel %vm12169_vm5, %v13679_v31, %v13689_v48 }
 0x4a9   :  { %v5900_v29 = vcombine.high %v5760_v30, %v5760_v30  ;;  %v5907_v10 = vrot.slane %v5760_v30, %v12540_v8  ;;  %v5763_v47 = vadd.f32 %v5762_v55, %v13655_v11  ;;  %v11759_v39 = vpop.f32.mrb[31].mxu0  ;;  %v13699_v42 = vpack.c.bf16 %v6406_v25, %v6389_v49 }
 0x4ab   :  { %v5914_v1 = vrot.slane %v5900_v29, %v12540_v8  ;;  %v5915_v34 = vcombine.high %v5907_v10, %v5907_v10  ;;  %v5917_v9 = vcombine.high %v5763_v47, %v5763_v47  ;;  %v5924_v43 = vrot.slane %v5763_v47, %v12540_v8  ;;  %6807 = vrot.lane.b32.xlu0 %v13699_v42, %s11953_s17 }
 0x4ac   :  { %v6215_v60 = vmax.f32 %v5907_v10, 0.0  ;;  %v6693_v50 = vshll.u32 %v13699_v42, 16  ;;  %v6690_v56 = vshrl.u32 %v13699_v42, 16  ;;  %v11911_v42 = vld [vmem:[%s14902_s7 + $0x10] sm:$0xff]  }
 0x4ad   :  { %v5916_v44 = vcombine.high %v5914_v1, %v5914_v1  ;;  %v6216_v46 = vmax.f32 %v5915_v34, 0.0  ;;  %v5931_v3 = vrot.slane %v5917_v9, %v12540_v8  ;;  %v6217_v2 = vmax.f32 %v5914_v1, 0.0  ;;  %11789 = vmatpush3.bf16.msra.mxu1 %v11911_v42 }
 0x4ae   :  { %v5932_v24 = vcombine.high %v5924_v43, %v5924_v43  ;;  %v5767_v0 = vpop.f32.mrb[32].mxu0  ;;  %v6219_v12 = vmax.f32 %v5924_v43, 0.0  ;;  %v6763_v23 = vrot.slane %v6693_v50, 1  ;;  %v6692_v58 = vrot.slane %v6690_v56, 7  ;;  %11868 = vmatprep.subr.bf16.mxu1 %v11946_v18 }
 0x4af   :  { %v6218_v51 = vmax.f32 %v5916_v44, 0.0  ;;  %v5933_v28 = vcombine.high %v5931_v3, %v5931_v3  ;;  %v11762_v15 = vpop.f32.mrb[33].mxu0  ;;  %v6407_v6 = vcombine.low %v6215_v60, %v6216_v46  ;;  %v5768_v5 = vadd.f32 %v5767_v0, %v13655_v11 }
 0x4b0   :  { %v6220_v63 = vmax.f32 %v5932_v24, 0.0  ;;  %v5770_v62 = vpop.f32.mrb[34].mxu0  ;;  %v6221_v37 = vmax.f32 %v5931_v3, 0.0  ;;  %v6764_v4 = vsel %vm165_vm0, %v6762_v35, %v6763_v23  ;;  %v6695_v35 = vor.u32 %v6693_v50, %v6692_v58 }
 0x4b1   :  { %v6408_v53 = vcombine.low %v6217_v2, %v6218_v51  ;;  %v6222_v26 = vmax.f32 %v5933_v28, 0.0  ;;  %v5771_v16 = vadd.f32 %v5770_v62, %v13655_v11  ;;  %v11763_v7 = vpop.f32.mrb[35].mxu0  ;;  %v5934_v38 = vcombine.high %v5768_v5, %v5768_v5  ;;  %6827 = vrot.lane.b32.xlu1 %v6764_v4, %s11951_s24 }
 0x4b2   :  { %v6424_v40 = vcombine.low %v6219_v12, %v6220_v63  ;;  %v5941_v41 = vrot.slane %v5768_v5, %v12540_v8  ;;  %v6415_v10 = vrot.slane %v6407_v6, %v12540_v8  ;;  %v13725_v12 = vsel %vm86_vm4, %v6685_v14, %v6695_v35 }
 0x4b3   :  { %v6425_v36 = vcombine.low %v6221_v37, %v6222_v26  ;;  %v5951_v30 = vcombine.high %v5771_v16, %v5771_v16  ;;  %v5958_v32 = vrot.slane %v5771_v16, %v12540_v8  ;;  %v6422_v54 = vrot.slane %v6408_v53, %v12540_v8 }
 0x4b4   :  { %v5948_v52 = vrot.slane %v5934_v38, %v12540_v8  ;;  %v5949_v55 = vcombine.high %v5941_v41, %v5941_v41  ;;  %v6223_v11 = vmax.f32 %v5941_v41, 0.0  ;;  %v6432_v25 = vrot.slane %v6424_v40, %v12540_v8 }
 0x4b5   :  { %v5965_v33 = vrot.slane %v5951_v30, %v12540_v8  ;;  %v5966_v29 = vcombine.high %v5958_v32, %v5958_v32  ;;  %v6439_v49 = vrot.slane %v6425_v36, %v12540_v8  ;;  %v6227_v34 = vmax.f32 %v5958_v32, 0.0 }
 0x4b6   :  { %v5950_v47 = vcombine.high %v5948_v52, %v5948_v52  ;;  %v6224_v39 = vmax.f32 %v5949_v55, 0.0  ;;  %v6423_v43 = vcombine.low %v6415_v10, %v6422_v54  ;;  %v6225_v44 = vmax.f32 %v5948_v52, 0.0 }
 0x4b7   :  { %v5967_v1 = vcombine.high %v5965_v33, %v5965_v33  ;;  %v6228_v9 = vmax.f32 %v5966_v29, 0.0  ;;  %v6440_v3 = vcombine.low %v6432_v25, %v6439_v49  ;;  %v6229_v2 = vmax.f32 %v5965_v33, 0.0 }
 0x4b8   :  { %v6226_v46 = vmax.f32 %v5950_v47, 0.0  ;;  %v6441_v60 = vcombine.low %v6223_v11, %v6224_v39  ;;  %v6765_v37 = vor.u32 %v6763_v23, %v6690_v56  ;;  %v5652_v14 = vcombine.low %v13633_v19, %v13630_v22 }
 0x4b9   :  { %v6230_v24 = vmax.f32 %v5967_v1, 0.0  ;;  %v6458_v0 = vcombine.low %v6227_v34, %v6228_v9  ;;  %v6663_v28 = vpack.c.bf16 %v6440_v3, %v6423_v43  ;;  %v5661_v38 = vcombine.low %v13637_v13, %v13633_v19 }
 0x4ba   :  { %v6442_v51 = vcombine.low %v6225_v44, %v6226_v46  ;;  %v6449_v5 = vrot.slane %v6441_v60, %v12540_v8  ;;  %v5662_v36 = vcombine.low %v13641_v21, %v13630_v22  ;;  %v5659_v23 = vrot.slane %v5652_v14, %v12540_v8 }
 0x4bb   :  { %v6459_v15 = vcombine.low %v6229_v2, %v6230_v24  ;;  %6809 = vrot.lane.b32.xlu0 %v6663_v28, %s11953_s17  ;;  %v6701_v6 = vshll.u32 %v6663_v28, 16  ;;  %v6698_v63 = vshrl.u32 %v6663_v28, 16  ;;  %v6466_v62 = vrot.slane %v6458_v0, %v12540_v8 }
 0x4bc   :  { %v6456_v50 = vrot.slane %v6442_v51, %v12540_v8  ;;  %v13747_v19 = vrot.slane %v5661_v38, %v12540_v8  ;;  %v5676_v13 = vrot.slane %v5662_v36, %v12540_v8  ;;  %v5660_v21 = vcombine.low %v13648_v45, %v5659_v23 }
 0x4bd   :  { %v6473_v53 = vrot.slane %v6459_v15, %v12540_v8  ;;  %v6766_v26 = vrot.slane %v6701_v6, 1  ;;  %v6700_v16 = vrot.slane %v6698_v63, 7 }
 0x4be   :  { %v6457_v7 = vcombine.low %v6449_v5, %v6456_v50  ;;  %v13757_v33 = vcombine.low %v13747_v19, %v5676_v13 }
 0x4bf   :  { %v6474_v40 = vcombine.low %v6466_v62, %v6473_v53  ;;  %v6767_v41 = vsel %vm165_vm0, %v6765_v37, %v6766_v26  ;;  %v6703_v4 = vor.u32 %v6701_v6, %v6700_v16  ;;  %v6768_v52 = vor.u32 %v6766_v26, %v6698_v63 }
 0x4c0   :  { %6829 = vrot.lane.b32.xlu1 %v6767_v41, %s11951_s24 }
 0x4c1   :  { %v6664_v30 = vpack.c.bf16 %v6474_v40, %v6457_v7  ;;  %v13742_v56 = vsel %vm86_vm4, %v6692_v58, %v6703_v4 }
 0x4c3   :  { %6811 = vrot.lane.b32.xlu0 %v6664_v30, %s11953_s17  ;;  %v6709_v32 = vshll.u32 %v6664_v30, 16  ;;  %v6706_v54 = vshrl.u32 %v6664_v30, 16 }
 0x4c5   :  { %v6769_v55 = vrot.slane %v6709_v32, 1  ;;  %v13750_v22 = vrot.slane %v6706_v54, 7 }
 0x4c7   :  { %v6770_v58 = vsel %vm165_vm0, %v6768_v52, %v6769_v55  ;;  %v6711_v11 = vor.u32 %v6709_v32, %v13750_v22  ;;  %v6771_v37 = vor.u32 %v6769_v55, %v6706_v54 }
 0x4c8   :  { %6831 = vrot.lane.b32.xlu1 %v6770_v58, %s11951_s24  ;;  %v5775_v10 = vpop.f32.mrb[36].mxu0 }
 0x4c9   :  { %v13760_v29 = vsel %vm86_vm4, %v6700_v16, %v6711_v11  ;;  %v5776_v47 = vadd.f32 %v5775_v10, %v5660_v21  ;;  %v11766_v39 = vpop.f32.mrb[37].mxu0 }
 0x4ca   :  { %v5778_v25 = vpop.f32.mrb[38].mxu0 }
 0x4cb   :  { %v5968_v49 = vcombine.high %v5776_v47, %v5776_v47  ;;  %v5975_v1 = vrot.slane %v5776_v47, %v12540_v8  ;;  %v5779_v45 = vadd.f32 %v5778_v25, %v13757_v33  ;;  %v11767_v34 = vpop.f32.mrb[39].mxu0 }
 0x4cd   :  { %v5982_v9 = vrot.slane %v5968_v49, %v12540_v8  ;;  %v5983_v43 = vcombine.high %v5975_v1, %v5975_v1  ;;  %v5985_v42 = vcombine.high %v5779_v45, %v5779_v45  ;;  %v6231_v44 = vmax.f32 %v5975_v1, 0.0 }
 0x4ce   :  { %v5992_v46 = vrot.slane %v5779_v45, %v12540_v8 }
 0x4cf   :  { %v5984_v3 = vcombine.high %v5982_v9, %v5982_v9  ;;  %v6232_v35 = vmax.f32 %v5983_v43, 0.0  ;;  %v6233_v60 = vmax.f32 %v5982_v9, 0.0  ;;  %v5999_v2 = vrot.slane %v5985_v42, %v12540_v8 }
 0x4d0   :  { %v6000_v24 = vcombine.high %v5992_v46, %v5992_v46  ;;  %v5783_v0 = vpop.f32.mrb[40].mxu0  ;;  %v6235_v6 = vmax.f32 %v5992_v46, 0.0 }
 0x4d1   :  { %v6234_v51 = vmax.f32 %v5984_v3, 0.0  ;;  %v6475_v28 = vcombine.low %v6231_v44, %v6232_v35  ;;  %v6001_v15 = vcombine.high %v5999_v2, %v5999_v2  ;;  %v11770_v50 = vpop.f32.mrb[41].mxu0  ;;  %v6237_v5 = vmax.f32 %v5999_v2, 0.0 }
 0x4d2   :  { %v6236_v63 = vmax.f32 %v6000_v24, 0.0  ;;  %v5784_v62 = vadd.f32 %v5783_v0, %v13757_v33  ;;  %v5786_v53 = vpop.f32.mrb[42].mxu0  ;;  %v6489_v16 = vrot.slane %v6233_v60, %v12540_v8 }
 0x4d3   :  { %v6482_v26 = vrot.slane %v6475_v28, %v12540_v8  ;;  %v6491_v14 = vcombine.low %v6234_v51, %v6235_v6  ;;  %v5787_v7 = vadd.f32 %v5786_v53, %v13757_v33  ;;  %v11771_v40 = vpop.f32.mrb[43].mxu0  ;;  %v6238_v38 = vmax.f32 %v6001_v15, 0.0 }
 0x4d4   :  { %v6492_v41 = vcombine.low %v6236_v63, %v6237_v5  ;;  %v6002_v4 = vcombine.high %v5784_v62, %v5784_v62  ;;  %v6009_v36 = vrot.slane %v5784_v62, %v12540_v8 }
 0x4d5   :  { %v6490_v30 = vcombine.low %v6482_v26, %v6489_v16  ;;  %v6019_v23 = vcombine.high %v5787_v7, %v5787_v7  ;;  %v6026_v32 = vrot.slane %v5787_v7, %v12540_v8  ;;  %v6499_v13 = vrot.slane %v6491_v14, %v12540_v8 }
 0x4d6   :  { %v6016_v54 = vrot.slane %v6002_v4, %v12540_v8  ;;  %v6017_v52 = vcombine.high %v6009_v36, %v6009_v36  ;;  %v6239_v55 = vmax.f32 %v6009_v36, 0.0  ;;  %v6506_v21 = vrot.slane %v6492_v41, %v12540_v8 }
 0x4d7   :  { %v13776_v58 = vpack.c.bf16 %v6490_v30, %v6490_v30  ;;  %v6033_v11 = vrot.slane %v6019_v23, %v12540_v8  ;;  %v6034_v10 = vcombine.high %v6026_v32, %v6026_v32  ;;  %v6243_v47 = vmax.f32 %v6026_v32, 0.0 }
 0x4d8   :  { %v6018_v39 = vcombine.high %v6016_v54, %v6016_v54  ;;  %v6240_v25 = vmax.f32 %v6017_v52, 0.0  ;;  %v6241_v49 = vmax.f32 %v6016_v54, 0.0  ;;  %v6508_v1 = vcombine.low %v6238_v38, %v6239_v55  ;;  %v5791_v45 = vpop.f32.mrb[44].mxu0 }
 0x4d9   :  { %v6035_v34 = vcombine.high %v6033_v11, %v6033_v11  ;;  %v6244_v9 = vmax.f32 %v6034_v10, 0.0  ;;  %v6245_v43 = vmax.f32 %v6033_v11, 0.0  ;;  %v5792_v42 = vadd.f32 %v5791_v45, %v13757_v33  ;;  %v11774_v44 = vpop.f32.mrb[45].mxu0 }
 0x4da   :  { %v6242_v46 = vmax.f32 %v6018_v39, 0.0  ;;  %v6509_v3 = vcombine.low %v6240_v25, %v6241_v49  ;;  %v5794_v35 = vpop.f32.mrb[46].mxu0  ;;  %v13781_v60 = vshll.u32 %v13776_v58, 16  ;;  %v6507_v2 = vcombine.low %v6499_v13, %v6506_v21 }
 0x4db   :  { %v6246_v24 = vmax.f32 %v6035_v34, 0.0  ;;  %v6526_v0 = vcombine.low %v6244_v9, %v6245_v43  ;;  %v6036_v51 = vcombine.high %v5792_v42, %v5792_v42  ;;  %v6043_v28 = vrot.slane %v5792_v42, %v12540_v8  ;;  %v11775_v15 = vpop.f32.mrb[47].mxu0 }
 0x4dc   :  { %v6525_v6 = vcombine.low %v6242_v46, %v6243_v47  ;;  %v5795_v50 = vadd.f32 %v5794_v35, %v13757_v33  ;;  %v6772_v63 = vrot.slane %v13781_v60, 1  ;;  %v6516_v5 = vrot.slane %v6508_v1, %v12540_v8 }
 0x4dd   :  { %v6050_v62 = vrot.slane %v6036_v51, %v12540_v8  ;;  %v6051_v53 = vcombine.high %v6043_v28, %v6043_v28  ;;  %v6247_v26 = vmax.f32 %v6043_v28, 0.0  ;;  %v6523_v16 = vrot.slane %v6509_v3, %v12540_v8 }
 0x4de   :  { %v6053_v14 = vcombine.high %v5795_v50, %v5795_v50  ;;  %v6060_v7 = vrot.slane %v5795_v50, %v12540_v8  ;;  %v6773_v40 = vsel %vm165_vm0, %v6771_v37, %v6772_v63  ;;  %v6533_v38 = vrot.slane %v6525_v6, %v12540_v8 }
 0x4df   :  { %v6052_v41 = vcombine.high %v6050_v62, %v6050_v62  ;;  %v6248_v4 = vmax.f32 %v6051_v53, 0.0  ;;  %v6249_v36 = vmax.f32 %v6050_v62, 0.0  ;;  %v6542_v30 = vcombine.low %v6246_v24, %v6247_v26  ;;  %6833 = vrot.lane.b32.xlu1 %v6773_v40, %s11951_s24 }
 0x4e0   :  { %v6067_v23 = vrot.slane %v6053_v14, %v12540_v8  ;;  %v6068_v32 = vcombine.high %v6060_v7, %v6060_v7  ;;  %v6251_v13 = vmax.f32 %v6060_v7, 0.0  ;;  %v5799_v54 = vpop.f32.mrb[48].mxu0  ;;  %v6524_v52 = vcombine.low %v6516_v5, %v6523_v16 }
 0x4e1   :  { %v6250_v55 = vmax.f32 %v6052_v41, 0.0  ;;  %v6543_v21 = vcombine.low %v6248_v4, %v6249_v36  ;;  %v5800_v11 = vadd.f32 %v5799_v54, %v13757_v33  ;;  %v11778_v10 = vpop.f32.mrb[49].mxu0  ;;  %v6540_v37 = vrot.slane %v6526_v0, %v12540_v8 }
 0x4e2   :  { %v6069_v47 = vcombine.high %v6067_v23, %v6067_v23  ;;  %v6252_v39 = vmax.f32 %v6068_v32, 0.0  ;;  %v6253_v25 = vmax.f32 %v6067_v23, 0.0  ;;  %v13798_v49 = vpack.c.bf16 %v6524_v52, %v6507_v2  ;;  %v5802_v1 = vpop.f32.mrb[50].mxu0 }
 0x4e3   :  { %v13800_v45 = vcombine.low %v6250_v55, %v6251_v13  ;;  %v6070_v34 = vcombine.high %v5800_v11, %v5800_v11  ;;  %v6077_v9 = vrot.slane %v5800_v11, %v12540_v8  ;;  %v5803_v43 = vadd.f32 %v5802_v1, %v13757_v33  ;;  %v11779_v42 = vpop.f32.mrb[51].mxu0 }
 0x4e4   :  { %v6254_v44 = vmax.f32 %v6069_v47, 0.0  ;;  %v6560_v46 = vcombine.low %v6252_v39, %v6253_v25  ;;  %6815 = vrot.lane.b32.xlu0 %v13798_v49, %s11953_s17  ;;  %v13807_v3 = vshrl.u32 %v13798_v49, 16  ;;  %v6722_v35 = vshll.u32 %v13798_v49, 16 }
 0x4e5   :  { %v6084_v2 = vrot.slane %v6070_v34, %v12540_v8  ;;  %v6085_v24 = vcombine.high %v6077_v9, %v6077_v9  ;;  %v6255_v0 = vmax.f32 %v6077_v9, 0.0  ;;  %v6087_v51 = vcombine.high %v5803_v43, %v5803_v43 }
 0x4e6   :  { %v6094_v28 = vrot.slane %v5803_v43, %v12540_v8  ;;  %v6541_v15 = vcombine.low %v6533_v38, %v6540_v37  ;;  %v6550_v6 = vrot.slane %v6542_v30, %v12540_v8  ;;  %v6557_v50 = vrot.slane %v6543_v21, %v12540_v8 }
 0x4e7   :  { %v6086_v5 = vcombine.high %v6084_v2, %v6084_v2  ;;  %v6256_v62 = vmax.f32 %v6085_v24, 0.0  ;;  %v6257_v53 = vmax.f32 %v6084_v2, 0.0  ;;  %v6576_v26 = vcombine.low %v6254_v44, %v6255_v0 }
 0x4e8   :  { %v6101_v16 = vrot.slane %v6087_v51, %v12540_v8  ;;  %v6102_v14 = vcombine.high %v6094_v28, %v6094_v28  ;;  %v6259_v7 = vmax.f32 %v6094_v28, 0.0  ;;  %6813 = vrot.lane.b32.xlu0 %v13776_v58, %s11953_s17  ;;  %v5807_v40 = vpop.f32.mrb[52].mxu0  ;;  %v6558_v41 = vcombine.low %v6550_v6, %v6557_v50 }
 0x4e9   :  { %v6258_v4 = vmax.f32 %v6086_v5, 0.0  ;;  %v6577_v36 = vcombine.low %v6256_v62, %v6257_v53  ;;  %v5808_v38 = vadd.f32 %v5807_v40, %v13757_v33  ;;  %v11782_v30 = vpop.f32.mrb[53].mxu0  ;;  %v6775_v23 = vrot.slane %v6722_v35, 1 }
 0x4ea   :  { %v6103_v32 = vcombine.high %v6101_v16, %v6101_v16  ;;  %v6260_v13 = vmax.f32 %v6102_v14, 0.0  ;;  %v6261_v54 = vmax.f32 %v6101_v16, 0.0  ;;  %v6667_v52 = vpack.c.bf16 %v6558_v41, %v6541_v15  ;;  %v5810_v55 = vpop.f32.mrb[54].mxu0 }
 0x4eb   :  { %v6593_v21 = vcombine.low %v6258_v4, %v6259_v7  ;;  %v6104_v11 = vcombine.high %v5808_v38, %v5808_v38  ;;  %v6111_v10 = vrot.slane %v5808_v38, %v12540_v8  ;;  %v5811_v37 = vadd.f32 %v5810_v55, %v13747_v19  ;;  %v11783_v47 = vpop.f32.mrb[55].mxu0 }
 0x4ec   :  { %v6262_v39 = vmax.f32 %v6103_v32, 0.0  ;;  %v6594_v25 = vcombine.low %v6260_v13, %v6261_v54  ;;  %6817 = vrot.lane.b32.xlu0 %v6667_v52, %s11953_s17  ;;  %v6729_v33 = vshll.u32 %v6667_v52, 16  ;;  %v6776_v1 = vor.u32 %v6775_v23, %v13807_v3 }
 0x4ed   :  { %v6118_v34 = vrot.slane %v6104_v11, %v12540_v8  ;;  %v6119_v9 = vcombine.high %v6111_v10, %v6111_v10  ;;  %v6263_v43 = vmax.f32 %v6111_v10, 0.0  ;;  %v6127_v42 = vrot.slane %v5811_v37, %v12540_v8 }
 0x4ee   :  { %v6777_v44 = vrot.slane %v6729_v33, 1  ;;  %v6567_v2 = vrot.slane %v13800_v45, %v12540_v8  ;;  %v6574_v19 = vrot.slane %v6560_v46, %v12540_v8  ;;  %v6584_v24 = vrot.slane %v6576_v26, %v12540_v8 }
 0x4ef   :  { %v6120_v0 = vcombine.high %v6118_v34, %v6118_v34  ;;  %v6264_v51 = vmax.f32 %v6119_v9, 0.0  ;;  %v6265_v28 = vmax.f32 %v6118_v34, 0.0  ;;  %v6610_v15 = vcombine.low %v6262_v39, %v6263_v43 }
 0x4f0   :  { %v6128_v6 = vcombine.high %v6127_v42, %v6127_v42  ;;  %v6267_v50 = vmax.f32 %v6127_v42, 0.0  ;;  %v6778_v5 = vsel %vm165_vm0, %v6776_v1, %v6777_v44  ;;  %v6575_v62 = vcombine.low %v6567_v2, %v6574_v19 }
 0x4f1   :  { %v6266_v53 = vmax.f32 %v6120_v0, 0.0  ;;  %v6611_v16 = vcombine.low %v6264_v51, %v6265_v28  ;;  %6837 = vrot.lane.b32.xlu1 %v6778_v5, %s11951_s24  ;;  %v6591_v14 = vrot.slane %v6577_v36, %v12540_v8  ;;  %v6714_v45 = vshrl.u32 %v13776_v58, 16 }
 0x4f2   :  { %v6268_v46 = vmax.f32 %v6128_v6, 0.0  ;;  %v6726_v7 = vshrl.u32 %v6667_v52, 16  ;;  %v6601_v26 = vrot.slane %v6593_v21, %v12540_v8  ;;  %v6608_v40 = vrot.slane %v6594_v25, %v12540_v8 }
 0x4f3   :  { %v6627_v41 = vcombine.low %v6266_v53, %v6267_v50  ;;  %v6592_v4 = vcombine.low %v6584_v24, %v6591_v14  ;;  %v6716_v38 = vrot.slane %v6714_v45, 7  ;;  %v6774_v30 = vor.u32 %v6772_v63, %v6714_v45 }
 0x4f4   :  { %v6728_v23 = vrot.slane %v6726_v7, 7  ;;  %v6609_v32 = vcombine.low %v6601_v26, %v6608_v40  ;;  %v6618_v13 = vrot.slane %v6610_v15, %v12540_v8  ;;  %v6625_v36 = vrot.slane %v6611_v16, %v12540_v8 }
 0x4f5   :  { %v6668_v54 = vpack.c.bf16 %v6592_v4, %v6575_v62  ;;  %v6793_v58 = vsel %vm12209_vm7, %v6774_v30, %v13781_v60  ;;  %v6634_v52 = vrot.slane %v6627_v41, %v12540_v8  ;;  %v6641_v55 = vrot.slane %v6268_v46, %v12540_v8 }
 0x4f6   :  { %6835 = vrot.lane.b32.xlu1 %v6793_v58, %s11951_s24  ;;  %v6721_v21 = vrot.slane %v13807_v3, 7  ;;  %v6719_v63 = vor.u32 %v13781_v60, %v6716_v38  ;;  %v6731_v11 = vor.u32 %v6729_v33, %v6728_v23  ;;  %v6626_v37 = vcombine.low %v6618_v13, %v6625_v36 }
 0x4f7   :  { %6819 = vrot.lane.b32.xlu0 %v6668_v54, %s11953_s17  ;;  %v6737_v10 = vshll.u32 %v6668_v54, 16  ;;  %v6734_v47 = vshrl.u32 %v6668_v54, 16  ;;  %v6642_v39 = vcombine.low %v6634_v52, %v6641_v55  ;;  %v6779_v9 = vor.u32 %v6777_v44, %v6726_v7 }
 0x4f8   :  { %v13851_v25 = vor.u32 %v6722_v35, %v6721_v21  ;;  %v13855_v1 = vsel %vm86_vm4, %v13750_v22, %v6719_v63  ;;  %v13858_v34 = vsel %vm86_vm4, %v6721_v21, %v6731_v11  ;;  %v6669_v33 = vpack.c.bf16 %v6626_v37, %v6609_v32 }
 0x4f9   :  { %v6780_v60 = vrot.slane %v6737_v10, 1  ;;  %v6736_v43 = vrot.slane %v6734_v47, 7  ;;  %v6670_v42 = vpack.c.bf16 %v6642_v39, %v6642_v39 }
 0x4fa   :  { %v6760_v2 = vsel %vm12169_vm5, %v13807_v3, %v13851_v25  ;;  %v6745_v35 = vshll.u32 %v6669_v33, 16  ;;  %v6742_v22 = vshrl.u32 %v6669_v33, 16 }
 0x4fb   :  { %v6781_v49 = vsel %vm165_vm0, %v6779_v9, %v6780_v60  ;;  %6821 = vrot.lane.b32.xlu0 %v6669_v33, %s11953_s17  ;;  %v6753_v19 = vshll.u32 %v6670_v42, 16  ;;  %v6750_v24 = vshrl.u32 %v6670_v42, 16  ;;  %v6739_v44 = vor.u32 %v6737_v10, %v6736_v43 }
 0x4fc   :  { %6839 = vrot.lane.b32.xlu1 %v6781_v49, %s11951_s24  ;;  %v6782_v0 = vor.u32 %v6780_v60, %v6734_v47  ;;  %v6783_v51 = vrot.slane %v6745_v35, 1  ;;  %v6744_v28 = vrot.slane %v6742_v22, 7 }
 0x4fd   :  { %v6786_v15 = vrot.slane %v6753_v19, 1  ;;  %v6752_v6 = vrot.slane %v6750_v24, 7  ;;  %v13868_v50 = vsel %vm86_vm4, %v6728_v23, %v6739_v44 }
 0x4fe   :  { %v6784_v5 = vsel %vm165_vm0, %v6782_v0, %v6783_v51  ;;  %v6785_v62 = vor.u32 %v6783_v51, %v6742_v22  ;;  %v6747_v53 = vor.u32 %v6745_v35, %v6744_v28 }
 0x4ff   :  { %6823 = vrot.lane.b32.xlu0 %v6670_v42, %s11953_s17  ;;  %v6755_v16 = vor.u32 %v6753_v19, %v6752_v6  ;;  %v6788_v7 = vor.u32 %v6786_v15, %v6750_v24  ;;  %s11956_s17 = smov [#allocation2]  }
 0x500   :  { %6841 = vrot.lane.b32.xlu1 %v6784_v5, %s11951_s24  ;;  %v6787_v14 = vsel %vm165_vm0, %v6785_v62, %v6786_v15  ;;  %v13875_v45 = vsel %vm86_vm4, %v6736_v43, %v6747_v53  ;;  %s11456_s18 = sshll.u32 %s11956_s17, 4  ;;  %s11457_s18 = int_to_ptr.vmem [resolvable:$true] %s11456_s18 }
 0x501   :  { %v13878_v46 = vsel %vm86_vm4, %v6744_v28, %v6755_v16  ;;  %v6794_v26 = vsel %vm12209_vm7, %v6788_v7, %v6753_v19  ;;  %s11920_s3 = scalar_lea.vmem %s11457_s18, 32  ;;  %p11925_p1 = scmp.lt.s32.totalorder %s11457_s18, %s11457_s18 }
 0x502   :  { %p11921_p0 = scmp.ne.s32.totalorder %s11457_s18, %s11920_s3  ;;  %p11926_p2 = scmp.lt.s32.totalorder %s11920_s3, %s11920_s3 }
 0x504   :  { %6843 = vrot.lane.b32.xlu1 %v6787_v14, %s11951_s24  ;;  %p11927_p3 = por %p11926_p2, %p11925_p1 }
 0x506   :  { %p11928_p4 = pnand %p11927_p3, %p11921_p0 }
 0x508   :  { %6845 = vrot.lane.b32.xlu1 %v6794_v26, %s11951_s24 }
 0x514   :  { %v6806_v40 = vpop.permute.xlu0 %6805 }
 0x515   :  { %v6850_v41 = vsel %vm6847_vm15, %v6759_v20, %v6806_v40 }
 0x51d   :  { %v6808_v10 = vpop.permute.xlu0 %6807 }
 0x51e   :  { %v6853_v9 = vsel %vm6847_vm15, %v13725_v12, %v6808_v10 }
 0x523   :  { %v6828_v4 = vpop.permute.xlu1 %6827 }
 0x524   :  { %v6879_v38 = vsel %vm2436_vm12, %v6850_v41, %v6828_v4 }
 0x525   :  { %v6914_v30 = vcombine.high %v6879_v38, %v6879_v38  ;;  %v6921_v23 = vrot.slane %v6879_v38, %v12273_v59 }
 0x527   :  { %v6928_v32 = vrot.slane %v6914_v30, %v12273_v59  ;;  %v6929_v13 = vcombine.high %v6921_v23, %v6921_v23  ;;  %v6937_v58 = vrot.slane %v6921_v23, %v12273_v59 }
 0x529   :  { %v6930_v54 = vcombine.high %v6928_v32, %v6928_v32  ;;  %v6951_v36 = vrot.slane %v6929_v13, %v12273_v59  ;;  %v6944_v52 = vrot.slane %v6928_v32, %v12273_v59 }
 0x52b   :  { %v6958_v31 = vrot.slane %v6930_v54, %v12273_v59  ;;  %v7369_v48 = vcombine.low %v6937_v58, %v6951_v36  ;;  %v11531_v20 = vcombine.high %v6937_v58, %v6951_v36 }
 0x52d   :  { %v7371_v55 = vcombine.low %v6944_v52, %v6958_v31  ;;  %v11532_v21 = vcombine.high %v6944_v52, %v6958_v31  ;;  %v7379_v63 = vrot.slane %v7369_v48, %v12273_v59  ;;  %v7386_v11 = vrot.slane %v11531_v20, %v12273_v59  ;;  %v6810_v24 = vpop.permute.xlu0 %6809 }
 0x52e   :  { %v6856_v15 = vsel %vm6847_vm15, %v13742_v56, %v6810_v24 }
 0x52f   :  { %v7393_v37 = vrot.slane %v7371_v55, %v12273_v59  ;;  %v7400_v47 = vrot.slane %v11532_v21, %v12273_v59  ;;  %v7401_v39 = vcombine.low %v7379_v63, %v7386_v11 }
 0x531   :  { %v7402_v60 = vcombine.low %v7393_v37, %v7400_v47  ;;  %v7409_v42 = vrot.slane %v7401_v39, %v12273_v59 }
 0x532   :  { %v6830_v33 = vpop.permute.xlu1 %6829 }
 0x533   :  { %v6881_v43 = vsel %vm2436_vm12, %v6853_v9, %v6830_v33  ;;  %v7416_v49 = vrot.slane %v7402_v60, %v12273_v59 }
 0x534   :  { %v6963_v35 = vcombine.high %v6881_v43, %v6881_v43  ;;  %v6970_v22 = vrot.slane %v6881_v43, %v12273_v59 }
 0x535   :  { %v7417_v19 = vcombine.low %v7409_v42, %v7416_v49 }
 0x536   :  { %v6977_v44 = vrot.slane %v6963_v35, %v12273_v59  ;;  %v6978_v0 = vcombine.high %v6970_v22, %v6970_v22  ;;  %v6986_v12 = vrot.slane %v6970_v22, %v12273_v59  ;;  %v6812_v22 = vpop.permute.xlu0 %6811 }
 0x537   :  { %11791 = vmatmul.mubr.msk.bf16.vlgmr.msra.gmra.mrb[52].mxu1 %vm7866_vm1, %v7417_v19  ;;  %v6859_v19 = vsel %vm6847_vm15, %v13760_v29, %v6812_v22 }
 0x538   :  { %v6979_v51 = vcombine.high %v6977_v44, %v6977_v44  ;;  %v7000_v28 = vrot.slane %v6978_v0, %v12273_v59  ;;  %v6993_v6 = vrot.slane %v6977_v44, %v12273_v59  ;;  %11794 = vmatprep.mubr.msk.bf16.mxu1 %vm11948_vm8, %v11946_v18 }
 0x53a   :  { %v6832_v5 = vpop.permute.xlu1 %6831  ;;  %v7007_v62 = vrot.slane %v6979_v51, %v12273_v59  ;;  %v7418_v53 = vcombine.low %v6986_v12, %v7000_v28  ;;  %v11533_v16 = vcombine.high %v6986_v12, %v7000_v28 }
 0x53b   :  { %v6883_v14 = vsel %vm2436_vm12, %v6856_v15, %v6832_v5 }
 0x53c   :  { %v7012_v7 = vcombine.high %v6883_v14, %v6883_v14  ;;  %v7019_v26 = vrot.slane %v6883_v14, %v12273_v59  ;;  %v7420_v40 = vcombine.low %v6993_v6, %v7007_v62  ;;  %v11534_v41 = vcombine.high %v6993_v6, %v7007_v62 }
 0x53d   :  { %v7428_v4 = vrot.slane %v7418_v53, %v12273_v59  ;;  %v7435_v56 = vrot.slane %v11533_v16, %v12273_v59 }
 0x53e   :  { %v7026_v38 = vrot.slane %v7012_v7, %v12273_v59  ;;  %v7027_v30 = vcombine.high %v7019_v26, %v7019_v26  ;;  %v7442_v23 = vrot.slane %v7420_v40, %v12273_v59  ;;  %v7449_v32 = vrot.slane %v11534_v41, %v12273_v59 }
 0x53f   :  { %v7450_v13 = vcombine.low %v7428_v4, %v7435_v56  ;;  %v7035_v58 = vrot.slane %v7019_v26, %v12273_v59 }
 0x540   :  { %v7028_v54 = vcombine.high %v7026_v38, %v7026_v38  ;;  %v7049_v36 = vrot.slane %v7027_v30, %v12273_v59  ;;  %v7451_v52 = vcombine.low %v7442_v23, %v7449_v32  ;;  %v7042_v31 = vrot.slane %v7026_v38, %v12273_v59 }
 0x541   :  { %v7458_v21 = vrot.slane %v7450_v13, %v12273_v59 }
 0x542   :  { %v7056_v48 = vrot.slane %v7028_v54, %v12273_v59  ;;  %v7467_v20 = vcombine.low %v7035_v58, %v7049_v36  ;;  %v11535_v55 = vcombine.high %v7035_v58, %v7049_v36  ;;  %v7465_v63 = vrot.slane %v7451_v52, %v12273_v59 }
 0x544   :  { %v7469_v11 = vcombine.low %v7042_v31, %v7056_v48  ;;  %v11536_v10 = vcombine.high %v7042_v31, %v7056_v48  ;;  %v7477_v37 = vrot.slane %v7467_v20, %v12273_v59  ;;  %v7484_v47 = vrot.slane %v11535_v55, %v12273_v59 }
 0x545   :  { %v7466_v39 = vcombine.low %v7458_v21, %v7465_v63 }
 0x546   :  { %v7491_v9 = vrot.slane %v7469_v11, %v12273_v59  ;;  %v7498_v60 = vrot.slane %v11536_v10, %v12273_v59  ;;  %v7499_v33 = vcombine.low %v7477_v37, %v7484_v47 }
 0x547   :  { %11795 = vmatmul.mubr.msk.bf16.gmra.mrb[56].mxu1 %vm7866_vm1, %v7466_v39 }
 0x548   :  { %11798 = vmatprep.mubr.msk.bf16.mxu1 %vm11948_vm8, %v11946_v18  ;;  %v7500_v43 = vcombine.low %v7491_v9, %v7498_v60  ;;  %v7507_v42 = vrot.slane %v7499_v33, %v12273_v59 }
 0x54a   :  { %v7514_v49 = vrot.slane %v7500_v43, %v12273_v59 }
 0x54c   :  { %v7515_v35 = vcombine.low %v7507_v42, %v7514_v49 }
 0x54f   :  { %11799 = vmatmul.mubr.msk.bf16.gmra.mrb[60].mxu1 %vm7866_vm1, %v7515_v35 }
 0x550   :  { %11802 = vmatprep.mubr.msk.bf16.mxu1 %vm11948_vm8, %v11946_v18 }
 0x551   :  { %v6834_v24 = vpop.permute.xlu1 %6833 }
 0x552   :  { %v6885_v44 = vsel %vm2436_vm12, %v6859_v19, %v6834_v24 }
 0x553   :  { %v7061_v0 = vcombine.high %v6885_v44, %v6885_v44  ;;  %v7068_v51 = vrot.slane %v6885_v44, %v12273_v59 }
 0x555   :  { %v7075_v12 = vrot.slane %v7061_v0, %v12273_v59  ;;  %v7076_v28 = vcombine.high %v7068_v51, %v7068_v51  ;;  %v7084_v6 = vrot.slane %v7068_v51, %v12273_v59 }
 0x556   :  { %v6816_v14 = vpop.permute.xlu0 %6815 }
 0x557   :  { %v7077_v15 = vcombine.high %v7075_v12, %v7075_v12  ;;  %v7098_v5 = vrot.slane %v7076_v28, %v12273_v59  ;;  %v7091_v62 = vrot.slane %v7075_v12, %v12273_v59  ;;  %v6865_v54 = vsel %vm6847_vm15, %v6760_v2, %v6816_v14 }
 0x559   :  { %v7105_v53 = vrot.slane %v7077_v15, %v12273_v59  ;;  %v7516_v16 = vcombine.low %v7084_v6, %v7098_v5  ;;  %v11537_v29 = vcombine.high %v7084_v6, %v7098_v5 }
 0x55a   :  { %v6814_v30 = vpop.permute.xlu0 %6813 }
 0x55b   :  { %v7518_v7 = vcombine.low %v7091_v62, %v7105_v53  ;;  %v11538_v26 = vcombine.high %v7091_v62, %v7105_v53  ;;  %v7526_v40 = vrot.slane %v7516_v16, %v12273_v59  ;;  %v7533_v41 = vrot.slane %v11537_v29, %v12273_v59 }
 0x55c   :  { %v6862_v25 = vsel %vm6847_vm15, %v13855_v1, %v6814_v30 }
 0x55d   :  { %v7540_v4 = vrot.slane %v7518_v7, %v12273_v59  ;;  %v7547_v56 = vrot.slane %v11538_v26, %v12273_v59  ;;  %v7548_v38 = vcombine.low %v7526_v40, %v7533_v41 }
 0x55e   :  { %v6818_v31 = vpop.permute.xlu0 %6817 }
 0x55f   :  { %v7549_v23 = vcombine.low %v7540_v4, %v7547_v56  ;;  %v7556_v32 = vrot.slane %v7548_v38, %v12273_v59  ;;  %v6868_v22 = vsel %vm6847_vm15, %v13858_v34, %v6818_v31 }
 0x561   :  { %v7563_v13 = vrot.slane %v7549_v23, %v12273_v59 }
 0x563   :  { %v6838_v58 = vpop.permute.xlu1 %6837  ;;  %v7564_v36 = vcombine.low %v7556_v32, %v7563_v13 }
 0x564   :  { %v6889_v52 = vsel %vm2436_vm12, %v6865_v54, %v6838_v58 }
 0x565   :  { %v7133_v48 = vcombine.high %v6889_v52, %v6889_v52  ;;  %v7140_v20 = vrot.slane %v6889_v52, %v12273_v59  ;;  %11803 = vmatmul.mubr.msk.bf16.gmra.mrb[64].mxu1 %vm7866_vm1, %v7564_v36 }
 0x566   :  { %11806 = vmatprep.mubr.msk.bf16.mxu1 %vm11948_vm8, %v11946_v18 }
 0x567   :  { %v7147_v55 = vrot.slane %v7133_v48, %v12273_v59  ;;  %v7148_v21 = vcombine.high %v7140_v20, %v7140_v20  ;;  %v7156_v3 = vrot.slane %v7140_v20, %v12273_v59 }
 0x568   :  { %v6836_v2 = vpop.permute.xlu1 %6835 }
 0x569   :  { %v7149_v63 = vcombine.high %v7147_v55, %v7147_v55  ;;  %v7163_v11 = vrot.slane %v7147_v55, %v12273_v59  ;;  %v7170_v10 = vrot.slane %v7148_v21, %v12273_v59  ;;  %v7178_v37 = vcombine.high %v7156_v3, %v7156_v3  ;;  %v6820_v47 = vpop.permute.xlu0 %6819 }
 0x56a   :  { %v6887_v39 = vsel %vm2436_vm12, %v6862_v25, %v6836_v2  ;;  %v6871_v51 = vsel %vm6847_vm15, %v13868_v50, %v6820_v47 }
 0x56b   :  { %v7177_v9 = vrot.slane %v7149_v63, %v12273_v59  ;;  %v7179_v60 = vcombine.high %v7163_v11, %v7163_v11  ;;  %v7180_v33 = vcombine.high %v7170_v10, %v7170_v10  ;;  %v7116_v43 = vrot.slane %v6887_v39, %v12273_v59 }
 0x56c   :  { %v7567_v42 = vcombine.low %v7170_v10, %v7178_v37 }
 0x56d   :  { %v7568_v49 = vcombine.low %v7180_v33, %v7163_v11  ;;  %v7614_v35 = vcombine.low %v7177_v9, %v7179_v60  ;;  %v6822_v1 = vpop.permute.xlu0 %6821  ;;  %v7117_v19 = vcombine.high %v7116_v43, %v7116_v43  ;;  %v7124_v24 = vrot.slane %v7116_v43, %v12273_v59 }
 0x56e   :  { %v6840_v44 = vpop.permute.xlu1 %6839  ;;  %v7589_v62 = vrot.slane %v7567_v42, %v12273_v59  ;;  %v7181_v34 = vcombine.high %v7177_v9, %v7177_v9  ;;  %v6874_v16 = vsel %vm6847_vm15, %v13875_v45, %v6822_v1 }
 0x56f   :  { %v7596_v0 = vrot.slane %v7568_v49, %v12273_v59  ;;  %v6891_v12 = vsel %vm2436_vm12, %v6868_v22, %v6840_v44  ;;  %v7131_v28 = vrot.slane %v7117_v19, %v12273_v59  ;;  %v7132_v15 = vcombine.high %v7124_v24, %v7124_v24 }
 0x570   :  { %v7182_v6 = vcombine.high %v6891_v12, %v6891_v12  ;;  %v7189_v5 = vrot.slane %v6891_v12, %v12273_v59  ;;  %v7624_v53 = vrot.slane %v7614_v35, %v12273_v59 }
 0x571   :  { %v6824_v29 = vpop.permute.xlu0 %6823  ;;  %v7565_v14 = vcombine.low %v7124_v24, %v7131_v28  ;;  %v7566_v7 = vcombine.low %v7132_v15, %v7156_v3  ;;  %v7598_v38 = vcombine.low %v7589_v62, %v7596_v0 }
 0x572   :  { %v7196_v50 = vrot.slane %v7182_v6, %v12273_v59  ;;  %v7197_v26 = vcombine.high %v7189_v5, %v7189_v5  ;;  %v6842_v40 = vpop.permute.xlu1 %6841  ;;  %v7205_v41 = vrot.slane %v7189_v5, %v12273_v59  ;;  %v6877_v4 = vsel %vm6847_vm15, %v13878_v46, %v6824_v29 }
 0x573   :  { %v6893_v56 = vsel %vm2436_vm12, %v6871_v51, %v6842_v40  ;;  %v7575_v30 = vrot.slane %v7565_v14, %v12273_v59  ;;  %v7582_v23 = vrot.slane %v7566_v7, %v12273_v59  ;;  %v7612_v10 = vrot.slane %v7598_v38, %v12273_v59 }
 0x574   :  { %v7198_v45 = vcombine.high %v7196_v50, %v7196_v50  ;;  %v7212_v32 = vrot.slane %v7196_v50, %v12273_v59  ;;  %v7219_v13 = vrot.slane %v7197_v26, %v12273_v59  ;;  %v7227_v54 = vcombine.high %v7205_v41, %v7205_v41 }
 0x575   :  { %v7615_v58 = vcombine.low %v7181_v34, %v7205_v41  ;;  %v7231_v36 = vcombine.high %v6893_v56, %v6893_v56  ;;  %v7597_v52 = vcombine.low %v7575_v30, %v7582_v23  ;;  %v7238_v46 = vrot.slane %v6893_v56, %v12273_v59 }
 0x576   :  { %v7226_v31 = vrot.slane %v7198_v45, %v12273_v59  ;;  %v7228_v48 = vcombine.high %v7212_v32, %v7212_v32  ;;  %v7229_v20 = vcombine.high %v7219_v13, %v7219_v13  ;;  %v7616_v55 = vcombine.low %v7219_v13, %v7227_v54  ;;  %v6844_v11 = vpop.permute.xlu1 %6843 }
 0x577   :  { %v7631_v21 = vrot.slane %v7615_v58, %v12273_v59  ;;  %v7245_v3 = vrot.slane %v7231_v36, %v12273_v59  ;;  %v7246_v2 = vcombine.high %v7238_v46, %v7238_v46  ;;  %v7254_v63 = vrot.slane %v7238_v46, %v12273_v59 }
 0x578   :  { %v7663_v25 = vcombine.low %v7226_v31, %v7228_v48  ;;  %v7617_v37 = vcombine.low %v7229_v20, %v7212_v32  ;;  %v7230_v39 = vcombine.high %v7226_v31, %v7226_v31  ;;  %v7638_v60 = vrot.slane %v7616_v55, %v12273_v59 }
 0x579   :  { %v7646_v47 = vcombine.low %v7624_v53, %v7631_v21  ;;  %v7247_v9 = vcombine.high %v7245_v3, %v7245_v3  ;;  %v7261_v33 = vrot.slane %v7245_v3, %v12273_v59  ;;  %v7268_v43 = vrot.slane %v7246_v2, %v12273_v59 }
 0x57a   :  { %v7276_v42 = vcombine.high %v7254_v63, %v7254_v63  ;;  %v7673_v49 = vrot.slane %v7663_v25, %v12273_v59  ;;  %v7664_v1 = vcombine.low %v7230_v39, %v7254_v63  ;;  %v6895_v22 = vsel %vm2436_vm12, %v6874_v16, %v6844_v11  ;;  %v6846_v53 = vpop.permute.xlu1 %6845 }
 0x57b   :  { %v7275_v35 = vrot.slane %v7247_v9, %v12273_v59  ;;  %v7277_v19 = vcombine.high %v7261_v33, %v7261_v33  ;;  %v7278_v24 = vcombine.high %v7268_v43, %v7268_v43  ;;  %v7280_v0 = vcombine.high %v6895_v22, %v6895_v22 }
 0x57c   :  { %v7665_v44 = vcombine.low %v7268_v43, %v7276_v42  ;;  %v7680_v51 = vrot.slane %v7664_v1, %v12273_v59  ;;  %v7287_v28 = vrot.slane %v6895_v22, %v12273_v59  ;;  %v7605_v15 = vrot.slane %v7597_v52, %v12273_v59 }
 0x57d   :  { %v7279_v12 = vcombine.high %v7275_v35, %v7275_v35  ;;  %v7645_v6 = vrot.slane %v7617_v37, %v12273_v59  ;;  %v7666_v5 = vcombine.low %v7278_v24, %v7261_v33  ;;  %v7712_v62 = vcombine.low %v7275_v35, %v7277_v19 }
 0x57e   :  { %v7294_v34 = vrot.slane %v7280_v0, %v12273_v59  ;;  %v7695_v29 = vcombine.low %v7673_v49, %v7680_v51  ;;  %v7295_v16 = vcombine.high %v7287_v28, %v7287_v28  ;;  %v7303_v14 = vrot.slane %v7287_v28, %v12273_v59  ;;  %v11530_v28 = vld [vmem:[%s14903_s8] ss:$0 sm:$0xff] }
 0x57f   :  { %v7613_v7 = vcombine.low %v7605_v15, %v7612_v10  ;;  %v7687_v50 = vrot.slane %v7665_v44, %v12273_v59  ;;  %v7694_v26 = vrot.slane %v7666_v5, %v12273_v59  ;;  %v6897_v23 = vsel %vm2436_vm12, %v6877_v4, %v6846_v53 }
 0x580   :  { %v7296_v40 = vcombine.high %v7294_v34, %v7294_v34  ;;  %v7310_v41 = vrot.slane %v7294_v34, %v12273_v59  ;;  %v7317_v56 = vrot.slane %v7295_v16, %v12273_v59  ;;  %v7325_v38 = vcombine.high %v7303_v14, %v7303_v14 }
 0x581   :  { %v7713_v30 = vcombine.low %v7279_v12, %v7303_v14  ;;  %11807 = vmatmul.mubr.msk.bf16.gmra.mrb[68].mxu1 %vm7866_vm1, %v7613_v7  ;;  %v7335_v13 = vrot.slane %v6897_v23, %v12273_v59  ;;  %v7647_v54 = vcombine.low %v7638_v60, %v7645_v6  ;;  %v7722_v58 = vrot.slane %v7712_v62, %v12273_v59 }
 0x582   :  { %v7324_v45 = vrot.slane %v7296_v40, %v12273_v59  ;;  %v7326_v32 = vcombine.high %v7310_v41, %v7310_v41  ;;  %11810 = vmatprep.mubr.msk.bf16.mxu1 %vm11948_vm8, %v11946_v18  ;;  %v7327_v36 = vcombine.high %v7317_v56, %v7317_v56  ;;  %v7714_v52 = vcombine.low %v7317_v56, %v7325_v38 }
 0x583   :  { %v7729_v31 = vrot.slane %v7713_v30, %v12273_v59  ;;  %v7336_v20 = vcombine.high %v7335_v13, %v7335_v13  ;;  %v7343_v4 = vrot.slane %v7335_v13, %v12273_v59  ;;  %v7654_v3 = vrot.slane %v7646_v47, %v12273_v59 }
 0x584   :  { %v7761_v48 = vcombine.low %v7324_v45, %v7326_v32  ;;  %v7328_v46 = vcombine.high %v7324_v45, %v7324_v45  ;;  %v7715_v55 = vcombine.low %v7327_v36, %v7310_v41  ;;  %v7661_v25 = vrot.slane %v7647_v54, %v12273_v59 }
 0x585   :  { %v7744_v21 = vcombine.low %v7722_v58, %v7729_v31  ;;  %v7350_v2 = vrot.slane %v7336_v20, %v12273_v59  ;;  %v7351_v63 = vcombine.high %v7343_v4, %v7343_v4  ;;  %v7736_v10 = vrot.slane %v7714_v52, %v12273_v59 }
 0x586   :  { %v7762_v11 = vcombine.low %v7328_v46, %v7343_v4  ;;  %v7743_v37 = vrot.slane %v7715_v55, %v12273_v59  ;;  %v7662_v39 = vcombine.low %v7654_v3, %v7661_v25  ;;  %v7696_v9 = vcombine.low %v7687_v50, %v7694_v26 }
 0x587   :  { %v7770_v60 = vrot.slane %v7761_v48, %v12273_v59  ;;  %v7763_v33 = vcombine.low %v7350_v2, %v7351_v63  ;;  %v7703_v47 = vrot.slane %v7695_v29, %v12273_v59  ;;  %v7752_v19 = vrot.slane %v7744_v21, %v12273_v59  ;;  %v11912_v63 = vld [vmem:[%s14904_s9] sm:$0xff]  }
 0x588   :  { %v7777_v43 = vrot.slane %v7762_v11, %v12273_v59  ;;  %v7710_v42 = vrot.slane %v7696_v9, %v12273_v59  ;;  %v7745_v49 = vcombine.low %v7736_v10, %v7743_v37  ;;  %v7352_v15 = vcombine.high %v11530_v28, %v11530_v28  ;;  %11827 = vmatpush3.bf16.msra.mxu0 %v11912_v63 }
 0x589   :  { %11811 = vmatmul.mubr.msk.bf16.gmra.mrb[72].mxu1 %vm7866_vm1, %v7662_v39  ;;  %v7784_v35 = vrot.slane %v7763_v33, %v12273_v59  ;;  %v14060_v6 = vrot.slane %v11530_v28, %v12540_v8  ;;  %v11913_v39 = vld [vmem:[%s14904_s9 + $0x8] sm:$0xff]   ;;  %11828 = vmatprep.subr.bf16.mxu0 %v11946_v18  ;;  %vm11324_vm12 = vcmask 589312   ;;  %vm11448_vm15 = vcmask 50176  }
 0x58a   :  { %v7785_v1 = vcombine.low %v7770_v60, %v7777_v43  ;;  %11814 = vmatprep.mubr.msk.bf16.mxu1 %vm11948_vm8, %v11946_v18  ;;  %v7711_v22 = vcombine.low %v7703_v47, %v7710_v42  ;;  %v7759_v24 = vrot.slane %v7745_v49, %v12273_v59  ;;  %v14063_v5 = vrot.slane %v7352_v15, %v12540_v8 }
 0x58b   :  { %v7799_v0 = vrot.slane %v7784_v35, %v12273_v59  ;;  %v14067_v62 = vcombine.high %v14060_v6, %v14060_v6 }
 0x58c   :  { %v7792_v44 = vrot.slane %v7785_v1, %v12273_v59  ;;  %v7760_v51 = vcombine.low %v7752_v19, %v7759_v24  ;;  %v14071_v34 = vcombine.high %v14063_v5, %v14063_v5  ;;  %11829 = vmatpush3.bf16.msra.mxu0 %v11913_v39 }
 0x58d   :  { %v7819_v53 = vcombine.low %v14060_v6, %v14067_v62  ;;  %11830 = vmatprep.subr.bf16.mxu0 %v11946_v18 }
 0x58e   :  { %v7800_v12 = vcombine.low %v7792_v44, %v7799_v0  ;;  %v7820_v29 = vcombine.low %v14063_v5, %v14071_v34 }
 0x58f   :  { %v14078_v16 = vrot.slane %v7819_v53, %v12540_v8 }
 0x590   :  { %v7834_v14 = vrot.slane %v7820_v29, %v12540_v8 }
 0x591   :  { %11815 = vmatmul.mubr.msk.bf16.gmra.mrb[76].mxu1 %vm7866_vm1, %v7711_v22 }
 0x592   :  { %11818 = vmatprep.mubr.msk.bf16.mxu1 %vm11948_vm8, %v11946_v18  ;;  %v14082_v7 = vcombine.low %v14078_v16, %v7834_v14 }
 0x599   :  { %11819 = vmatmul.mubr.msk.bf16.gmra.mrb[80].mxu1 %vm7866_vm1, %v7760_v51 }
 0x59a   :  { %11822 = vmatprep.mubr.msk.bf16.mxu1 %vm11948_vm8, %v11946_v18 }
 0x5a1   :  { %11823 = vmatmul.mubr.msk.bf16.gmra.mrb[84].mxu1 %vm7866_vm1, %v7800_v12 }
 0x5a2   :  { %11878 = vmatprep.mubr.msk.bf16.mxu1 %vm11948_vm8, %v11946_v18 }
 0x60a   :  { %v7928_v50 = vpop.f32.mrb[52].mxu1 }
 0x60b   :  { %v7929_v26 = vadd.f32 %v7928_v50, %v14082_v7  ;;  %v11792_v40 = vpop.f32.mrb[53].mxu1 }
 0x60c   :  { %v7931_v41 = vpop.f32.mrb[54].mxu1 }
 0x60d   :  { %v8017_v56 = vcombine.high %v7929_v26, %v7929_v26  ;;  %v8024_v38 = vrot.slane %v7929_v26, %v12540_v8  ;;  %v7932_v30 = vadd.f32 %v7931_v41, %v14082_v7  ;;  %v11793_v23 = vpop.f32.mrb[55].mxu1 }
 0x60f   :  { %v8031_v45 = vrot.slane %v8017_v56, %v12540_v8  ;;  %v8032_v32 = vcombine.high %v8024_v38, %v8024_v38  ;;  %v8034_v13 = vcombine.high %v7932_v30, %v7932_v30  ;;  %v8041_v54 = vrot.slane %v7932_v30, %v12540_v8 }
 0x610   :  { %v8384_v4 = vmax.f32 %v8024_v38, 0.0 }
 0x611   :  { %v8033_v58 = vcombine.high %v8031_v45, %v8031_v45  ;;  %v8048_v36 = vrot.slane %v8034_v13, %v12540_v8  ;;  %v8385_v52 = vmax.f32 %v8032_v32, 0.0  ;;  %v8049_v31 = vcombine.high %v8041_v54, %v8041_v54 }
 0x612   :  { %v8386_v48 = vmax.f32 %v8031_v45, 0.0  ;;  %v8388_v55 = vmax.f32 %v8041_v54, 0.0 }
 0x613   :  { %v8387_v46 = vmax.f32 %v8033_v58, 0.0  ;;  %v8050_v20 = vcombine.high %v8048_v36, %v8048_v36  ;;  %v8389_v21 = vmax.f32 %v8049_v31, 0.0  ;;  %v8390_v25 = vmax.f32 %v8048_v36, 0.0 }
 0x614   :  { %v8524_v11 = vcombine.low %v8384_v4, %v8385_v52 }
 0x615   :  { %v8525_v3 = vcombine.low %v8386_v48, %v8387_v46  ;;  %v8391_v2 = vmax.f32 %v8050_v20, 0.0  ;;  %v8541_v10 = vcombine.low %v8388_v55, %v8389_v21 }
 0x616   :  { %v8532_v35 = vrot.slane %v8524_v11, %v12540_v8 }
 0x617   :  { %v8542_v37 = vcombine.low %v8390_v25, %v8391_v2  ;;  %v8539_v60 = vrot.slane %v8525_v3, %v12540_v8  ;;  %v8549_v47 = vrot.slane %v8541_v10, %v12540_v8 }
 0x619   :  { %v8556_v42 = vrot.slane %v8542_v37, %v12540_v8  ;;  %v8540_v0 = vcombine.low %v8532_v35, %v8539_v60 }
 0x61a   :  { %v7936_v9 = vpop.f32.mrb[56].mxu1 }
 0x61b   :  { %v7937_v33 = vadd.f32 %v7936_v9, %v14082_v7  ;;  %v11796_v43 = vpop.f32.mrb[57].mxu1  ;;  %v8557_v44 = vcombine.low %v8549_v47, %v8556_v42 }
 0x61c   :  { %v7939_v49 = vpop.f32.mrb[58].mxu1 }
 0x61d   :  { %v8051_v1 = vcombine.high %v7937_v33, %v7937_v33  ;;  %v8058_v22 = vrot.slane %v7937_v33, %v12540_v8  ;;  %v7940_v19 = vadd.f32 %v7939_v49, %v14082_v7  ;;  %v11797_v24 = vpop.f32.mrb[59].mxu1  ;;  %v8846_v53 = vpack.c.bf16 %v8557_v44, %v8540_v0 }
 0x61f   :  { %v8065_v51 = vrot.slane %v8051_v1, %v12540_v8  ;;  %v8066_v12 = vcombine.high %v8058_v22, %v8058_v22  ;;  %v8068_v28 = vcombine.high %v7940_v19, %v7940_v19  ;;  %v8075_v15 = vrot.slane %v7940_v19, %v12540_v8  ;;  %8989 = vrot.lane.b32.xlu0 %v8846_v53, %s11954_s20 }
 0x620   :  { %v8392_v26 = vmax.f32 %v8058_v22, 0.0  ;;  %v14108_v56 = vshrl.u32 %v8846_v53, 16  ;;  %v8870_v39 = vshll.u32 %v8846_v53, 16 }
 0x621   :  { %v8067_v29 = vcombine.high %v8065_v51, %v8065_v51  ;;  %v8393_v14 = vmax.f32 %v8066_v12, 0.0  ;;  %v8082_v50 = vrot.slane %v8068_v28, %v12540_v8  ;;  %v8083_v40 = vcombine.high %v8075_v15, %v8075_v15 }
 0x622   :  { %v7944_v41 = vpop.f32.mrb[60].mxu1  ;;  %v8394_v38 = vmax.f32 %v8065_v51, 0.0  ;;  %v8396_v13 = vmax.f32 %v8075_v15, 0.0  ;;  %v8869_v3 = vrot.slane %v14108_v56, 7 }
 0x623   :  { %v8395_v30 = vmax.f32 %v8067_v29, 0.0  ;;  %v8084_v23 = vcombine.high %v8082_v50, %v8082_v50  ;;  %v11800_v45 = vpop.f32.mrb[61].mxu1  ;;  %v8558_v32 = vcombine.low %v8392_v26, %v8393_v14  ;;  %v8397_v54 = vmax.f32 %v8083_v40, 0.0 }
 0x624   :  { %v7945_v58 = vadd.f32 %v7944_v41, %v14082_v7  ;;  %v7947_v36 = vpop.f32.mrb[62].mxu1  ;;  %v8398_v31 = vmax.f32 %v8082_v50, 0.0  ;;  %v14122_v44 = vor.u32 %v8870_v39, %v8869_v3  ;;  %v8945_v40 = vrot.slane %v8870_v39, 1 }
 0x625   :  { %v8559_v52 = vcombine.low %v8394_v38, %v8395_v30  ;;  %v8399_v48 = vmax.f32 %v8084_v23, 0.0  ;;  %v7948_v46 = vadd.f32 %v7947_v36, %v14082_v7  ;;  %v11801_v20 = vpop.f32.mrb[63].mxu1  ;;  %v8575_v4 = vcombine.low %v8396_v13, %v8397_v54 }
 0x626   :  { %v8085_v55 = vcombine.high %v7945_v58, %v7945_v58  ;;  %v8092_v21 = vrot.slane %v7945_v58, %v12540_v8  ;;  %v8566_v9 = vrot.slane %v8558_v32, %v12540_v8  ;;  %v8943_v14 = vsel %vm12169_vm5, %v14108_v56, %v14122_v44 }
 0x627   :  { %v8576_v25 = vcombine.low %v8398_v31, %v8399_v48  ;;  %v8102_v2 = vcombine.high %v7948_v46, %v7948_v46  ;;  %v8109_v63 = vrot.slane %v7948_v46, %v12540_v8  ;;  %v8573_v11 = vrot.slane %v8559_v52, %v12540_v8 }
 0x628   :  { %v8099_v10 = vrot.slane %v8085_v55, %v12540_v8  ;;  %v8100_v37 = vcombine.high %v8092_v21, %v8092_v21  ;;  %v8400_v60 = vmax.f32 %v8092_v21, 0.0  ;;  %v8583_v47 = vrot.slane %v8575_v4, %v12540_v8 }
 0x629   :  { %v8116_v33 = vrot.slane %v8102_v2, %v12540_v8  ;;  %v8117_v43 = vcombine.high %v8109_v63, %v8109_v63  ;;  %v8404_v35 = vmax.f32 %v8109_v63, 0.0  ;;  %v8590_v1 = vrot.slane %v8576_v25, %v12540_v8 }
 0x62a   :  { %v8101_v42 = vcombine.high %v8099_v10, %v8099_v10  ;;  %v8401_v49 = vmax.f32 %v8100_v37, 0.0  ;;  %v8574_v24 = vcombine.low %v8566_v9, %v8573_v11  ;;  %v8402_v0 = vmax.f32 %v8099_v10, 0.0 }
 0x62b   :  { %v8118_v22 = vcombine.high %v8116_v33, %v8116_v33  ;;  %v8405_v19 = vmax.f32 %v8117_v43, 0.0  ;;  %v8406_v12 = vmax.f32 %v8116_v33, 0.0  ;;  %v8591_v28 = vcombine.low %v8583_v47, %v8590_v1 }
 0x62c   :  { %v8403_v51 = vmax.f32 %v8101_v42, 0.0  ;;  %v8592_v15 = vcombine.low %v8400_v60, %v8401_v49  ;;  %v8946_v54 = vor.u32 %v8945_v40, %v14108_v56 }
 0x62d   :  { %v8407_v53 = vmax.f32 %v8118_v22, 0.0  ;;  %v8609_v29 = vcombine.low %v8404_v35, %v8405_v19  ;;  %v8847_v26 = vpack.c.bf16 %v8591_v28, %v8574_v24 }
 0x62e   :  { %v8593_v50 = vcombine.low %v8402_v0, %v8403_v51  ;;  %v8600_v45 = vrot.slane %v8592_v15, %v12540_v8 }
 0x62f   :  { %v8610_v41 = vcombine.low %v8406_v12, %v8407_v53  ;;  %8991 = vrot.lane.b32.xlu0 %v8847_v26, %s11954_s20  ;;  %v8877_v38 = vshll.u32 %v8847_v26, 16  ;;  %v8874_v23 = vshrl.u32 %v8847_v26, 16  ;;  %v8617_v32 = vrot.slane %v8609_v29, %v12540_v8  ;;  %v11914_v12 = vld [vmem:[%s14904_s9 + $0x10] ss:$0 sps:$4 sm:$0x33]  }
 0x630   :  { %v8607_v30 = vrot.slane %v8593_v50, %v12540_v8  ;;  %v10007_v26 = vsel %vm1286_vm6, %v11914_v12, 0  ;;  %vm9062_vm6 = vcmask 195584  }
 0x631   :  { %v8624_v13 = vrot.slane %v8610_v41, %v12540_v8  ;;  %v8947_v58 = vrot.slane %v8877_v38, 1  ;;  %v8876_v36 = vrot.slane %v8874_v23, 7  ;;  %11831 = vmatpush3.bf16.msra.mxu0 %v10007_v26 }
 0x632   :  { %v8608_v52 = vcombine.low %v8600_v45, %v8607_v30 }
 0x633   :  { %v8625_v31 = vcombine.low %v8617_v32, %v8624_v13  ;;  %v8948_v48 = vsel %vm165_vm0, %v8946_v54, %v8947_v58  ;;  %v8879_v46 = vor.u32 %v8877_v38, %v8876_v36  ;;  %v8949_v25 = vor.u32 %v8947_v58, %v8874_v23 }
 0x634   :  { %9011 = vrot.lane.b32.xlu1 %v8948_v48, %s11955_s1  ;;  %v7845_v48 = vcombine.low %v14067_v62, %v14063_v5 }
 0x635   :  { %v8848_v20 = vpack.c.bf16 %v8625_v31, %v8608_v52  ;;  %v14137_v4 = vsel %vm86_vm4, %v8869_v3, %v8879_v46  ;;  %v7846_v46 = vcombine.low %v14071_v34, %v14060_v6 }
 0x637   :  { %8993 = vrot.lane.b32.xlu0 %v8848_v20, %s11954_s20  ;;  %v8885_v55 = vshll.u32 %v8848_v20, 16  ;;  %v8882_v21 = vshrl.u32 %v8848_v20, 16 }
 0x638   :  { %v7952_v11 = vpop.f32.mrb[64].mxu1 }
 0x639   :  { %v8950_v2 = vrot.slane %v8885_v55, 1  ;;  %v8884_v63 = vrot.slane %v8882_v21, 7  ;;  %v7953_v10 = vadd.f32 %v7952_v11, %v14082_v7  ;;  %v11804_v37 = vpop.f32.mrb[65].mxu1 }
 0x63a   :  { %v7955_v60 = vpop.f32.mrb[66].mxu1  ;;  %v7860_v37 = vrot.slane %v7846_v46, %v12540_v8 }
 0x63b   :  { %v8951_v39 = vsel %vm165_vm0, %v8949_v25, %v8950_v2  ;;  %v8887_v9 = vor.u32 %v8885_v55, %v8884_v63  ;;  %v8119_v33 = vcombine.high %v7953_v10, %v7953_v10  ;;  %v8126_v3 = vrot.slane %v7953_v10, %v12540_v8  ;;  %v11805_v47 = vpop.f32.mrb[67].mxu1 }
 0x63c   :  { %9013 = vrot.lane.b32.xlu1 %v8951_v39, %s11955_s1  ;;  %v7956_v43 = vadd.f32 %v7955_v60, %v14082_v7  ;;  %v14168_v10 = vrot.slane %v7845_v48, %v12540_v8  ;;  %v8952_v39 = vor.u32 %v8950_v2, %v8882_v21 }
 0x63d   :  { %v14146_v42 = vsel %vm86_vm4, %v8876_v36, %v8887_v9  ;;  %v8133_v49 = vrot.slane %v8119_v33, %v12540_v8  ;;  %v8134_v35 = vcombine.high %v8126_v3, %v8126_v3  ;;  %v8408_v7 = vmax.f32 %v8126_v3, 0.0 }
 0x63e   :  { %v8136_v1 = vcombine.high %v7956_v43, %v7956_v43  ;;  %v8143_v22 = vrot.slane %v7956_v43, %v12540_v8  ;;  %v7836_v36 = vcombine.low %v14063_v5, %v14060_v6  ;;  %v14178_v34 = vcombine.low %v14168_v10, %v7860_v37 }
 0x63f   :  { %v8135_v19 = vcombine.high %v8133_v49, %v8133_v49  ;;  %v8409_v24 = vmax.f32 %v8134_v35, 0.0  ;;  %v8410_v28 = vmax.f32 %v8133_v49, 0.0 }
 0x640   :  { %v8150_v0 = vrot.slane %v8136_v1, %v12540_v8  ;;  %v8151_v51 = vcombine.high %v8143_v22, %v8143_v22  ;;  %v8412_v29 = vmax.f32 %v8143_v22, 0.0  ;;  %v7843_v55 = vrot.slane %v7836_v36, %v12540_v8 }
 0x641   :  { %v8411_v15 = vmax.f32 %v8135_v19, 0.0  ;;  %v8626_v40 = vcombine.low %v8408_v7, %v8409_v24 }
 0x642   :  { %v8152_v53 = vcombine.high %v8150_v0, %v8150_v0  ;;  %v8413_v50 = vmax.f32 %v8151_v51, 0.0  ;;  %v8414_v38 = vmax.f32 %v8150_v0, 0.0  ;;  %v7844_v5 = vcombine.low %v14078_v16, %v7843_v55 }
 0x643   :  { %v8627_v41 = vcombine.low %v8410_v28, %v8411_v15  ;;  %v8634_v13 = vrot.slane %v8626_v40, %v12540_v8 }
 0x644   :  { %v8415_v30 = vmax.f32 %v8152_v53, 0.0  ;;  %v8643_v23 = vcombine.low %v8412_v29, %v8413_v50 }
 0x645   :  { %v8641_v32 = vrot.slane %v8627_v41, %v12540_v8 }
 0x646   :  { %v8644_v45 = vcombine.low %v8414_v38, %v8415_v30  ;;  %v8651_v54 = vrot.slane %v8643_v23, %v12540_v8 }
 0x647   :  { %v8642_v52 = vcombine.low %v8634_v13, %v8641_v32 }
 0x648   :  { %v8658_v58 = vrot.slane %v8644_v45, %v12540_v8 }
 0x64a   :  { %v8659_v31 = vcombine.low %v8651_v54, %v8658_v58 }
 0x64c   :  { %v8849_v20 = vpack.c.bf16 %v8659_v31, %v8642_v52 }
 0x64e   :  { %8995 = vrot.lane.b32.xlu0 %v8849_v20, %s11954_s20  ;;  %v8893_v25 = vshll.u32 %v8849_v20, 16  ;;  %v8890_v11 = vshrl.u32 %v8849_v20, 16 }
 0x650   :  { %v8953_v9 = vrot.slane %v8893_v25, 1  ;;  %v14171_v60 = vrot.slane %v8890_v11, 7 }
 0x652   :  { %v8954_v6 = vsel %vm165_vm0, %v8952_v39, %v8953_v9  ;;  %v8895_v62 = vor.u32 %v8893_v25, %v14171_v60  ;;  %v8955_v45 = vor.u32 %v8953_v9, %v8890_v11 }
 0x653   :  { %9015 = vrot.lane.b32.xlu1 %v8954_v6, %s11955_s1 }
 0x654   :  { %v14181_v33 = vsel %vm86_vm4, %v8884_v63, %v8895_v62  ;;  %v7960_v3 = vpop.f32.mrb[68].mxu1 }
 0x655   :  { %v7961_v43 = vadd.f32 %v7960_v3, %v7844_v5  ;;  %v11808_v21 = vpop.f32.mrb[69].mxu1 }
 0x656   :  { %v7963_v2 = vpop.f32.mrb[70].mxu1 }
 0x657   :  { %v8153_v47 = vcombine.high %v7961_v43, %v7961_v43  ;;  %v8160_v49 = vrot.slane %v7961_v43, %v12540_v8  ;;  %v7964_v16 = vadd.f32 %v7963_v2, %v14178_v34  ;;  %v11809_v35 = vpop.f32.mrb[71].mxu1 }
 0x659   :  { %v8167_v1 = vrot.slane %v8153_v47, %v12540_v8  ;;  %v8168_v22 = vcombine.high %v8160_v49, %v8160_v49  ;;  %v8170_v19 = vcombine.high %v7964_v16, %v7964_v16  ;;  %v8416_v24 = vmax.f32 %v8160_v49, 0.0 }
 0x65a   :  { %v8177_v0 = vrot.slane %v7964_v16, %v12540_v8 }
 0x65b   :  { %v8169_v51 = vcombine.high %v8167_v1, %v8167_v1  ;;  %v8417_v63 = vmax.f32 %v8168_v22, 0.0  ;;  %v8418_v12 = vmax.f32 %v8167_v1, 0.0  ;;  %v8184_v7 = vrot.slane %v8170_v19, %v12540_v8 }
 0x65c   :  { %v8185_v28 = vcombine.high %v8177_v0, %v8177_v0  ;;  %v7968_v15 = vpop.f32.mrb[72].mxu1  ;;  %v8420_v26 = vmax.f32 %v8177_v0, 0.0 }
 0x65d   :  { %v8419_v53 = vmax.f32 %v8169_v51, 0.0  ;;  %v8660_v29 = vcombine.low %v8416_v24, %v8417_v63  ;;  %v8186_v50 = vcombine.high %v8184_v7, %v8184_v7  ;;  %v11812_v40 = vpop.f32.mrb[73].mxu1  ;;  %v8422_v38 = vmax.f32 %v8184_v7, 0.0 }
 0x65e   :  { %v8421_v41 = vmax.f32 %v8185_v28, 0.0  ;;  %v7969_v30 = vadd.f32 %v7968_v15, %v14178_v34  ;;  %v7971_v23 = vpop.f32.mrb[74].mxu1  ;;  %v8674_v13 = vrot.slane %v8418_v12, %v12540_v8 }
 0x65f   :  { %v8667_v32 = vrot.slane %v8660_v29, %v12540_v8  ;;  %v8676_v54 = vcombine.low %v8419_v53, %v8420_v26  ;;  %v7972_v58 = vadd.f32 %v7971_v23, %v14178_v34  ;;  %v11813_v36 = vpop.f32.mrb[75].mxu1  ;;  %v8423_v52 = vmax.f32 %v8186_v50, 0.0 }
 0x660   :  { %v8677_v31 = vcombine.low %v8421_v41, %v8422_v38  ;;  %v8187_v48 = vcombine.high %v7969_v30, %v7969_v30  ;;  %v8194_v46 = vrot.slane %v7969_v30, %v12540_v8 }
 0x661   :  { %v8675_v20 = vcombine.low %v8667_v32, %v8674_v13  ;;  %v8204_v55 = vcombine.high %v7972_v58, %v7972_v58  ;;  %v8211_v25 = vrot.slane %v7972_v58, %v12540_v8  ;;  %v8684_v37 = vrot.slane %v8676_v54, %v12540_v8 }
 0x662   :  { %v8201_v11 = vrot.slane %v8187_v48, %v12540_v8  ;;  %v8202_v39 = vcombine.high %v8194_v46, %v8194_v46  ;;  %v8424_v9 = vmax.f32 %v8194_v46, 0.0  ;;  %v8691_v5 = vrot.slane %v8677_v31, %v12540_v8 }
 0x663   :  { %v14197_v6 = vpack.c.bf16 %v8675_v20, %v8675_v20  ;;  %v8218_v62 = vrot.slane %v8204_v55, %v12540_v8  ;;  %v8219_v3 = vcombine.high %v8211_v25, %v8211_v25  ;;  %v8428_v43 = vmax.f32 %v8211_v25, 0.0 }
 0x664   :  { %v8203_v21 = vcombine.high %v8201_v11, %v8201_v11  ;;  %v8425_v2 = vmax.f32 %v8202_v39, 0.0  ;;  %v8426_v47 = vmax.f32 %v8201_v11, 0.0  ;;  %v8693_v49 = vcombine.low %v8423_v52, %v8424_v9  ;;  %v7976_v16 = vpop.f32.mrb[76].mxu1 }
 0x665   :  { %v8220_v35 = vcombine.high %v8218_v62, %v8218_v62  ;;  %v8429_v1 = vmax.f32 %v8219_v3, 0.0  ;;  %v8430_v22 = vmax.f32 %v8218_v62, 0.0  ;;  %v7977_v19 = vadd.f32 %v7976_v16, %v14178_v34  ;;  %v11816_v24 = vpop.f32.mrb[77].mxu1 }
 0x666   :  { %v8427_v0 = vmax.f32 %v8203_v21, 0.0  ;;  %v8694_v51 = vcombine.low %v8425_v2, %v8426_v47  ;;  %v7979_v63 = vpop.f32.mrb[78].mxu1  ;;  %v14202_v12 = vshll.u32 %v14197_v6, 16  ;;  %v8692_v7 = vcombine.low %v8684_v37, %v8691_v5 }
 0x667   :  { %v8431_v28 = vmax.f32 %v8220_v35, 0.0  ;;  %v8711_v15 = vcombine.low %v8429_v1, %v8430_v22  ;;  %v8221_v53 = vcombine.high %v7977_v19, %v7977_v19  ;;  %v8228_v29 = vrot.slane %v7977_v19, %v12540_v8  ;;  %v11817_v50 = vpop.f32.mrb[79].mxu1 }
 0x668   :  { %v8710_v26 = vcombine.low %v8427_v0, %v8428_v43  ;;  %v7980_v40 = vadd.f32 %v7979_v63, %v14178_v34  ;;  %v8956_v41 = vrot.slane %v14202_v12, 1  ;;  %v8701_v38 = vrot.slane %v8693_v49, %v12540_v8 }
 0x669   :  { %v8235_v30 = vrot.slane %v8221_v53, %v12540_v8  ;;  %v8236_v23 = vcombine.high %v8228_v29, %v8228_v29  ;;  %v8432_v32 = vmax.f32 %v8228_v29, 0.0  ;;  %v8708_v13 = vrot.slane %v8694_v51, %v12540_v8 }
 0x66a   :  { %v8238_v54 = vcombine.high %v7980_v40, %v7980_v40  ;;  %v8245_v58 = vrot.slane %v7980_v40, %v12540_v8  ;;  %v8957_v36 = vsel %vm165_vm0, %v8955_v45, %v8956_v41  ;;  %v8718_v52 = vrot.slane %v8710_v26, %v12540_v8 }
 0x66b   :  { %v8237_v31 = vcombine.high %v8235_v30, %v8235_v30  ;;  %v8433_v48 = vmax.f32 %v8236_v23, 0.0  ;;  %v8434_v46 = vmax.f32 %v8235_v30, 0.0  ;;  %v8727_v20 = vcombine.low %v8431_v28, %v8432_v32  ;;  %9017 = vrot.lane.b32.xlu1 %v8957_v36, %s11955_s1 }
 0x66c   :  { %v8252_v55 = vrot.slane %v8238_v54, %v12540_v8  ;;  %v8253_v25 = vcombine.high %v8245_v58, %v8245_v58  ;;  %v8436_v37 = vmax.f32 %v8245_v58, 0.0  ;;  %v7984_v11 = vpop.f32.mrb[80].mxu1  ;;  %v8709_v39 = vcombine.low %v8701_v38, %v8708_v13 }
 0x66d   :  { %v8435_v9 = vmax.f32 %v8237_v31, 0.0  ;;  %v8728_v5 = vcombine.low %v8433_v48, %v8434_v46  ;;  %v7985_v62 = vadd.f32 %v7984_v11, %v14178_v34  ;;  %v11820_v3 = vpop.f32.mrb[81].mxu1  ;;  %v8725_v45 = vrot.slane %v8711_v15, %v12540_v8 }
 0x66e   :  { %v8254_v43 = vcombine.high %v8252_v55, %v8252_v55  ;;  %v8437_v21 = vmax.f32 %v8253_v25, 0.0  ;;  %v8438_v2 = vmax.f32 %v8252_v55, 0.0  ;;  %v14219_v47 = vpack.c.bf16 %v8709_v39, %v8692_v7  ;;  %v7987_v49 = vpop.f32.mrb[82].mxu1 }
 0x66f   :  { %v14221_v16 = vcombine.low %v8435_v9, %v8436_v37  ;;  %v8255_v35 = vcombine.high %v7985_v62, %v7985_v62  ;;  %v8262_v1 = vrot.slane %v7985_v62, %v12540_v8  ;;  %v7988_v22 = vadd.f32 %v7987_v49, %v14178_v34  ;;  %v11821_v19 = vpop.f32.mrb[83].mxu1 }
 0x670   :  { %v8439_v24 = vmax.f32 %v8254_v43, 0.0  ;;  %v8745_v0 = vcombine.low %v8437_v21, %v8438_v2  ;;  %v14226_v51 = vshrl.u32 %v14219_v47, 16  ;;  %v8906_v63 = vshll.u32 %v14219_v47, 16  ;;  %8999 = vrot.lane.b32.xlu0 %v14219_v47, %s11954_s20 }
 0x671   :  { %v8269_v7 = vrot.slane %v8255_v35, %v12540_v8  ;;  %v8270_v28 = vcombine.high %v8262_v1, %v8262_v1  ;;  %v8440_v15 = vmax.f32 %v8262_v1, 0.0  ;;  %v8272_v53 = vcombine.high %v7988_v22, %v7988_v22 }
 0x672   :  { %v8279_v29 = vrot.slane %v7988_v22, %v12540_v8  ;;  %v8726_v50 = vcombine.low %v8718_v52, %v8725_v45  ;;  %v8735_v26 = vrot.slane %v8727_v20, %v12540_v8  ;;  %v8742_v40 = vrot.slane %v8728_v5, %v12540_v8 }
 0x673   :  { %v8271_v38 = vcombine.high %v8269_v7, %v8269_v7  ;;  %v8441_v30 = vmax.f32 %v8270_v28, 0.0  ;;  %v8442_v23 = vmax.f32 %v8269_v7, 0.0  ;;  %v8761_v32 = vcombine.low %v8439_v24, %v8440_v15 }
 0x674   :  { %v8286_v13 = vrot.slane %v8272_v53, %v12540_v8  ;;  %v8287_v54 = vcombine.high %v8279_v29, %v8279_v29  ;;  %v8444_v58 = vmax.f32 %v8279_v29, 0.0  ;;  %8997 = vrot.lane.b32.xlu0 %v14197_v6, %s11954_s20  ;;  %v7992_v36 = vpop.f32.mrb[84].mxu1  ;;  %v8743_v31 = vcombine.low %v8735_v26, %v8742_v40 }
 0x675   :  { %v8443_v48 = vmax.f32 %v8271_v38, 0.0  ;;  %v8762_v46 = vcombine.low %v8441_v30, %v8442_v23  ;;  %v7993_v52 = vadd.f32 %v7992_v36, %v14178_v34  ;;  %v11824_v20 = vpop.f32.mrb[85].mxu1  ;;  %v8959_v55 = vrot.slane %v8906_v63, 1 }
 0x676   :  { %v8288_v25 = vcombine.high %v8286_v13, %v8286_v13  ;;  %v8445_v37 = vmax.f32 %v8287_v54, 0.0  ;;  %v8446_v11 = vmax.f32 %v8286_v13, 0.0  ;;  %v8852_v39 = vpack.c.bf16 %v8743_v31, %v8726_v50  ;;  %v7995_v9 = vpop.f32.mrb[86].mxu1 }
 0x677   :  { %v8778_v5 = vcombine.low %v8443_v48, %v8444_v58  ;;  %v8289_v62 = vcombine.high %v7993_v52, %v7993_v52  ;;  %v8296_v3 = vrot.slane %v7993_v52, %v12540_v8  ;;  %v7996_v45 = vadd.f32 %v7995_v9, %v14168_v10  ;;  %v11825_v43 = vpop.f32.mrb[87].mxu1 }
 0x678   :  { %v8447_v21 = vmax.f32 %v8288_v25, 0.0  ;;  %v8779_v2 = vcombine.low %v8445_v37, %v8446_v11  ;;  %9001 = vrot.lane.b32.xlu0 %v8852_v39, %s11954_s20  ;;  %v8913_v34 = vshll.u32 %v8852_v39, 16  ;;  %v8960_v49 = vor.u32 %v8959_v55, %v14226_v51 }
 0x679   :  { %v8303_v35 = vrot.slane %v8289_v62, %v12540_v8  ;;  %v8304_v1 = vcombine.high %v8296_v3, %v8296_v3  ;;  %v8448_v22 = vmax.f32 %v8296_v3, 0.0  ;;  %v8312_v19 = vrot.slane %v7996_v45, %v12540_v8 }
 0x67a   :  { %v8961_v24 = vrot.slane %v8913_v34, 1  ;;  %v8752_v7 = vrot.slane %v14221_v16, %v12540_v8  ;;  %v8759_v10 = vrot.slane %v8745_v0, %v12540_v8  ;;  %v8769_v28 = vrot.slane %v8761_v32, %v12540_v8 }
 0x67b   :  { %v8305_v15 = vcombine.high %v8303_v35, %v8303_v35  ;;  %v8449_v53 = vmax.f32 %v8304_v1, 0.0  ;;  %v8450_v29 = vmax.f32 %v8303_v35, 0.0  ;;  %v8795_v50 = vcombine.low %v8447_v21, %v8448_v22 }
 0x67c   :  { %v8313_v26 = vcombine.high %v8312_v19, %v8312_v19  ;;  %v8452_v40 = vmax.f32 %v8312_v19, 0.0  ;;  %v8962_v38 = vsel %vm165_vm0, %v8960_v49, %v8961_v24  ;;  %v8760_v30 = vcombine.low %v8752_v7, %v8759_v10 }
 0x67d   :  { %v8451_v23 = vmax.f32 %v8305_v15, 0.0  ;;  %v8796_v13 = vcombine.low %v8449_v53, %v8450_v29  ;;  %9021 = vrot.lane.b32.xlu1 %v8962_v38, %s11955_s1  ;;  %v8776_v54 = vrot.slane %v8762_v46, %v12540_v8  ;;  %v8898_v16 = vshrl.u32 %v14197_v6, 16 }
 0x67e   :  { %v8453_v0 = vmax.f32 %v8313_v26, 0.0  ;;  %v8910_v58 = vshrl.u32 %v8852_v39, 16  ;;  %v8786_v32 = vrot.slane %v8778_v5, %v12540_v8  ;;  %v8793_v36 = vrot.slane %v8779_v2, %v12540_v8 }
 0x67f   :  { %v8812_v31 = vcombine.low %v8451_v23, %v8452_v40  ;;  %v8777_v48 = vcombine.low %v8769_v28, %v8776_v54  ;;  %v8900_v52 = vrot.slane %v8898_v16, 7  ;;  %v8958_v20 = vor.u32 %v8956_v41, %v8898_v16 }
 0x680   :  { %v8826_v55 = vrot.slane %v8453_v0, %v12540_v8  ;;  %v8912_v25 = vrot.slane %v8910_v58, 7  ;;  %v8794_v37 = vcombine.low %v8786_v32, %v8793_v36  ;;  %v8803_v39 = vrot.slane %v8795_v50, %v12540_v8 }
 0x681   :  { %v8819_v46 = vrot.slane %v8812_v31, %v12540_v8  ;;  %v8853_v11 = vpack.c.bf16 %v8777_v48, %v8760_v30  ;;  %v8977_v6 = vsel %vm12209_vm7, %v8958_v20, %v14202_v12  ;;  %v8810_v9 = vrot.slane %v8796_v13, %v12540_v8 }
 0x682   :  { %9019 = vrot.lane.b32.xlu1 %v8977_v6, %s11955_s1  ;;  %v8905_v5 = vrot.slane %v14226_v51, 7  ;;  %v8903_v41 = vor.u32 %v14202_v12, %v8900_v52  ;;  %v8915_v62 = vor.u32 %v8913_v34, %v8912_v25  ;;  %v8963_v1 = vor.u32 %v8961_v24, %v8910_v58 }
 0x683   :  { %9003 = vrot.lane.b32.xlu0 %v8853_v11, %s11954_s20  ;;  %v8921_v3 = vshll.u32 %v8853_v11, 16  ;;  %v8827_v45 = vcombine.low %v8819_v46, %v8826_v55  ;;  %v8918_v43 = vshrl.u32 %v8853_v11, 16  ;;  %v8811_v21 = vcombine.low %v8803_v39, %v8810_v9 }
 0x684   :  { %v14272_v2 = vor.u32 %v8906_v63, %v8905_v5  ;;  %v14276_v49 = vsel %vm86_vm4, %v14171_v60, %v8903_v41  ;;  %v14279_v35 = vsel %vm86_vm4, %v8905_v5, %v8915_v62 }
 0x685   :  { %v8964_v12 = vrot.slane %v8921_v3, 1  ;;  %v8855_v34 = vpack.c.bf16 %v8827_v45, %v8827_v45  ;;  %v8920_v22 = vrot.slane %v8918_v43, 7  ;;  %v8854_v19 = vpack.c.bf16 %v8811_v21, %v8794_v37 }
 0x686   :  { %v8944_v7 = vsel %vm12169_vm5, %v14226_v51, %v14272_v2  ;;  %vm11282_vm5 = vcmask 195712  }
 0x687   :  { %v8965_v47 = vsel %vm165_vm0, %v8963_v1, %v8964_v12  ;;  %v8937_v63 = vshll.u32 %v8855_v34, 16  ;;  %v8934_v10 = vshrl.u32 %v8855_v34, 16  ;;  %9005 = vrot.lane.b32.xlu0 %v8854_v19, %s11954_s20  ;;  %v8929_v60 = vshll.u32 %v8854_v19, 16 }
 0x688   :  { %9023 = vrot.lane.b32.xlu1 %v8965_v47, %s11955_s1  ;;  %v8926_v28 = vshrl.u32 %v8854_v19, 16  ;;  %v8923_v24 = vor.u32 %v8921_v3, %v8920_v22  ;;  %v8966_v15 = vor.u32 %v8964_v12, %v8918_v43 }
 0x689   :  { %v8936_v53 = vrot.slane %v8934_v10, 7  ;;  %v8967_v29 = vrot.slane %v8929_v60, 1  ;;  %v8970_v26 = vrot.slane %v8937_v63, 1 }
 0x68a   :  { %v8928_v50 = vrot.slane %v8926_v28, 7  ;;  %v14289_v40 = vsel %vm86_vm4, %v8912_v25, %v8923_v24 }
 0x68b   :  { %v8939_v38 = vor.u32 %v8937_v63, %v8936_v53  ;;  %9007 = vrot.lane.b32.xlu0 %v8855_v34, %s11954_s20  ;;  %v8968_v30 = vsel %vm165_vm0, %v8966_v15, %v8967_v29  ;;  %v8969_v23 = vor.u32 %v8967_v29, %v8926_v28  ;;  %v8972_v58 = vor.u32 %v8970_v26, %v8934_v10 }
 0x68c   :  { %v8931_v13 = vor.u32 %v8929_v60, %v8928_v50  ;;  %9025 = vrot.lane.b32.xlu1 %v8968_v30, %s11955_s1 }
 0x68d   :  { %v14295_v54 = vsel %vm86_vm4, %v8928_v50, %v8939_v38  ;;  %v8971_v16 = vsel %vm165_vm0, %v8969_v23, %v8970_v26  ;;  %v8978_v32 = vsel %vm12209_vm7, %v8972_v58, %v8937_v63  ;;  %vm9978_vm0 = vcmask 293888  }
 0x68e   :  { %v14299_v0 = vsel %vm86_vm4, %v8920_v22, %v8931_v13  ;;  %vm11179_vm4 = vcmask 95232   ;;  %vm11289_vm7 = vcmask 261312  }
 0x690   :  { %9027 = vrot.lane.b32.xlu1 %v8971_v16, %s11955_s1 }
 0x691   :  { %v8990_v36 = vpop.permute.xlu0 %8989 }
 0x692   :  { %v9034_v31 = vsel %vm9031_vm3, %v8943_v14, %v8990_v36 }
 0x694   :  { %9029 = vrot.lane.b32.xlu1 %v8978_v32, %s11955_s1 }
 0x6a1   :  { %v8992_v27 = vpop.permute.xlu0 %8991 }
 0x6a2   :  { %v9037_v56 = vsel %vm9031_vm3, %v14137_v4, %v8992_v27 }
 0x6a6   :  { %v9012_v48 = vpop.permute.xlu1 %9011 }
 0x6a7   :  { %v9064_v52 = vsel %vm9062_vm6, %v9034_v31, %v9012_v48 }
 0x6a8   :  { %v9093_v20 = vcombine.high %v9064_v52, %v9064_v52  ;;  %v9100_v55 = vrot.slane %v9064_v52, %v12273_v59 }
 0x6aa   :  { %v9107_v25 = vrot.slane %v9093_v20, %v12273_v59  ;;  %v9108_v37 = vcombine.high %v9100_v55, %v9100_v55  ;;  %v9116_v11 = vrot.slane %v9100_v55, %v12273_v59  ;;  %v8994_v20 = vpop.permute.xlu0 %8993 }
 0x6ab   :  { %v9040_v55 = vsel %vm9031_vm3, %v14146_v42, %v8994_v20 }
 0x6ac   :  { %v9109_v46 = vcombine.high %v9107_v25, %v9107_v25  ;;  %v9130_v6 = vrot.slane %v9108_v37, %v12273_v59  ;;  %v9123_v44 = vrot.slane %v9107_v25, %v12273_v59 }
 0x6ae   :  { %v9014_v14 = vpop.permute.xlu1 %9013  ;;  %v9137_v39 = vrot.slane %v9109_v46, %v12273_v59  ;;  %v9531_v9 = vcombine.low %v9116_v11, %v9130_v6  ;;  %v11551_v5 = vcombine.high %v9116_v11, %v9130_v6 }
 0x6af   :  { %v9066_v41 = vsel %vm9062_vm6, %v9037_v56, %v9014_v14 }
 0x6b0   :  { %v9142_v62 = vcombine.high %v9066_v41, %v9066_v41  ;;  %v9149_v3 = vrot.slane %v9066_v41, %v12273_v59  ;;  %v9533_v45 = vcombine.low %v9123_v44, %v9137_v39  ;;  %v11552_v43 = vcombine.high %v9123_v44, %v9137_v39 }
 0x6b1   :  { %v9541_v21 = vrot.slane %v9531_v9, %v12273_v59  ;;  %v9548_v1 = vrot.slane %v11551_v5, %v12273_v59 }
 0x6b2   :  { %v9156_v4 = vrot.slane %v9142_v62, %v12273_v59  ;;  %v9157_v12 = vcombine.high %v9149_v3, %v9149_v3  ;;  %v9555_v34 = vrot.slane %v9533_v45, %v12273_v59  ;;  %v9562_v22 = vrot.slane %v11552_v43, %v12273_v59 }
 0x6b3   :  { %v9563_v19 = vcombine.low %v9541_v21, %v9548_v1  ;;  %v9165_v63 = vrot.slane %v9149_v3, %v12273_v59 }
 0x6b4   :  { %v9158_v47 = vcombine.high %v9156_v4, %v9156_v4  ;;  %v9179_v10 = vrot.slane %v9157_v12, %v12273_v59  ;;  %v9564_v60 = vcombine.low %v9555_v34, %v9562_v22  ;;  %v9172_v28 = vrot.slane %v9156_v4, %v12273_v59 }
 0x6b5   :  { %v9571_v29 = vrot.slane %v9563_v19, %v12273_v59 }
 0x6b6   :  { %v9186_v24 = vrot.slane %v9158_v47, %v12273_v59  ;;  %v9580_v15 = vcombine.low %v9165_v63, %v9179_v10  ;;  %v11553_v53 = vcombine.high %v9165_v63, %v9179_v10  ;;  %v9578_v50 = vrot.slane %v9564_v60, %v12273_v59 }
 0x6b8   :  { %v9582_v26 = vcombine.low %v9172_v28, %v9186_v24  ;;  %v11554_v38 = vcombine.high %v9172_v28, %v9186_v24  ;;  %v9590_v30 = vrot.slane %v9580_v15, %v12273_v59  ;;  %v9597_v23 = vrot.slane %v11553_v53, %v12273_v59 }
 0x6b9   :  { %v9579_v13 = vcombine.low %v9571_v29, %v9578_v50 }
 0x6ba   :  { %v9604_v16 = vrot.slane %v9582_v26, %v12273_v59  ;;  %v9611_v58 = vrot.slane %v11554_v38, %v12273_v59  ;;  %v9612_v32 = vcombine.low %v9590_v30, %v9597_v23 }
 0x6bb   :  { %11833 = vmatmul.mubr.msk.bf16.vlgmr.msra.gmra.mrb[56].mxu0 %vm9978_vm0, %v9579_v13 }
 0x6bc   :  { %11836 = vmatprep.mubr.msk.bf16.mxu0 %vm11948_vm8, %v11946_v18  ;;  %v9613_v36 = vcombine.low %v9604_v16, %v9611_v58  ;;  %v9620_v31 = vrot.slane %v9612_v32, %v12273_v59 }
 0x6be   :  { %v9627_v48 = vrot.slane %v9613_v36, %v12273_v59 }
 0x6c0   :  { %v9628_v52 = vcombine.low %v9620_v31, %v9627_v48  ;;  %v8996_v19 = vpop.permute.xlu0 %8995 }
 0x6c1   :  { %v9043_v47 = vsel %vm9031_vm3, %v14181_v33, %v8996_v19 }
 0x6c3   :  { %11837 = vmatmul.mubr.msk.bf16.gmra.mrb[60].mxu0 %vm9978_vm0, %v9628_v52 }
 0x6c4   :  { %11840 = vmatprep.mubr.msk.bf16.mxu0 %vm11948_vm8, %v11946_v18 }
 0x6c5   :  { %v9016_v27 = vpop.permute.xlu1 %9015 }
 0x6c6   :  { %v9068_v25 = vsel %vm9062_vm6, %v9040_v55, %v9016_v27 }
 0x6c7   :  { %v9191_v37 = vcombine.high %v9068_v25, %v9068_v25  ;;  %v9198_v46 = vrot.slane %v9068_v25, %v12273_v59 }
 0x6c9   :  { %v9205_v11 = vrot.slane %v9191_v37, %v12273_v59  ;;  %v9206_v6 = vcombine.high %v9198_v46, %v9198_v46  ;;  %v9214_v44 = vrot.slane %v9198_v46, %v12273_v59 }
 0x6cb   :  { %v9207_v56 = vcombine.high %v9205_v11, %v9205_v11  ;;  %v9228_v14 = vrot.slane %v9206_v6, %v12273_v59  ;;  %v9221_v39 = vrot.slane %v9205_v11, %v12273_v59 }
 0x6cd   :  { %v9235_v9 = vrot.slane %v9207_v56, %v12273_v59  ;;  %v9629_v5 = vcombine.low %v9214_v44, %v9228_v14  ;;  %v11555_v42 = vcombine.high %v9214_v44, %v9228_v14 }
 0x6cf   :  { %v9631_v41 = vcombine.low %v9221_v39, %v9235_v9  ;;  %v11556_v62 = vcombine.high %v9221_v39, %v9235_v9  ;;  %v9639_v3 = vrot.slane %v9629_v5, %v12273_v59  ;;  %v9646_v45 = vrot.slane %v11555_v42, %v12273_v59 }
 0x6d1   :  { %v9653_v43 = vrot.slane %v9631_v41, %v12273_v59  ;;  %v9660_v21 = vrot.slane %v11556_v62, %v12273_v59  ;;  %v9661_v1 = vcombine.low %v9639_v3, %v9646_v45 }
 0x6d3   :  { %v9662_v4 = vcombine.low %v9653_v43, %v9660_v21  ;;  %v9669_v12 = vrot.slane %v9661_v1, %v12273_v59 }
 0x6d5   :  { %v9676_v34 = vrot.slane %v9662_v4, %v12273_v59 }
 0x6d7   :  { %v9677_v22 = vcombine.low %v9669_v12, %v9676_v34 }
 0x6d9   :  { %11841 = vmatmul.mubr.msk.bf16.gmra.mrb[64].mxu0 %vm9978_vm0, %v9677_v22 }
 0x6da   :  { %11844 = vmatprep.mubr.msk.bf16.mxu0 %vm11948_vm8, %v11946_v18 }
 0x6dd   :  { %v9018_v63 = vpop.permute.xlu1 %9017 }
 0x6de   :  { %v9070_v10 = vsel %vm9062_vm6, %v9043_v47, %v9018_v63 }
 0x6df   :  { %v9240_v60 = vcombine.high %v9070_v10, %v9070_v10  ;;  %v9247_v28 = vrot.slane %v9070_v10, %v12273_v59 }
 0x6e1   :  { %v9254_v24 = vrot.slane %v9240_v60, %v12273_v59  ;;  %v9255_v15 = vcombine.high %v9247_v28, %v9247_v28  ;;  %v9263_v29 = vrot.slane %v9247_v28, %v12273_v59 }
 0x6e2   :  { %v9000_v23 = vpop.permute.xlu0 %8999 }
 0x6e3   :  { %v9256_v53 = vcombine.high %v9254_v24, %v9254_v24  ;;  %v9277_v50 = vrot.slane %v9255_v15, %v12273_v59  ;;  %v9270_v26 = vrot.slane %v9254_v24, %v12273_v59  ;;  %v9049_v25 = vsel %vm9031_vm3, %v8944_v7, %v9000_v23 }
 0x6e5   :  { %v9284_v38 = vrot.slane %v9256_v53, %v12273_v59  ;;  %v9678_v30 = vcombine.low %v9263_v29, %v9277_v50  ;;  %v11557_v33 = vcombine.high %v9263_v29, %v9277_v50 }
 0x6e6   :  { %v8998_v20 = vpop.permute.xlu0 %8997 }
 0x6e7   :  { %v9680_v13 = vcombine.low %v9270_v26, %v9284_v38  ;;  %v11558_v16 = vcombine.high %v9270_v26, %v9284_v38  ;;  %v9688_v58 = vrot.slane %v9678_v30, %v12273_v59  ;;  %v9695_v32 = vrot.slane %v11557_v33, %v12273_v59 }
 0x6e8   :  { %v9046_v2 = vsel %vm9031_vm3, %v14276_v49, %v8998_v20 }
 0x6e9   :  { %v9702_v36 = vrot.slane %v9680_v13, %v12273_v59  ;;  %v9709_v31 = vrot.slane %v11558_v16, %v12273_v59  ;;  %v9710_v48 = vcombine.low %v9688_v58, %v9695_v32 }
 0x6ea   :  { %v9002_v44 = vpop.permute.xlu0 %9001 }
 0x6eb   :  { %v9711_v52 = vcombine.low %v9702_v36, %v9709_v31  ;;  %v9718_v55 = vrot.slane %v9710_v48, %v12273_v59  ;;  %v9052_v49 = vsel %vm9031_vm3, %v14279_v35, %v9002_v44 }
 0x6ed   :  { %v9725_v27 = vrot.slane %v9711_v52, %v12273_v59 }
 0x6ef   :  { %v9022_v37 = vpop.permute.xlu1 %9021  ;;  %v9726_v46 = vcombine.low %v9718_v55, %v9725_v27 }
 0x6f0   :  { %v9074_v11 = vsel %vm9062_vm6, %v9049_v25, %v9022_v37 }
 0x6f1   :  { %v9312_v6 = vcombine.high %v9074_v11, %v9074_v11  ;;  %v9319_v56 = vrot.slane %v9074_v11, %v12273_v59  ;;  %11845 = vmatmul.mubr.msk.bf16.gmra.mrb[68].mxu0 %vm9978_vm0, %v9726_v46 }
 0x6f2   :  { %11848 = vmatprep.mubr.msk.bf16.mxu0 %vm11948_vm8, %v11946_v18 }
 0x6f3   :  { %v9326_v17 = vrot.slane %v9312_v6, %v12273_v59  ;;  %v9327_v14 = vcombine.high %v9319_v56, %v9319_v56  ;;  %v9335_v51 = vrot.slane %v9319_v56, %v12273_v59 }
 0x6f4   :  { %v9020_v7 = vpop.permute.xlu1 %9019 }
 0x6f5   :  { %v9328_v39 = vcombine.high %v9326_v17, %v9326_v17  ;;  %v9342_v9 = vrot.slane %v9326_v17, %v12273_v59  ;;  %v9349_v5 = vrot.slane %v9327_v14, %v12273_v59  ;;  %v9357_v42 = vcombine.high %v9335_v51, %v9335_v51  ;;  %v9004_v41 = vpop.permute.xlu0 %9003 }
 0x6f6   :  { %v9072_v62 = vsel %vm9062_vm6, %v9046_v2, %v9020_v7  ;;  %v9055_v35 = vsel %vm9031_vm3, %v14289_v40, %v9004_v41 }
 0x6f7   :  { %v9356_v3 = vrot.slane %v9328_v39, %v12273_v59  ;;  %v9358_v45 = vcombine.high %v9342_v9, %v9342_v9  ;;  %v9359_v43 = vcombine.high %v9349_v5, %v9349_v5  ;;  %v9295_v21 = vrot.slane %v9072_v62, %v12273_v59 }
 0x6f8   :  { %v9729_v1 = vcombine.low %v9349_v5, %v9357_v42 }
 0x6f9   :  { %v9730_v4 = vcombine.low %v9359_v43, %v9342_v9  ;;  %v9776_v12 = vcombine.low %v9356_v3, %v9358_v45  ;;  %v9296_v34 = vcombine.high %v9295_v21, %v9295_v21  ;;  %v9303_v22 = vrot.slane %v9295_v21, %v12273_v59  ;;  %v9006_v47 = vpop.permute.xlu0 %9005 }
 0x6fa   :  { %v9024_v19 = vpop.permute.xlu1 %9023  ;;  %v9751_v53 = vrot.slane %v9729_v1, %v12273_v59  ;;  %v9360_v29 = vcombine.high %v9356_v3, %v9356_v3  ;;  %v9058_v16 = vsel %vm9031_vm3, %v14299_v0, %v9006_v47 }
 0x6fb   :  { %v9758_v63 = vrot.slane %v9730_v4, %v12273_v59  ;;  %v9076_v10 = vsel %vm9062_vm6, %v9052_v49, %v9024_v19  ;;  %v9310_v60 = vrot.slane %v9296_v34, %v12273_v59  ;;  %v9311_v28 = vcombine.high %v9303_v22, %v9303_v22 }
 0x6fc   :  { %v9361_v24 = vcombine.high %v9076_v10, %v9076_v10  ;;  %v9368_v15 = vrot.slane %v9076_v10, %v12273_v59  ;;  %v9786_v50 = vrot.slane %v9776_v12, %v12273_v59 }
 0x6fd   :  { %v9727_v26 = vcombine.low %v9303_v22, %v9310_v60  ;;  %v9728_v38 = vcombine.low %v9311_v28, %v9335_v51  ;;  %v9008_v23 = vpop.permute.xlu0 %9007  ;;  %v14417_v40 = vcombine.low %v9751_v53, %v9758_v63 }
 0x6fe   :  { %v9375_v30 = vrot.slane %v9361_v24, %v12273_v59  ;;  %v9376_v33 = vcombine.high %v9368_v15, %v9368_v15  ;;  %v9384_v13 = vrot.slane %v9368_v15, %v12273_v59  ;;  %v14415_v58 = vsel %vm9031_vm3, %v14295_v54, %v9008_v23  ;;  %v9026_v32 = vpop.permute.xlu1 %9025 }
 0x6ff   :  { %v9737_v36 = vrot.slane %v9727_v26, %v12273_v59  ;;  %v9744_v31 = vrot.slane %v9728_v38, %v12273_v59  ;;  %v9078_v0 = vsel %vm9062_vm6, %v9055_v35, %v9026_v32  ;;  %v9774_v7 = vrot.slane %v14417_v40, %v12273_v59 }
 0x700   :  { %v9377_v48 = vcombine.high %v9375_v30, %v9375_v30  ;;  %v9391_v52 = vrot.slane %v9375_v30, %v12273_v59  ;;  %v9398_v20 = vrot.slane %v9376_v33, %v12273_v59  ;;  %v9406_v55 = vcombine.high %v9384_v13, %v9384_v13 }
 0x701   :  { %v9777_v27 = vcombine.low %v9360_v29, %v9384_v13  ;;  %v9759_v25 = vcombine.low %v9737_v36, %v9744_v31  ;;  %v9410_v46 = vcombine.high %v9078_v0, %v9078_v0  ;;  %v9417_v44 = vrot.slane %v9078_v0, %v12273_v59 }
 0x702   :  { %v9405_v54 = vrot.slane %v9377_v48, %v12273_v59  ;;  %v9407_v37 = vcombine.high %v9391_v52, %v9391_v52  ;;  %v9408_v11 = vcombine.high %v9398_v20, %v9398_v20  ;;  %v9778_v6 = vcombine.low %v9398_v20, %v9406_v55  ;;  %v9028_v17 = vpop.permute.xlu1 %9027 }
 0x703   :  { %v9793_v56 = vrot.slane %v9777_v27, %v12273_v59  ;;  %v9424_v51 = vrot.slane %v9410_v46, %v12273_v59  ;;  %v9080_v2 = vsel %vm9062_vm6, %v9058_v16, %v9028_v17  ;;  %v9425_v42 = vcombine.high %v9417_v44, %v9417_v44 }
 0x704   :  { %v9825_v14 = vcombine.low %v9405_v54, %v9407_v37  ;;  %v9779_v39 = vcombine.low %v9408_v11, %v9391_v52  ;;  %v9409_v5 = vcombine.high %v9405_v54, %v9405_v54  ;;  %v9800_v41 = vrot.slane %v9778_v6, %v12273_v59 }
 0x705   :  { %v9808_v9 = vcombine.low %v9786_v50, %v9793_v56  ;;  %v9426_v62 = vcombine.high %v9424_v51, %v9424_v51  ;;  %v9433_v3 = vrot.slane %v9417_v44, %v12273_v59  ;;  %v9440_v45 = vrot.slane %v9424_v51, %v12273_v59 }
 0x706   :  { %v9835_v43 = vrot.slane %v9825_v14, %v12273_v59  ;;  %v9447_v21 = vrot.slane %v9425_v42, %v12273_v59  ;;  %v9459_v1 = vcombine.high %v9080_v2, %v9080_v2  ;;  %v9466_v4 = vrot.slane %v9080_v2, %v12273_v59  ;;  %v9030_v26 = vpop.permute.xlu1 %9029 }
 0x707   :  { %v9454_v12 = vrot.slane %v9426_v62, %v12273_v59  ;;  %v9455_v49 = vcombine.high %v9433_v3, %v9433_v3  ;;  %v9456_v34 = vcombine.high %v9440_v45, %v9440_v45  ;;  %v9826_v22 = vcombine.low %v9409_v5, %v9433_v3 }
 0x708   :  { %v9457_v19 = vcombine.high %v9447_v21, %v9447_v21  ;;  %v9473_v47 = vrot.slane %v9459_v1, %v12273_v59  ;;  %v9474_v63 = vcombine.high %v9466_v4, %v9466_v4  ;;  %v9482_v10 = vrot.slane %v9466_v4, %v12273_v59 }
 0x709   :  { %v9827_v60 = vcombine.low %v9447_v21, %v9455_v49  ;;  %v9842_v28 = vrot.slane %v9826_v22, %v12273_v59  ;;  %v9874_v24 = vcombine.low %v9454_v12, %v9456_v34  ;;  %v9458_v15 = vcombine.high %v9454_v12, %v9454_v12 }
 0x70a   :  { %v9828_v53 = vcombine.low %v9457_v19, %v9440_v45  ;;  %v9475_v35 = vcombine.high %v9473_v47, %v9473_v47  ;;  %v9489_v29 = vrot.slane %v9473_v47, %v12273_v59  ;;  %v9496_v50 = vrot.slane %v9474_v63, %v12273_v59  ;;  %v11572_v47 = vld [vmem:[%s14906_s11] ss:$0 sm:$0xff] }
 0x70b   :  { %v9807_v38 = vrot.slane %v9779_v39, %v12273_v59  ;;  %v9849_v30 = vrot.slane %v9827_v60, %v12273_v59  ;;  %v9857_v33 = vcombine.low %v9835_v43, %v9842_v28  ;;  %v9504_v23 = vcombine.high %v9482_v10, %v9482_v10 }
 0x70c   :  { %v9856_v13 = vrot.slane %v9828_v53, %v12273_v59  ;;  %v9503_v16 = vrot.slane %v9475_v35, %v12273_v59  ;;  %v9505_v32 = vcombine.high %v9489_v29, %v9489_v29  ;;  %v9506_v40 = vcombine.high %v9496_v50, %v9496_v50 }
 0x70d   :  { %v9875_v36 = vcombine.low %v9458_v15, %v9482_v10  ;;  %v9876_v31 = vcombine.low %v9496_v50, %v9504_v23  ;;  %v9767_v48 = vrot.slane %v9759_v25, %v12273_v59  ;;  %v9082_v52 = vsel %vm9062_vm6, %v14415_v58, %v9030_v26 }
 0x70e   :  { %v9884_v20 = vrot.slane %v9874_v24, %v12273_v59  ;;  %v9877_v55 = vcombine.low %v9506_v40, %v9489_v29  ;;  %v9507_v27 = vcombine.high %v9503_v16, %v9503_v16  ;;  %v9514_v0 = vrot.slane %v9082_v52, %v12273_v59 }
 0x70f   :  { %v9891_v54 = vrot.slane %v9875_v36, %v12273_v59  ;;  %v9923_v37 = vcombine.low %v9503_v16, %v9505_v32  ;;  %v9775_v46 = vcombine.low %v9767_v48, %v9774_v7  ;;  %v9809_v11 = vcombine.low %v9800_v41, %v9807_v38 }
 0x710   :  { %v9898_v6 = vrot.slane %v9876_v31, %v12273_v59  ;;  %v9905_v56 = vrot.slane %v9877_v55, %v12273_v59  ;;  %v9515_v44 = vcombine.high %v9514_v0, %v9514_v0  ;;  %v9522_v25 = vrot.slane %v9514_v0, %v12273_v59 }
 0x711   :  { %v9906_v17 = vcombine.low %v9884_v20, %v9891_v54  ;;  %11849 = vmatmul.mubr.msk.bf16.gmra.mrb[72].mxu0 %vm9978_vm0, %v9775_v46  ;;  %v9816_v58 = vrot.slane %v9808_v9, %v12273_v59  ;;  %v9823_v14 = vrot.slane %v9809_v11, %v12273_v59  ;;  %v9858_v51 = vcombine.low %v9849_v30, %v9856_v13 }
 0x712   :  { %v9529_v2 = vrot.slane %v9515_v44, %v12273_v59  ;;  %v9530_v39 = vcombine.high %v9522_v25, %v9522_v25  ;;  %v9924_v7 = vcombine.low %v9507_v27, %v9522_v25  ;;  %11852 = vmatprep.mubr.msk.bf16.mxu0 %vm11948_vm8, %v11946_v18  ;;  %v9865_v42 = vrot.slane %v9857_v33, %v12273_v59 }
 0x713   :  { %v9824_v5 = vcombine.low %v9816_v58, %v9823_v14  ;;  %v9872_v41 = vrot.slane %v9858_v51, %v12273_v59  ;;  %v9907_v62 = vcombine.low %v9898_v6, %v9905_v56  ;;  %v9932_v3 = vrot.slane %v9923_v37, %v12273_v59 }
 0x714   :  { %v9925_v45 = vcombine.low %v9529_v2, %v9530_v39  ;;  %v9939_v9 = vrot.slane %v9924_v7, %v12273_v59  ;;  %v9914_v21 = vrot.slane %v9906_v17, %v12273_v59  ;;  %v10602_v10 = vcombine.high %v11572_v47, %v11572_v47 }
 0x715   :  { %v9873_v43 = vcombine.low %v9865_v42, %v9872_v41  ;;  %v9921_v1 = vrot.slane %v9907_v62, %v12273_v59  ;;  %v14494_v24 = vrot.slane %v11572_v47, %v12540_v8 }
 0x716   :  { %v9946_v4 = vrot.slane %v9925_v45, %v12273_v59  ;;  %v9947_v12 = vcombine.low %v9932_v3, %v9939_v9  ;;  %v14497_v53 = vrot.slane %v10602_v10, %v12540_v8 }
 0x717   :  { %v9922_v49 = vcombine.low %v9914_v21, %v9921_v1  ;;  %v14510_v30 = vcombine.high %v14494_v24, %v14494_v24 }
 0x718   :  { %v9954_v34 = vrot.slane %v9947_v12, %v12273_v59  ;;  %v9961_v22 = vrot.slane %v9946_v4, %v12273_v59  ;;  %v11571_v59 = vld [vmem:[%s14905_s10] ss:$0 sm:$0xff]  ;;  %v14516_v36 = vcombine.high %v14497_v53, %v14497_v53 }
 0x719   :  { %11853 = vmatmul.mubr.msk.bf16.gmra.mrb[76].mxu0 %vm9978_vm0, %v9824_v5  ;;  %v10505_v63 = vcombine.high %v11571_v59, %v11571_v59  ;;  %v14488_v60 = vrot.slane %v11571_v59, %v12540_v8 }
 0x71a   :  { %11856 = vmatprep.mubr.msk.bf16.mxu0 %vm11948_vm8, %v11946_v18  ;;  %v9962_v19 = vcombine.low %v9954_v34, %v9961_v22 }
 0x71b   :  { %v14491_v28 = vrot.slane %v10505_v63, %v12540_v8  ;;  %v14502_v50 = vcombine.high %v14488_v60, %v14488_v60 }
 0x71d   :  { %v14506_v38 = vcombine.high %v14491_v28, %v14491_v28 }
 0x721   :  { %11857 = vmatmul.mubr.msk.bf16.gmra.mrb[80].mxu0 %vm9978_vm0, %v9873_v43 }
 0x722   :  { %11860 = vmatprep.mubr.msk.bf16.mxu0 %vm11948_vm8, %v11946_v18 }
 0x729   :  { %11861 = vmatmul.mubr.msk.bf16.gmra.mrb[84].mxu0 %vm9978_vm0, %v9922_v49 }
 0x72a   :  { %11864 = vmatprep.mubr.msk.bf16.mxu0 %vm11948_vm8, %v11946_v18  ;;  %vm11296_vm8 = vcmask 326912  }
 0x731   :  { %11865 = vmatmul.mubr.msk.bf16.gmra.mrb[88].mxu0 %vm9978_vm0, %v9962_v19 }
 0x78e   :  { %v10043_v15 = vpop.f32.mrb[56].mxu0 }
 0x78f   :  { %v10132_v35 = vcombine.high %v10043_v15, %v10043_v15  ;;  %v10139_v29 = vrot.slane %v10043_v15, %v12540_v8  ;;  %v11834_v26 = vpop.f32.mrb[57].mxu0 }
 0x790   :  { %v10046_v33 = vpop.f32.mrb[58].mxu0 }
 0x791   :  { %v10146_v23 = vrot.slane %v10132_v35, %v12540_v8  ;;  %v10147_v13 = vcombine.high %v10139_v29, %v10139_v29  ;;  %v10526_v16 = vmul.f32 %v14488_v60, %v10139_v29  ;;  %v10149_v32 = vcombine.high %v10046_v33, %v10046_v33  ;;  %v11835_v40 = vpop.f32.mrb[59].mxu0 }
 0x792   :  { %v10156_v31 = vrot.slane %v10046_v33, %v12540_v8 }
 0x793   :  { %v10148_v48 = vcombine.high %v10146_v23, %v10146_v23  ;;  %v10527_v52 = vmul.f32 %v14502_v50, %v10147_v13  ;;  %v10528_v20 = vmul.f32 %v14491_v28, %v10146_v23  ;;  %v10623_v55 = vadd.f32 %v14494_v24, %v10526_v16 }
 0x794   :  { %v10163_v27 = vrot.slane %v10149_v32, %v12540_v8  ;;  %v10164_v0 = vcombine.high %v10156_v31, %v10156_v31  ;;  %v10530_v54 = vmul.f32 %v14488_v60, %v10156_v31 }
 0x795   :  { %v10529_v37 = vmul.f32 %v14506_v38, %v10148_v48  ;;  %v10624_v46 = vadd.f32 %v14510_v30, %v10527_v52  ;;  %v10625_v11 = vadd.f32 %v14497_v53, %v10528_v20  ;;  %v10693_v14 = vmax.f32 %v10623_v55, 0.0 }
 0x796   :  { %v10165_v6 = vcombine.high %v10163_v27, %v10163_v27  ;;  %v10531_v56 = vmul.f32 %v14502_v50, %v10164_v0  ;;  %v10532_v44 = vmul.f32 %v14491_v28, %v10163_v27  ;;  %v10627_v25 = vadd.f32 %v14494_v24, %v10530_v54  ;;  %v10051_v17 = vpop.f32.mrb[60].mxu0 }
 0x797   :  { %v10626_v58 = vadd.f32 %v14516_v36, %v10529_v37  ;;  %v10694_v51 = vmax.f32 %v10624_v46, 0.0  ;;  %v10166_v2 = vcombine.high %v10051_v17, %v10051_v17  ;;  %v11838_v39 = vpop.f32.mrb[61].mxu0  ;;  %v10695_v7 = vmax.f32 %v10625_v11, 0.0 }
 0x798   :  { %v10533_v5 = vmul.f32 %v14506_v38, %v10165_v6  ;;  %v10628_v42 = vadd.f32 %v14510_v30, %v10531_v56  ;;  %v10629_v41 = vadd.f32 %v14497_v53, %v10532_v44  ;;  %v10054_v62 = vpop.f32.mrb[62].mxu0  ;;  %v10173_v3 = vrot.slane %v10051_v17, %v12540_v8 }
 0x799   :  { %v10180_v45 = vrot.slane %v10166_v2, %v12540_v8  ;;  %v10183_v9 = vcombine.high %v10054_v62, %v10054_v62  ;;  %v10190_v43 = vrot.slane %v10054_v62, %v12540_v8  ;;  %v11839_v21 = vpop.f32.mrb[63].mxu0  ;;  %v10697_v4 = vmax.f32 %v10627_v25, 0.0 }
 0x79a   :  { %v10630_v1 = vadd.f32 %v14516_v36, %v10533_v5  ;;  %v10698_v12 = vmax.f32 %v10628_v42, 0.0  ;;  %v10696_v49 = vmax.f32 %v10626_v58, 0.0  ;;  %v10181_v34 = vcombine.high %v10173_v3, %v10173_v3 }
 0x79b   :  { %v10182_v22 = vcombine.high %v10180_v45, %v10180_v45  ;;  %v10534_v19 = vmul.f32 %v14488_v60, %v10173_v3  ;;  %v10536_v59 = vmul.f32 %v14491_v28, %v10180_v45  ;;  %v10197_v47 = vrot.slane %v10183_v9, %v12540_v8 }
 0x79c   :  { %v10198_v63 = vcombine.high %v10190_v43, %v10190_v43  ;;  %v10538_v10 = vmul.f32 %v14488_v60, %v10190_v43  ;;  %v10833_v15 = vcombine.low %v10693_v14, %v10694_v51  ;;  %v10535_v35 = vmul.f32 %v14502_v50, %v10181_v34 }
 0x79d   :  { %v10537_v29 = vmul.f32 %v14506_v38, %v10182_v22  ;;  %v10631_v26 = vadd.f32 %v14494_v24, %v10534_v19  ;;  %v10633_v33 = vadd.f32 %v14497_v53, %v10536_v59  ;;  %v10199_v23 = vcombine.high %v10197_v47, %v10197_v47 }
 0x79e   :  { %v10539_v13 = vmul.f32 %v14502_v50, %v10198_v63  ;;  %v10540_v16 = vmul.f32 %v14491_v28, %v10197_v47  ;;  %v10635_v32 = vadd.f32 %v14494_v24, %v10538_v10  ;;  %v10699_v40 = vmax.f32 %v10629_v41, 0.0 }
 0x79f   :  { %v10632_v31 = vadd.f32 %v14510_v30, %v10535_v35  ;;  %v10634_v48 = vadd.f32 %v14516_v36, %v10537_v29  ;;  %v10701_v52 = vmax.f32 %v10631_v26, 0.0  ;;  %v10703_v20 = vmax.f32 %v10633_v33, 0.0 }
 0x7a0   :  { %v10541_v55 = vmul.f32 %v14506_v38, %v10199_v23  ;;  %v10636_v27 = vadd.f32 %v14510_v30, %v10539_v13  ;;  %v10637_v0 = vadd.f32 %v14497_v53, %v10540_v16  ;;  %v10705_v37 = vmax.f32 %v10635_v32, 0.0 }
 0x7a1   :  { %v10702_v54 = vmax.f32 %v10632_v31, 0.0  ;;  %v10834_v46 = vcombine.low %v10695_v7, %v10696_v49  ;;  %v10700_v11 = vmax.f32 %v10630_v1, 0.0  ;;  %v10841_v44 = vrot.slane %v10833_v15, %v12540_v8 }
 0x7a2   :  { %v10638_v6 = vadd.f32 %v14516_v36, %v10541_v55  ;;  %v10706_v56 = vmax.f32 %v10636_v27, 0.0  ;;  %v10850_v25 = vcombine.low %v10697_v4, %v10698_v12  ;;  %v10704_v14 = vmax.f32 %v10634_v48, 0.0 }
 0x7a3   :  { %v10848_v17 = vrot.slane %v10834_v46, %v12540_v8  ;;  %v10851_v58 = vcombine.low %v10699_v40, %v10700_v11  ;;  %v10867_v51 = vcombine.low %v10701_v52, %v10702_v54  ;;  %v10707_v2 = vmax.f32 %v10637_v0, 0.0 }
 0x7a4   :  { %v10708_v39 = vmax.f32 %v10638_v6, 0.0  ;;  %v10884_v5 = vcombine.low %v10705_v37, %v10706_v56  ;;  %v10858_v41 = vrot.slane %v10850_v25, %v12540_v8  ;;  %v10868_v62 = vcombine.low %v10703_v20, %v10704_v14 }
 0x7a5   :  { %v10849_v42 = vcombine.low %v10841_v44, %v10848_v17  ;;  %v10865_v7 = vrot.slane %v10851_v58, %v12540_v8  ;;  %v10875_v43 = vrot.slane %v10867_v51, %v12540_v8 }
 0x7a6   :  { %v10885_v3 = vcombine.low %v10707_v2, %v10708_v39  ;;  %v10882_v21 = vrot.slane %v10868_v62, %v12540_v8  ;;  %v10892_v1 = vrot.slane %v10884_v5, %v12540_v8 }
 0x7a7   :  { %v11155_v45 = vsel %vm9031_vm3, %v10849_v42, 0.0  ;;  %v10866_v9 = vcombine.low %v10858_v41, %v10865_v7 }
 0x7a8   :  { %11156 = vadd.xlane.f32.xlu0 %v11155_v45  ;;  %v10899_v4 = vrot.slane %v10885_v3, %v12540_v8  ;;  %v10883_v49 = vcombine.low %v10875_v43, %v10882_v21 }
 0x7a9   :  { %v11158_v12 = vsel %vm9031_vm3, %v10866_v9, 0.0 }
 0x7aa   :  { %11159 = vadd.xlane.f32.xlu1 %v11158_v12  ;;  %v10900_v34 = vcombine.low %v10892_v1, %v10899_v4  ;;  %v11161_v22 = vsel %vm9031_vm3, %v10883_v49, 0.0 }
 0x7ac   :  { %v11164_v19 = vsel %vm9031_vm3, %v10900_v34, 0.0  ;;  %v10059_v59 = vpop.f32.mrb[64].mxu0 }
 0x7ad   :  { %11165 = vadd.xlane.f32.xlu0 %v11164_v19  ;;  %v10200_v47 = vcombine.high %v10059_v59, %v10059_v59  ;;  %v10207_v63 = vrot.slane %v10059_v59, %v12540_v8  ;;  %v11842_v10 = vpop.f32.mrb[65].mxu0 }
 0x7ae   :  { %11162 = vadd.xlane.f32.xlu1 %v11161_v22  ;;  %v10062_v15 = vpop.f32.mrb[66].mxu0 }
 0x7af   :  { %v10214_v35 = vrot.slane %v10200_v47, %v12540_v8  ;;  %v10215_v29 = vcombine.high %v10207_v63, %v10207_v63  ;;  %v10542_v26 = vmul.f32 %v14488_v60, %v10207_v63  ;;  %v10217_v33 = vcombine.high %v10062_v15, %v10062_v15  ;;  %v11843_v23 = vpop.f32.mrb[67].mxu0 }
 0x7b0   :  { %v10224_v13 = vrot.slane %v10062_v15, %v12540_v8 }
 0x7b1   :  { %v10216_v16 = vcombine.high %v10214_v35, %v10214_v35  ;;  %v10543_v32 = vmul.f32 %v14502_v50, %v10215_v29  ;;  %v10544_v40 = vmul.f32 %v14491_v28, %v10214_v35  ;;  %v10639_v31 = vadd.f32 %v14494_v24, %v10542_v26 }
 0x7b2   :  { %v10231_v48 = vrot.slane %v10217_v33, %v12540_v8  ;;  %v10232_v52 = vcombine.high %v10224_v13, %v10224_v13  ;;  %v10546_v20 = vmul.f32 %v14488_v60, %v10224_v13 }
 0x7b3   :  { %v10545_v55 = vmul.f32 %v14506_v38, %v10216_v16  ;;  %v10640_v27 = vadd.f32 %v14510_v30, %v10543_v32  ;;  %v10641_v0 = vadd.f32 %v14497_v53, %v10544_v40  ;;  %v10709_v56 = vmax.f32 %v10639_v31, 0.0 }
 0x7b4   :  { %v10233_v54 = vcombine.high %v10231_v48, %v10231_v48  ;;  %v10547_v37 = vmul.f32 %v14502_v50, %v10232_v52  ;;  %v10548_v46 = vmul.f32 %v14491_v28, %v10231_v48  ;;  %v10643_v11 = vadd.f32 %v14494_v24, %v10546_v20 }
 0x7b5   :  { %v10642_v6 = vadd.f32 %v14516_v36, %v10545_v55  ;;  %v10710_v44 = vmax.f32 %v10640_v27, 0.0  ;;  %v10711_v14 = vmax.f32 %v10641_v0, 0.0 }
 0x7b6   :  { %v10549_v25 = vmul.f32 %v14506_v38, %v10233_v54  ;;  %v10644_v17 = vadd.f32 %v14510_v30, %v10547_v37  ;;  %v10645_v58 = vadd.f32 %v14497_v53, %v10548_v46  ;;  %v10713_v5 = vmax.f32 %v10643_v11, 0.0 }
 0x7b7   :  { %v10712_v51 = vmax.f32 %v10642_v6, 0.0  ;;  %v10901_v2 = vcombine.low %v10709_v56, %v10710_v44 }
 0x7b8   :  { %v10646_v39 = vadd.f32 %v14516_v36, %v10549_v25  ;;  %v10714_v42 = vmax.f32 %v10644_v17, 0.0  ;;  %v10715_v7 = vmax.f32 %v10645_v58, 0.0 }
 0x7b9   :  { %v10902_v41 = vcombine.low %v10711_v14, %v10712_v51  ;;  %v10909_v45 = vrot.slane %v10901_v2, %v12540_v8 }
 0x7ba   :  { %v10716_v62 = vmax.f32 %v10646_v39, 0.0  ;;  %v10918_v3 = vcombine.low %v10713_v5, %v10714_v42 }
 0x7bb   :  { %v10916_v9 = vrot.slane %v10902_v41, %v12540_v8 }
 0x7bc   :  { %v10919_v43 = vcombine.low %v10715_v7, %v10716_v62  ;;  %v10926_v1 = vrot.slane %v10918_v3, %v12540_v8 }
 0x7bd   :  { %v10917_v21 = vcombine.low %v10909_v45, %v10916_v9 }
 0x7be   :  { %v10933_v4 = vrot.slane %v10919_v43, %v12540_v8 }
 0x7bf   :  { %v11167_v12 = vsel %vm9031_vm3, %v10917_v21, 0.0 }
 0x7c0   :  { %11168 = vadd.xlane.f32.xlu1 %v11167_v12  ;;  %v10934_v49 = vcombine.low %v10926_v1, %v10933_v4  ;;  %v11915_v4 = vld [vmem:[%s14907_s12] sm:$0xff]  }
 0x7c1   :  { %11869 = vmatpush3.bf16.msra.mxu1 %v11915_v4 }
 0x7c2   :  { %v11170_v34 = vsel %vm9031_vm3, %v10934_v49, 0.0  ;;  %11870 = vmatprep.subr.bf16.mxu1 %v11946_v18 }
 0x7c3   :  { %11171 = vadd.xlane.f32.xlu0 %v11170_v34 }
 0x7c4   :  { %v10067_v22 = vpop.f32.mrb[68].mxu0 }
 0x7c5   :  { %v10234_v19 = vcombine.high %v10067_v22, %v10067_v22  ;;  %v10241_v59 = vrot.slane %v10067_v22, %v12540_v8  ;;  %v11846_v47 = vpop.f32.mrb[69].mxu0 }
 0x7c6   :  { %v10070_v63 = vpop.f32.mrb[70].mxu0 }
 0x7c7   :  { %v10248_v10 = vrot.slane %v10234_v19, %v12540_v8  ;;  %v10249_v15 = vcombine.high %v10241_v59, %v10241_v59  ;;  %v10550_v35 = vmul.f32 %v14488_v60, %v10241_v59  ;;  %v10251_v29 = vcombine.high %v10070_v63, %v10070_v63  ;;  %v11847_v26 = vpop.f32.mrb[71].mxu0 }
 0x7c8   :  { %v10258_v33 = vrot.slane %v10070_v63, %v12540_v8 }
 0x7c9   :  { %v10250_v23 = vcombine.high %v10248_v10, %v10248_v10  ;;  %v10551_v13 = vmul.f32 %v14502_v50, %v10249_v15  ;;  %v10552_v16 = vmul.f32 %v14491_v28, %v10248_v10  ;;  %v10647_v32 = vadd.f32 %v14494_v24, %v10550_v35 }
 0x7ca   :  { %v10265_v40 = vrot.slane %v10251_v29, %v12540_v8  ;;  %v10266_v31 = vcombine.high %v10258_v33, %v10258_v33  ;;  %v10554_v48 = vmul.f32 %v14488_v60, %v10258_v33 }
 0x7cb   :  { %v10553_v52 = vmul.f32 %v14506_v38, %v10250_v23  ;;  %v10648_v20 = vadd.f32 %v14510_v30, %v10551_v13  ;;  %v10649_v55 = vadd.f32 %v14497_v53, %v10552_v16  ;;  %v10717_v11 = vmax.f32 %v10647_v32, 0.0 }
 0x7cc   :  { %v10267_v27 = vcombine.high %v10265_v40, %v10265_v40  ;;  %v10555_v0 = vmul.f32 %v14502_v50, %v10266_v31  ;;  %v10556_v54 = vmul.f32 %v14491_v28, %v10265_v40  ;;  %v10651_v37 = vadd.f32 %v14494_v24, %v10554_v48 }
 0x7cd   :  { %v10650_v46 = vadd.f32 %v14516_v36, %v10553_v52  ;;  %v10718_v6 = vmax.f32 %v10648_v20, 0.0  ;;  %v10719_v17 = vmax.f32 %v10649_v55, 0.0 }
 0x7ce   :  { %v10557_v56 = vmul.f32 %v14506_v38, %v10267_v27  ;;  %v10652_v44 = vadd.f32 %v14510_v30, %v10555_v0  ;;  %v10653_v25 = vadd.f32 %v14497_v53, %v10556_v54  ;;  %v10721_v2 = vmax.f32 %v10651_v37, 0.0 }
 0x7cf   :  { %v10720_v58 = vmax.f32 %v10650_v46, 0.0  ;;  %v10935_v14 = vcombine.low %v10717_v11, %v10718_v6 }
 0x7d0   :  { %v10654_v51 = vadd.f32 %v14516_v36, %v10557_v56  ;;  %v10722_v39 = vmax.f32 %v10652_v44, 0.0  ;;  %v10723_v42 = vmax.f32 %v10653_v25, 0.0 }
 0x7d1   :  { %v10936_v5 = vcombine.low %v10719_v17, %v10720_v58  ;;  %v10943_v62 = vrot.slane %v10935_v14, %v12540_v8 }
 0x7d2   :  { %v10724_v41 = vmax.f32 %v10654_v51, 0.0  ;;  %v10952_v7 = vcombine.low %v10721_v2, %v10722_v39  ;;  %v11916_v2 = vld [vmem:[%s14907_s12 + $0x8] sm:$0xff]  }
 0x7d3   :  { %v10950_v3 = vrot.slane %v10936_v5, %v12540_v8  ;;  %11871 = vmatpush3.bf16.msra.mxu1 %v11916_v2 }
 0x7d4   :  { %v10953_v45 = vcombine.low %v10723_v42, %v10724_v41  ;;  %v10960_v43 = vrot.slane %v10952_v7, %v12540_v8  ;;  %11872 = vmatprep.subr.bf16.mxu1 %v11946_v18 }
 0x7d5   :  { %v10951_v9 = vcombine.low %v10943_v62, %v10950_v3 }
 0x7d6   :  { %v10967_v21 = vrot.slane %v10953_v45, %v12540_v8 }
 0x7d7   :  { %v11173_v1 = vsel %vm9031_vm3, %v10951_v9, 0.0 }
 0x7d8   :  { %11174 = vadd.xlane.f32.xlu1 %v11173_v1  ;;  %v10968_v12 = vcombine.low %v10960_v43, %v10967_v21 }
 0x7da   :  { %v11176_v49 = vsel %vm9031_vm3, %v10968_v12, 0.0 }
 0x7db   :  { %11177 = vadd.xlane.f32.xlu0 %v11176_v49 }
 0x7e4   :  { %v10075_v34 = vpop.f32.mrb[72].mxu0 }
 0x7e5   :  { %v10268_v22 = vcombine.high %v10075_v34, %v10075_v34  ;;  %v10275_v19 = vrot.slane %v10075_v34, %v12540_v8  ;;  %v11850_v59 = vpop.f32.mrb[73].mxu0 }
 0x7e6   :  { %v10078_v47 = vpop.f32.mrb[74].mxu0 }
 0x7e7   :  { %v10282_v63 = vrot.slane %v10268_v22, %v12540_v8  ;;  %v10283_v10 = vcombine.high %v10275_v19, %v10275_v19  ;;  %v10558_v15 = vmul.f32 %v14488_v60, %v10275_v19  ;;  %v10285_v35 = vcombine.high %v10078_v47, %v10078_v47  ;;  %v11851_v29 = vpop.f32.mrb[75].mxu0 }
 0x7e8   :  { %v10292_v26 = vrot.slane %v10078_v47, %v12540_v8 }
 0x7e9   :  { %v10284_v33 = vcombine.high %v10282_v63, %v10282_v63  ;;  %v10559_v23 = vmul.f32 %v14502_v50, %v10283_v10  ;;  %v10560_v13 = vmul.f32 %v14491_v28, %v10282_v63  ;;  %v14630_v16 = vadd.f32 %v14494_v24, %v10558_v15 }
 0x7ea   :  { %v10299_v32 = vrot.slane %v10285_v35, %v12540_v8  ;;  %v10300_v40 = vcombine.high %v10292_v26, %v10292_v26  ;;  %v10562_v31 = vmul.f32 %v14502_v50, %v10292_v26 }
 0x7eb   :  { %v10561_v48 = vmul.f32 %v14488_v60, %v10284_v33  ;;  %v14636_v52 = vadd.f32 %v14510_v30, %v10559_v23  ;;  %v14639_v20 = vadd.f32 %v14497_v53, %v10560_v13  ;;  %v10725_v11 = vmax.f32 %v14630_v16, 0.0 }
 0x7ec   :  { %v10301_v55 = vcombine.high %v10299_v32, %v10299_v32  ;;  %v10563_v27 = vmul.f32 %v14491_v28, %v10300_v40  ;;  %v10564_v0 = vmul.f32 %v14506_v38, %v10299_v32  ;;  %v10659_v54 = vadd.f32 %v14510_v30, %v10562_v31  ;;  %v10083_v37 = vpop.f32.mrb[76].mxu0 }
 0x7ed   :  { %v10658_v46 = vadd.f32 %v14494_v24, %v10561_v48  ;;  %v10302_v6 = vcombine.high %v10083_v37, %v10083_v37  ;;  %v10309_v56 = vrot.slane %v10083_v37, %v12540_v8  ;;  %v11854_v44 = vpop.f32.mrb[77].mxu0  ;;  %v10726_v25 = vmax.f32 %v14636_v52, 0.0 }
 0x7ee   :  { %v10565_v17 = vmul.f32 %v14488_v60, %v10301_v55  ;;  %v10660_v58 = vadd.f32 %v14497_v53, %v10563_v27  ;;  %v10661_v14 = vadd.f32 %v14516_v36, %v10564_v0  ;;  %v10086_v51 = vpop.f32.mrb[78].mxu0  ;;  %v10729_v3 = vmax.f32 %v10659_v54, 0.0 }
 0x7ef   :  { %v10316_v39 = vrot.slane %v10302_v6, %v12540_v8  ;;  %v10317_v5 = vcombine.high %v10309_v56, %v10309_v56  ;;  %v10566_v42 = vmul.f32 %v14502_v50, %v10309_v56  ;;  %v10319_v41 = vcombine.high %v10086_v51, %v10086_v51  ;;  %v11855_v7 = vpop.f32.mrb[79].mxu0 }
 0x7f0   :  { %v14657_v62 = vadd.f32 %v14494_v24, %v10565_v17  ;;  %v10730_v45 = vmax.f32 %v10660_v58, 0.0  ;;  %v10326_v9 = vrot.slane %v10086_v51, %v12540_v8  ;;  %v10731_v12 = vmax.f32 %v10661_v14, 0.0 }
 0x7f1   :  { %v10318_v43 = vcombine.high %v10316_v39, %v10316_v39  ;;  %v10567_v21 = vmul.f32 %v14491_v28, %v10317_v5  ;;  %v10568_v1 = vmul.f32 %v14506_v38, %v10316_v39  ;;  %v14663_v4 = vadd.f32 %v14510_v30, %v10566_v42 }
 0x7f2   :  { %v10333_v49 = vrot.slane %v10319_v41, %v12540_v8  ;;  %v10334_v34 = vcombine.high %v10326_v9, %v10326_v9  ;;  %v10570_v22 = vmul.f32 %v14502_v50, %v10326_v9  ;;  %v10728_v63 = vmax.f32 %v10658_v46, 0.0 }
 0x7f3   :  { %v10569_v19 = vmul.f32 %v14488_v60, %v10318_v43  ;;  %v14670_v59 = vadd.f32 %v14497_v53, %v10567_v21  ;;  %v14673_v47 = vadd.f32 %v14516_v36, %v10568_v1  ;;  %v10733_v23 = vmax.f32 %v14663_v4, 0.0 }
 0x7f4   :  { %v10335_v10 = vcombine.high %v10333_v49, %v10333_v49  ;;  %v10571_v15 = vmul.f32 %v14491_v28, %v10334_v34  ;;  %v10572_v35 = vmul.f32 %v14506_v38, %v10333_v49  ;;  %v14678_v29 = vadd.f32 %v14510_v30, %v10570_v22  ;;  %v10091_v26 = vpop.f32.mrb[80].mxu0 }
 0x7f5   :  { %v14681_v33 = vadd.f32 %v14494_v24, %v10569_v19  ;;  %v10734_v13 = vmax.f32 %v14670_v59, 0.0  ;;  %v10336_v32 = vcombine.high %v10091_v26, %v10091_v26  ;;  %v11858_v40 = vpop.f32.mrb[81].mxu0  ;;  %v10735_v31 = vmax.f32 %v14673_v47, 0.0 }
 0x7f6   :  { %v10573_v48 = vmul.f32 %v14488_v60, %v10335_v10  ;;  %v14688_v55 = vadd.f32 %v14497_v53, %v10571_v15  ;;  %v14691_v27 = vadd.f32 %v14516_v36, %v10572_v35  ;;  %v10094_v0 = vpop.f32.mrb[82].mxu0  ;;  %v10343_v54 = vrot.slane %v10091_v26, %v12540_v8 }
 0x7f7   :  { %v10350_v37 = vrot.slane %v10336_v32, %v12540_v8  ;;  %v10353_v46 = vcombine.high %v10094_v0, %v10094_v0  ;;  %v10360_v6 = vrot.slane %v10094_v0, %v12540_v8  ;;  %v11859_v56 = vpop.f32.mrb[83].mxu0  ;;  %v10737_v17 = vmax.f32 %v14678_v29, 0.0 }
 0x7f8   :  { %v14697_v44 = vadd.f32 %v14494_v24, %v10573_v48  ;;  %v10738_v58 = vmax.f32 %v14688_v55, 0.0  ;;  %v10985_v14 = vcombine.low %v10728_v63, %v10729_v3  ;;  %v10351_v51 = vcombine.high %v10343_v54, %v10343_v54 }
 0x7f9   :  { %v10352_v2 = vcombine.high %v10350_v37, %v10350_v37  ;;  %v10574_v39 = vmul.f32 %v14502_v50, %v10343_v54  ;;  %v10576_v5 = vmul.f32 %v14506_v38, %v10350_v37  ;;  %v10367_v42 = vrot.slane %v10353_v46, %v12540_v8 }
 0x7fa   :  { %v10368_v41 = vcombine.high %v10360_v6, %v10360_v6  ;;  %v10578_v7 = vmul.f32 %v14502_v50, %v10360_v6  ;;  %v10986_v9 = vcombine.low %v10730_v45, %v10731_v12  ;;  %v10575_v43 = vmul.f32 %v14491_v28, %v10351_v51 }
 0x7fb   :  { %v10577_v21 = vmul.f32 %v14488_v60, %v10352_v2  ;;  %v14708_v1 = vadd.f32 %v14510_v30, %v10574_v39  ;;  %v14711_v3 = vadd.f32 %v14516_v36, %v10576_v5  ;;  %v10369_v49 = vcombine.high %v10367_v42, %v10367_v42 }
 0x7fc   :  { %v10579_v34 = vmul.f32 %v14491_v28, %v10368_v41  ;;  %v10580_v22 = vmul.f32 %v14506_v38, %v10367_v42  ;;  %v14716_v19 = vadd.f32 %v14510_v30, %v10578_v7  ;;  %v10099_v59 = vpop.f32.mrb[84].mxu0  ;;  %v10739_v45 = vmax.f32 %v14691_v27, 0.0 }
 0x7fd   :  { %v14720_v12 = vadd.f32 %v14497_v53, %v10575_v43  ;;  %v14723_v47 = vadd.f32 %v14494_v24, %v10577_v21  ;;  %v10741_v63 = vmax.f32 %v14708_v1, 0.0  ;;  %v11862_v10 = vpop.f32.mrb[85].mxu0  ;;  %v10743_v15 = vmax.f32 %v14711_v3, 0.0 }
 0x7fe   :  { %v10581_v35 = vmul.f32 %v14488_v60, %v10369_v49  ;;  %v14729_v26 = vadd.f32 %v14497_v53, %v10579_v34  ;;  %v14732_v32 = vadd.f32 %v14516_v36, %v10580_v22  ;;  %v10102_v40 = vpop.f32.mrb[86].mxu0  ;;  %v10745_v48 = vmax.f32 %v14716_v19, 0.0 }
 0x7ff   :  { %v10993_v27 = vrot.slane %v10985_v14, %v12540_v8  ;;  %v11000_v0 = vrot.slane %v10986_v9, %v12540_v8  ;;  %v10370_v54 = vcombine.high %v10099_v59, %v10099_v59  ;;  %v11863_v37 = vpop.f32.mrb[87].mxu0  ;;  %v10742_v46 = vmax.f32 %v14720_v12, 0.0 }
 0x800   :  { %v14739_v6 = vadd.f32 %v14494_v24, %v10581_v35  ;;  %v10746_v56 = vmax.f32 %v14729_v26, 0.0  ;;  %v10377_v51 = vrot.slane %v10099_v59, %v12540_v8  ;;  %v10732_v5 = vmax.f32 %v14657_v62, 0.0 }
 0x801   :  { %v11001_v2 = vcombine.low %v10993_v27, %v11000_v0  ;;  %v10384_v39 = vrot.slane %v10370_v54, %v12540_v8  ;;  %v11003_v42 = vcombine.low %v10734_v13, %v10735_v31  ;;  %v10387_v7 = vcombine.high %v10102_v40, %v10102_v40 }
 0x802   :  { %v10385_v14 = vcombine.high %v10377_v51, %v10377_v51  ;;  %v10582_v41 = vmul.f32 %v14502_v50, %v10377_v51  ;;  %v10394_v9 = vrot.slane %v10102_v40, %v12540_v8  ;;  %v11002_v34 = vcombine.low %v10732_v5, %v10733_v23 }
 0x803   :  { %v11183_v43 = vsel %vm9031_vm3, %v11001_v2, 0.0  ;;  %v10386_v21 = vcombine.high %v10384_v39, %v10384_v39  ;;  %v10584_v49 = vmul.f32 %v14506_v38, %v10384_v39  ;;  %v11017_v13 = vrot.slane %v11003_v42, %v12540_v8 }
 0x804   :  { %11184 = vadd.xlane.f32.xlu0 %v11183_v43  ;;  %v10583_v22 = vmul.f32 %v14491_v28, %v10385_v14  ;;  %v14753_v62 = vadd.f32 %v14510_v30, %v10582_v41  ;;  %v10401_v31 = vrot.slane %v10387_v7, %v12540_v8  ;;  %v10107_v59 = vpop.f32.mrb[88].mxu0  ;;  %v11010_v35 = vrot.slane %v11002_v34, %v12540_v8 }
 0x805   :  { %v10585_v12 = vmul.f32 %v14488_v60, %v10386_v21  ;;  %v14759_v10 = vadd.f32 %v14516_v36, %v10584_v49  ;;  %v10402_v4 = vcombine.high %v10394_v9, %v10394_v9  ;;  %v11866_v23 = vpop.f32.mrb[89].mxu0  ;;  %v10747_v40 = vmax.f32 %v14732_v32, 0.0 }
 0x806   :  { %v14764_v27 = vadd.f32 %v14497_v53, %v10583_v22  ;;  %v10403_v0 = vcombine.high %v10401_v31, %v10401_v31  ;;  %v10586_v54 = vmul.f32 %v14502_v50, %v10394_v9  ;;  %v10110_v37 = vpop.f32.mrb[90].mxu0  ;;  %v10749_v2 = vmax.f32 %v14753_v62, 0.0 }
 0x807   :  { %v14768_v51 = vadd.f32 %v14494_v24, %v10585_v12  ;;  %v11018_v39 = vcombine.low %v11010_v35, %v11017_v13  ;;  %v10587_v5 = vmul.f32 %v14491_v28, %v10402_v4  ;;  %v11867_v42 = vpop.f32.mrb[91].mxu0  ;;  %v10751_v14 = vmax.f32 %v14759_v10, 0.0 }
 0x808   :  { %v10588_v32 = vmul.f32 %v14506_v38, %v10401_v31  ;;  %v10589_v41 = vmul.f32 %v14488_v60, %v10403_v0  ;;  %v14776_v7 = vadd.f32 %v14510_v30, %v10586_v54  ;;  %v10736_v21 = vmax.f32 %v14681_v33, 0.0 }
 0x809   :  { %v11186_v9 = vsel %vm9031_vm3, %v11018_v39, 0.0  ;;  %v10684_v43 = vadd.f32 %v14497_v53, %v10587_v5  ;;  %v11020_v49 = vcombine.low %v10738_v58, %v10739_v45  ;;  %v10750_v34 = vmax.f32 %v14764_v27, 0.0 }
 0x80a   :  { %11187 = vadd.xlane.f32.xlu0 %v11186_v9  ;;  %v10685_v22 = vadd.f32 %v14516_v36, %v10588_v32  ;;  %v14786_v13 = vadd.f32 %v14494_v24, %v10589_v41  ;;  %v10404_v31 = vcombine.high %v10107_v59, %v10107_v59  ;;  %v10753_v12 = vmax.f32 %v14776_v7, 0.0  ;;  %v11917_v7 = vld [vmem:[%s14907_s12 + $0x10] sm:$0xff]  }
 0x80b   :  { %v11019_v10 = vcombine.low %v10736_v21, %v10737_v17  ;;  %v11034_v35 = vrot.slane %v11020_v49, %v12540_v8  ;;  %v10411_v33 = vrot.slane %v10107_v59, %v12540_v8  ;;  %v10754_v55 = vmax.f32 %v10684_v43, 0.0  ;;  %11873 = vmatpush3.bf16.msra.mxu1 %v11917_v7 }
 0x80c   :  { %v10418_v58 = vrot.slane %v10404_v31, %v12540_v8  ;;  %v10740_v45 = vmax.f32 %v14697_v44, 0.0  ;;  %v11037_v4 = vcombine.low %v10742_v46, %v10743_v15  ;;  %v10427_v29 = vrot.slane %v10110_v37, %v12540_v8  ;;  %11874 = vmatprep.subr.bf16.mxu1 %v11946_v18 }
 0x80d   :  { %v11027_v23 = vrot.slane %v11019_v10, %v12540_v8  ;;  %v10419_v27 = vcombine.high %v10411_v33, %v10411_v33  ;;  %v10590_v0 = vmul.f32 %v14502_v50, %v10411_v33  ;;  %v10744_v49 = vmax.f32 %v14723_v47, 0.0 }
 0x80e   :  { %v10420_v17 = vcombine.high %v10418_v58, %v10418_v58  ;;  %v10592_v54 = vmul.f32 %v14506_v38, %v10418_v58  ;;  %v11036_v59 = vcombine.low %v10740_v45, %v10741_v63  ;;  %v11051_v39 = vrot.slane %v11037_v4, %v12540_v8 }
 0x80f   :  { %v11035_v5 = vcombine.low %v11027_v23, %v11034_v35  ;;  %v10591_v44 = vmul.f32 %v14491_v28, %v10419_v27  ;;  %v10687_v3 = vadd.f32 %v14510_v30, %v10590_v0  ;;  %v10428_v15 = vcombine.high %v10427_v29, %v10427_v29 }
 0x810   :  { %v10593_v46 = vmul.f32 %v14488_v60, %v10420_v17  ;;  %v10689_v42 = vadd.f32 %v14516_v36, %v10592_v54  ;;  %v11044_v37 = vrot.slane %v11036_v59, %v12540_v8  ;;  %v10594_v32 = vmul.f32 %v14502_v50, %v10427_v29 }
 0x811   :  { %v10755_v38 = vmax.f32 %v10685_v22, 0.0  ;;  %v11189_v1 = vsel %vm9031_vm3, %v11035_v5, 0.0  ;;  %v10688_v63 = vadd.f32 %v14497_v53, %v10591_v44  ;;  %v10595_v41 = vmul.f32 %v14491_v28, %v10428_v15  ;;  %v11918_v15 = vld [vmem:[%s14907_s12 + $0x18] sm:$0xff]  }
 0x812   :  { %11190 = vadd.xlane.f32.xlu1 %v11189_v1  ;;  %v10757_v9 = vmax.f32 %v10687_v3, 0.0  ;;  %v11052_v60 = vcombine.low %v11044_v37, %v11051_v39  ;;  %v10690_v36 = vadd.f32 %v14494_v24, %v10593_v46  ;;  %v10691_v43 = vadd.f32 %v14510_v30, %v10594_v32  ;;  %11875 = vmatpush3.bf16.msra.mxu1 %v11918_v15 }
 0x813   :  { %v10759_v21 = vmax.f32 %v10689_v42, 0.0  ;;  %v10692_v50 = vadd.f32 %v14497_v53, %v10595_v41  ;;  %v11054_v22 = vcombine.low %v10746_v56, %v10747_v40  ;;  %v10748_v35 = vmax.f32 %v14739_v6, 0.0  ;;  %11876 = vmatprep.subr.bf16.mxu1 %v11946_v18 }
 0x814   :  { %v11192_v28 = vsel %vm9031_vm3, %v11052_v60, 0.0  ;;  %v10760_v31 = vmax.f32 %v10690_v36, 0.0  ;;  %v10761_v10 = vmax.f32 %v10691_v43, 0.0  ;;  %v10758_v24 = vmax.f32 %v10688_v63, 0.0 }
 0x815   :  { %11193 = vadd.xlane.f32.xlu0 %v11192_v28  ;;  %v11053_v30 = vcombine.low %v10744_v49, %v10745_v48  ;;  %v11068_v53 = vrot.slane %v11054_v22, %v12540_v8  ;;  %v11071_v47 = vcombine.low %v10750_v34, %v10751_v14  ;;  %v11070_v26 = vcombine.low %v10748_v35, %v10749_v2 }
 0x816   :  { %v11121_v33 = vcombine.low %v10760_v31, %v10761_v10  ;;  %v10752_v56 = vmax.f32 %v14768_v51, 0.0  ;;  %v11088_v40 = vcombine.low %v10754_v55, %v10755_v38  ;;  %v10762_v58 = vmax.f32 %v10692_v50, 0.0 }
 0x817   :  { %v11061_v6 = vrot.slane %v11053_v30, %v12540_v8  ;;  %v11085_v45 = vrot.slane %v11071_v47, %v12540_v8  ;;  %v10969_v19 = vcombine.low %v10725_v11, %v10726_v25  ;;  %v11078_v48 = vrot.slane %v11070_v26, %v12540_v8 }
 0x818   :  { %v11087_v14 = vcombine.low %v10752_v56, %v10753_v12  ;;  %v11102_v34 = vrot.slane %v11088_v40, %v12540_v8  ;;  %v10756_v62 = vmax.f32 %v14786_v13, 0.0  ;;  %v10727_v51 = vmax.f32 %v14639_v20, 0.0 }
 0x819   :  { %v11069_v2 = vcombine.low %v11061_v6, %v11068_v53  ;;  %v11105_v55 = vcombine.low %v10758_v24, %v10759_v21  ;;  %v11086_v4 = vcombine.low %v11078_v48, %v11085_v45  ;;  %v11128_v52 = vrot.slane %v11121_v33, %v12540_v8 }
 0x81a   :  { %v11095_v23 = vrot.slane %v11087_v14, %v12540_v8  ;;  %v11104_v27 = vcombine.low %v10756_v62, %v10757_v9  ;;  %v10976_v11 = vrot.slane %v10969_v19, %v12540_v8  ;;  %v11135_v12 = vrot.slane %v10762_v58, %v12540_v8 }
 0x81b   :  { %v11195_v16 = vsel %vm9031_vm3, %v11069_v2, 0.0  ;;  %v11119_v25 = vrot.slane %v11105_v55, %v12540_v8  ;;  %v11198_v13 = vsel %vm9031_vm3, %v11086_v4, 0.0  ;;  %v10983_v29 = vrot.slane %v10727_v51, %v12540_v8 }
 0x81c   :  { %11196 = vadd.xlane.f32.xlu1 %v11195_v16  ;;  %v11103_v0 = vcombine.low %v11095_v23, %v11102_v34  ;;  %v11112_v20 = vrot.slane %v11104_v27, %v12540_v8  ;;  %11199 = vadd.xlane.f32.xlu0 %v11198_v13  ;;  %v11136_v17 = vcombine.low %v11128_v52, %v11135_v12  ;;  %v11919_v8 = vld [vmem:[%s14907_s12 + $0x20] ss:$0 sps:$4 sm:$0x77]   ;;  %v11265_v7 = vand.u32 127, %v327_v57 }
 0x81d   :  { %v10984_v39 = vcombine.low %v10976_v11, %v10983_v29  ;;  %v11406_v46 = vsel %vm198_vm2, %v11919_v8, 0  ;;  %vm11275_vm2 = vcmask 130112  }
 0x81e   :  { %v11201_v54 = vsel %vm9031_vm3, %v11103_v0, 0.0  ;;  %v11120_v59 = vcombine.low %v11112_v20, %v11119_v25  ;;  %v11207_v3 = vsel %vm11179_vm4, %v11136_v17, 0.0  ;;  %11877 = vmatpush3.bf16.msra.mxu1 %v11406_v46  ;;  %v11270_v36 = vadd.s32 4294967288, %v11265_v7 }
 0x81f   :  { %v11180_v44 = vsel %vm11179_vm4, %v10984_v39, 0.0  ;;  %v11277_v18 = vadd.s32 4294967280, %v11265_v7  ;;  %v11268_v22 = vsub.s32 %v11265_v7, %v12270_v61  ;;  %v11284_v10 = vadd.s32 4294967272, %v11265_v7 }
 0x820   :  { %11202 = vadd.xlane.f32.xlu1 %v11201_v54  ;;  %v11204_v5 = vsel %vm9031_vm3, %v11120_v59, 0.0  ;;  %v11273_v28 = vsub.s32 %v11270_v36, %v12270_v61  ;;  %v11291_v35 = vadd.s32 4294967264, %v11265_v7  ;;  %v11298_v19 = vadd.s32 4294967256, %v11265_v7 }
 0x821   :  { %11205 = vadd.xlane.f32.xlu0 %v11204_v5  ;;  %v11280_v31 = vsub.s32 %v11277_v18, %v12270_v61  ;;  %v11287_v6 = vsub.s32 %v11284_v10, %v12270_v61  ;;  %v11305_v48 = vadd.s32 4294967248, %v11265_v7  ;;  %v11312_v12 = vadd.s32 4294967240, %v11265_v7 }
 0x822   :  { %v11294_v45 = vsub.s32 %v11291_v35, %v12270_v61  ;;  %v11301_v11 = vsub.s32 %v11298_v19, %v12270_v61 }
 0x823   :  { %v11308_v25 = vsub.s32 %v11305_v48, %v12270_v61 }
 0x824   :  { %11181 = vadd.xlane.f32.xlu1 %v11180_v44 }
 0x825   :  { %11208 = vadd.xlane.f32.xlu0 %v11207_v3 }
 0x835   :  { %v11157_v42 = vpop.xlane.xlu0 %11156 }
 0x837   :  { %v11160_v38 = vpop.xlane.xlu1 %11159 }
 0x838   :  { %v11210_v21 = vpack.c.bf16 %v11160_v38, %v11157_v42  ;;  %v11315_v42 = vsub.s32 %v11312_v12, %v12270_v61 }
 0x83a   :  { %v11166_v37 = vpop.xlane.xlu0 %11165  ;;  %v11246_v53 = vunpack.c.l.b16 %v11210_v21  ;;  %v11247_v57 = vunpack.c.h.b16 %v11210_v21 }
 0x83b   :  { %v11163_v63 = vpop.xlane.xlu1 %11162 }
 0x83c   :  { %v11211_v50 = vpack.c.bf16 %v11166_v37, %v11163_v63  ;;  %v11269_v14 = vrot.slane %v11246_v53, %v11268_v22  ;;  %v11274_v34 = vrot.slane %v11247_v57, %v11273_v28  ;;  %v11319_v37 = vadd.s32 4294967232, %v11265_v7 }
 0x83e   :  { %v11248_v47 = vunpack.c.l.b16 %v11211_v50  ;;  %v11249_v62 = vunpack.c.h.b16 %v11211_v50  ;;  %v11276_v0 = vsel %vm11275_vm2, %v11274_v34, %v11269_v14  ;;  %v11322_v7 = vsub.s32 %v11319_v37, %v12270_v61  ;;  %v11573_v34 = vld [vmem:[%s14908_s13] ss:$0 sm:$0xff] }
 0x840   :  { %v11281_v2 = vrot.slane %v11248_v47, %v11280_v31  ;;  %v11288_v20 = vrot.slane %v11249_v62, %v11287_v6 }
 0x842   :  { %v11283_v54 = vsel %vm11282_vm5, %v11281_v2, %v11276_v0 }
 0x843   :  { %v11290_v38 = vsel %vm11289_vm7, %v11288_v20, %v11283_v54 }
 0x84d   :  { %v11169_v9 = vpop.xlane.xlu1 %11168 }
 0x850   :  { %v11172_v32 = vpop.xlane.xlu0 %11171 }
 0x851   :  { %v11212_v26 = vpack.c.bf16 %v11172_v32, %v11169_v9 }
 0x853   :  { %v11250_v51 = vunpack.c.l.b16 %v11212_v26  ;;  %v11251_v29 = vunpack.c.h.b16 %v11212_v26 }
 0x855   :  { %v11295_v59 = vrot.slane %v11250_v51, %v11294_v45 }
 0x857   :  { %v11297_v9 = vsel %vm11296_vm8, %v11295_v59, %v11290_v38 }
 0x865   :  { %v11175_v43 = vpop.xlane.xlu1 %11174 }
 0x868   :  { %v11178_v1 = vpop.xlane.xlu0 %11177 }
 0x869   :  { %v11213_v27 = vpack.c.bf16 %v11178_v1, %v11175_v43  ;;  %v11302_v1 = vrot.slane %v11251_v29, %v11301_v11 }
 0x86b   :  { %v11252_v44 = vunpack.c.l.b16 %v11213_v27  ;;  %v11304_v10 = vsel %vm11303_vm9, %v11302_v1, %v11297_v9 }
 0x86d   :  { %v11309_v43 = vrot.slane %v11252_v44, %v11308_v25 }
 0x891   :  { %v11185_v41 = vpop.xlane.xlu0 %11184 }
 0x897   :  { %v11188_v60 = vpop.xlane.xlu0 %11187 }
 0x898   :  { %v11215_v49 = vpack.c.bf16 %v11188_v60, %v11185_v41  ;;  %v11253_v60 = vunpack.c.h.b16 %v11213_v27 }
 0x89a   :  { %v11255_v56 = vunpack.c.l.b16 %v11215_v49  ;;  %v11256_v40 = vunpack.c.h.b16 %v11215_v49 }
 0x89c   :  { %v11329_v55 = vrot.slane %v11255_v56, %v11268_v22  ;;  %v11333_v4 = vrot.slane %v11256_v40, %v11273_v28 }
 0x89e   :  { %v11334_v39 = vsel %vm11275_vm2, %v11333_v4, %v11329_v55 }
 0x89f   :  { %v11191_v24 = vpop.xlane.xlu1 %11190 }
 0x8a2   :  { %v11194_v30 = vpop.xlane.xlu0 %11193 }
 0x8a3   :  { %v11216_v33 = vpack.c.bf16 %v11194_v30, %v11191_v24  ;;  %v11316_v30 = vrot.slane %v11253_v60, %v11315_v42 }
 0x8a5   :  { %v11257_v58 = vunpack.c.l.b16 %v11216_v33  ;;  %v11258_v23 = vunpack.c.h.b16 %v11216_v33  ;;  %v11311_v33 = vsel %vm11310_vm10, %v11309_v43, %v11304_v10 }
 0x8a6   :  { %v11318_v61 = vsel %vm11317_vm11, %v11316_v30, %v11311_v33 }
 0x8a7   :  { %v11338_v52 = vrot.slane %v11257_v58, %v11280_v31  ;;  %v11343_v5 = vrot.slane %v11258_v23, %v11287_v6 }
 0x8a9   :  { %v11197_v16 = vpop.xlane.xlu1 %11196  ;;  %v11200_v13 = vpop.xlane.xlu0 %11199  ;;  %v11339_v3 = vsel %vm11282_vm5, %v11338_v52, %v11334_v39 }
 0x8aa   :  { %v11217_v17 = vpack.c.bf16 %v11200_v13, %v11197_v16  ;;  %v11344_v36 = vsel %vm11289_vm7, %v11343_v5, %v11339_v3 }
 0x8ac   :  { %v11259_v15 = vunpack.c.l.b16 %v11217_v17  ;;  %v11260_v8 = vunpack.c.h.b16 %v11217_v17 }
 0x8ad   :  { %v11203_v46 = vpop.xlane.xlu1 %11202 }
 0x8ae   :  { %v11206_v32 = vpop.xlane.xlu0 %11205  ;;  %v11348_v63 = vrot.slane %v11259_v15, %v11294_v45  ;;  %v11353_v18 = vrot.slane %v11260_v8, %v11301_v11 }
 0x8af   :  { %v11218_v41 = vpack.c.bf16 %v11206_v32, %v11203_v46 }
 0x8b0   :  { %v11349_v21 = vsel %vm11296_vm8, %v11348_v63, %v11344_v36 }
 0x8b1   :  { %v11182_v50 = vpop.xlane.xlu1 %11181  ;;  %v11261_v49 = vunpack.c.l.b16 %v11218_v41  ;;  %v11262_v22 = vunpack.c.h.b16 %v11218_v41  ;;  %v11354_v53 = vsel %vm11303_vm9, %v11353_v18, %v11349_v21 }
 0x8b2   :  { %v11214_v28 = vpack.c.bf16 %v11182_v50, %v11182_v50  ;;  %v11209_v31 = vpop.xlane.xlu0 %11208 }
 0x8b3   :  { %v11358_v35 = vrot.slane %v11261_v49, %v11308_v25  ;;  %v11219_v24 = vpack.c.bf16 %v11209_v31, %v11209_v31  ;;  %v11363_v47 = vrot.slane %v11262_v22, %v11315_v42 }
 0x8b4   :  { %v11254_v57 = vunpack.c.l.b16 %v11214_v28 }
 0x8b5   :  { %v11359_v26 = vsel %vm11310_vm10, %v11358_v35, %v11354_v53  ;;  %v11263_v56 = vunpack.c.l.b16 %v11219_v24 }
 0x8b6   :  { %v11323_v40 = vrot.slane %v11254_v57, %v11322_v7  ;;  %v11364_v6 = vsel %vm11317_vm11, %v11363_v47, %v11359_v26 }
 0x8b7   :  { %v11368_v58 = vrot.slane %v11263_v56, %v11322_v7 }
 0x8b8   :  { %v11325_v45 = vsel %vm11324_vm12, %v11323_v40, %v11318_v61 }
 0x8b9   :  { %v11369_v19 = vsel %vm11324_vm12, %v11368_v58, %v11364_v6 }
 0x8ba   :  { %v11371_v48 = vsel %vm11370_vm13, %v11369_v19, %v11325_v45 }
 0x8bb   :  { %v11372_v14 = vpack.c.b16 %v11371_v48, %v11371_v48 }
 0x8bd   :  { %11879 = vmatmul.mubr.msk.bf16.vlgmr.msra.gmra.mrb[88].mxu1 %vm11400_vm14, %v11372_v14 }
 0x990   :  { %v11442_v62 = vpop.f32.mrb[88].mxu1 }
 0x991   :  { %v11443_v2 = vadd.f32 %v11573_v34, %v11442_v62  ;;  %v11880_v51 = vpop.f32.mrb[89].mxu1 }
 0x992   :  { %v11445_v55 = vpop.f32.mrb[90].mxu1 }
 0x993   :  { %v11881_v4 = vpop.f32.mrb[91].mxu1  ;;  %11449 = vst.msk [vmem:[#allocation2] sm:$0x3] %vm11448_vm15, %v11443_v2 }
 0x994   :  { %11931 = shalt.err (!%p11928_p4)
}
 0x995   :  { %s11932_s13 = scalar_lea.hbm %s14909_s14, 32 }
 0x996   :  { %p11933_p5 = scmp.ne.s32.totalorder %s14909_s14, %s11932_s13  ;;  %p11936_p6 = scmp.lt.u32.totalorder %s11932_s13, %s14909_s14 }
 0x998   :  { %p11938_p7 = pnand %p11936_p6, %p11933_p5 }
 0x99a   :  { %11941 = shalt.err (!%p11938_p7)
}
 0x99b   :  { %11459 = dma.vmem_to_hbm [thread:$0]  %s11457_s18, 32, %s14909_s14, [#allocation3]  }
 0x99c   :  { %11942 = dma.done.wait [#allocation3], 32  }
 0x99d   :  { %11943 = vsyncadd [#allocation3], 4294967264 }
 0x99e   :  { %11463 = vsyncpa [#allocation3], 1 }

</bundles_post_ra>
